<compile_context>
chip_gen: v6e
topology: v6e:2x2x1
jax: 0.10.0
libtpu: 0.0.40
codegen_flags: <defaults>
</compile_context>

<pallas_src>
import jax
import jax.numpy as jnp
from jax.experimental import pallas as pl
from jax.experimental.pallas import tpu as pltpu

LANE = 128


def _round_up(x, m):
    return ((x + m - 1) // m) * m


def _pad_last(a, new_size):
    pad = new_size - a.shape[-1]
    if pad == 0:
        return a
    cfg = [(0, 0)] * (a.ndim - 1) + [(0, pad)]
    return jnp.pad(a, cfg)


# ----------------------------------------------------------------------------
# BottleneckLSTMCell: one Pallas kernel, grid = (B//Bt, T).  The batch axis is
# "parallel" (megacore), T is the sequential recurrence carried in VMEM.
# ----------------------------------------------------------------------------
def _make_lstm_kernel(Bt, Hh, Ww, Cin_p, Ch_p):
    Npix = Bt * Hh * Ww

    def relu6(v):
        return jnp.minimum(jnp.maximum(v, 0.0), 6.0)

    def kernel(x_ref,
               dwx_ref, dwh_ref, pw1x_ref, pw1h_ref, pb1_ref,
               dw2_ref, pw2_ref, pb2_ref,
               hseq_ref, cfin_ref,
               hid_s, bot_s):
        t = pl.program_id(1)

        @pl.when(t == 0)
        def _():
            # zero initial state; H-halo rows stay zero forever (== conv pad)
            hid_s[...] = jnp.zeros(hid_s.shape, hid_s.dtype)
            bot_s[...] = jnp.zeros(bot_s.shape, bot_s.dtype)
            cfin_ref[...] = jnp.zeros(cfin_ref.shape, cfin_ref.dtype)

        # boundary-column masks for the rolled W taps
        w_ids = jax.lax.broadcasted_iota(jnp.int32, (1, 1, Ww, 1), 2)
        lmask = (w_ids > 0).astype(jnp.float32)
        rmask = (w_ids < Ww - 1).astype(jnp.float32)

        def wshift(src, shift):
            b, h2, _, c = src.shape
            flat = src.reshape(b * h2, Ww, c)
            rolled = pltpu.roll(flat, shift=shift, axis=1)
            return rolled.reshape(b, h2, Ww, c)

        def dw3x3(src, w_ref):
            """Depthwise 3x3, pad=1.  src: (Bt, Hh+2, Ww, C) with zero
            top/bottom halo rows; W taps via XLU roll + boundary mask."""
            left = wshift(src, 1) * lmask          # src[..., w-1, :]
            right = wshift(src, Ww - 1) * rmask    # src[..., w+1, :]  (== roll -1)
            acc = src[:, 0:Hh] * w_ref[0, 1, :]
            acc = acc + left[:, 0:Hh] * w_ref[0, 0, :]
            acc = acc + right[:, 0:Hh] * w_ref[0, 2, :]
            for ky in (1, 2):
                acc = acc + left[:, ky:ky + Hh] * w_ref[ky, 0, :]
                acc = acc + src[:, ky:ky + Hh] * w_ref[ky, 1, :]
                acc = acc + right[:, ky:ky + Hh] * w_ref[ky, 2, :]
            return acc                              # (Bt, Hh, Ww, C)

        xp = x_ref[0].astype(jnp.float32)           # (Bt, Hh+2, Ww, Cin_p)
        hp = hid_s[...]                             # (Bt, Hh+2, Ww, Ch_p)

        # --- bottleneck_conv_depth, split into x-half and hidden-half --------
        acc_x = dw3x3(xp, dwx_ref)                  # (Bt, Hh, Ww, Cin_p)
        acc_h = dw3x3(hp, dwh_ref)                  # (Bt, Hh, Ww, Ch_p)

        # --- bottleneck_conv_point: two lane-aligned bf16 matmuls (MXU) ------
        # (depthwise biases are folded into pb1 at param-prep time)
        bott = (jnp.dot(acc_x.reshape(Npix, Cin_p).astype(jnp.bfloat16),
                        pw1x_ref[...], preferred_element_type=jnp.float32)
                + jnp.dot(acc_h.reshape(Npix, Ch_p).astype(jnp.bfloat16),
                          pw1h_ref[...], preferred_element_type=jnp.float32)
                + pb1_ref[...])                     # (Npix, Ch_p)

        # --- lstm_conv_depth: via the H-halo bottleneck scratch --------------
        bot_s[:, 1:Hh + 1] = bott.reshape(Bt, Hh, Ww, Ch_p)
        acc2 = dw3x3(bot_s[...], dw2_ref)           # (Bt, Hh, Ww, Ch_p)
        acc2b = acc2.reshape(Npix, Ch_p).astype(jnp.bfloat16)

        # --- lstm_conv_point: gate-by-gate (bounds live VMEM) ----------------
        def gate(g):                                # gate order: i, j, f, o
            return (jnp.dot(acc2b, pw2_ref[g],
                            preferred_element_type=jnp.float32)
                    + pb2_ref[g])                   # (Npix, Ch_p)

        cell = cfin_ref[...].reshape(Npix, Ch_p)
        new_cell = cell * jax.nn.sigmoid(gate(2))   # forget_bias folded in pb2
        new_cell = new_cell + jax.nn.sigmoid(gate(0)) * relu6(gate(1))
        # clip_state=False in the reference config -> no clamp
        new_hidden = relu6(new_cell) * jax.nn.sigmoid(gate(3))

        cfin_ref[...] = new_cell.reshape(Bt, Hh, Ww, Ch_p)
        nh4 = new_hidden.reshape(Bt, Hh, Ww, Ch_p)
        hid_s[:, 1:Hh + 1] = nh4                    # aligned full-width rows
        hseq_ref[0] = nh4.astype(hseq_ref.dtype)    # bf16, lane-dense

    return kernel


def _lstm_vmem_estimate(Bt, Hh, Ww, Cin_p, Ch_p):
    px_in = Bt * (Hh + 2) * Ww
    px = Bt * Hh * Ww
    blocks = (2 * px_in * Cin_p * 2            # x (bf16, double buffered)
              + 2 * px * Ch_p * 2              # h_seq (bf16, double buffered)
              + 2 * px * Ch_p * 4)             # cfin (resident, generous)
    scratch = 2 * px_in * Ch_p * 4             # hid_s + bot_s
    weights = 2 * (9 * (Cin_p + 2 * Ch_p) * 4
                   + (Cin_p + Ch_p) * Ch_p * 2
                   + 4 * Ch_p * Ch_p * 2
                   + 5 * Ch_p * 4)
    live = px * (Cin_p * 4 + 8 * Ch_p * 4)     # depthwise accs + gate temps
    return int(1.5 * (blocks + scratch + weights + live)) + (2 << 20)


def run_bottleneck_lstm(x_seq_nhwc, params, *, block_b=None,
                        vmem_limit_bytes=None):
    """x_seq_nhwc: (T, B, H, W, Cin) f32.

    Returns (h_seq (T,B,H,W,Ch_p) bf16, final_cell (B,H,W,Ch_p) f32),
    channel lane-padded.  W should preferably be a multiple of 8."""
    T, B, Hh, Ww, Cin = x_seq_nhwc.shape
    Cin_p = params['pw1_x'].shape[0]
    Ch_p = params['pw1_h'].shape[0]

    if block_b is None:
        Bt = 1
        for cand in (4, 2):
            if B % cand == 0 and B // cand >= 2:
                Bt = cand
                break
    else:
        Bt = block_b if (block_b > 0 and B % block_b == 0) else 1

    # One-time pad (outside the recurrence): 1-row H halo + lane padding, bf16.
    xpad = jnp.pad(x_seq_nhwc,
                   ((0, 0), (0, 0), (1, 1), (0, 0), (0, Cin_p - Cin))
                   ).astype(jnp.bfloat16)

    if vmem_limit_bytes is None:
        est = _lstm_vmem_estimate(Bt, Hh, Ww, Cin_p, Ch_p)
        if est > (12 << 20):
            vmem_limit_bytes = min(est, 64 << 20)

    kernel = _make_lstm_kernel(Bt, Hh, Ww, Cin_p, Ch_p)
    w_spec = lambda shape: pl.BlockSpec(shape, lambda b, t: (0,) * len(shape))

    grid_spec = pltpu.PrefetchScalarGridSpec(
        num_scalar_prefetch=0,
        grid=(B // Bt, T),
        in_specs=[
            pl.BlockSpec((1, Bt, Hh + 2, Ww, Cin_p),
                         lambda b, t: (t, b, 0, 0, 0)),
            w_spec((3, 3, Cin_p)),        # dwx_w
            w_spec((3, 3, Ch_p)),         # dwh_w
            w_spec((Cin_p, Ch_p)),        # pw1_x (bf16)
            w_spec((Ch_p, Ch_p)),         # pw1_h (bf16)
            w_spec((1, Ch_p)),            # pb1   (folded)
            w_spec((3, 3, Ch_p)),         # dw2_w
            w_spec((4, Ch_p, Ch_p)),      # pw2   (bf16, per gate)
            w_spec((4, 1, Ch_p)),         # pb2   (folded, per gate)
        ],
        out_specs=(
            pl.BlockSpec((1, Bt, Hh, Ww, Ch_p), lambda b, t: (t, b, 0, 0, 0)),
            pl.BlockSpec((Bt, Hh, Ww, Ch_p), lambda b, t: (b, 0, 0, 0)),
        ),
        scratch_shapes=[
            pltpu.VMEM((Bt, Hh + 2, Ww, Ch_p), jnp.float32),  # hidden + H halo
            pltpu.VMEM((Bt, Hh + 2, Ww, Ch_p), jnp.float32),  # bottleneck + halo
        ],
    )
    out_shape = (
        jax.ShapeDtypeStruct((T, B, Hh, Ww, Ch_p), jnp.bfloat16),  # hidden/step
        jax.ShapeDtypeStruct((B, Hh, Ww, Ch_p), jnp.float32),      # final cell
    )
    h_seq, c_fin = pl.pallas_call(
        kernel,
        out_shape=out_shape,
        grid_spec=grid_spec,
        compiler_params=pltpu.CompilerParams(
            dimension_semantics=("parallel", "arbitrary"),
            vmem_limit_bytes=vmem_limit_bytes),
    )(xpad,
      params['dwx_w'], params['dwh_w'],
      params['pw1_x'], params['pw1_h'], params['pb1'],
      params['dw2_w'], params['pw2'], params['pb2'])
    return h_seq, c_fin


# ----------------------------------------------------------------------------
# Extra conv (type '2' layers): 3x3 conv, stride 2, pad 1, ReLU.
# Taps folded into the matmul K dim: one (tile_m, 9*Cp) @ (9*Cp, Cp) dot.
# ----------------------------------------------------------------------------
def _extra_conv_kernel(t_ref, w_ref, b_ref, o_ref):
    o_ref[...] = jnp.maximum(
        jnp.dot(t_ref[...], w_ref[...], preferred_element_type=jnp.float32)
        + b_ref[...], 0.0)


def extra_conv_relu(feats, wk, b, *, tile_m=None, vmem_limit_bytes=None):
    """feats: (N, H, W, Cp) lane-padded NHWC; wk: (9*Cp, Cp) bf16; b: (1, Cp)."""
    N, Hh, Ww, Cp = feats.shape
    assert wk.shape == (9 * Cp, Cp)
    Ho, Wo = (Hh + 1) // 2, (Ww + 1) // 2
    xp = jnp.pad(feats.astype(jnp.bfloat16), ((0, 0), (1, 1), (1, 1), (0, 0)))
    # TODO(synk): build these stride-2 taps in-kernel (strided pl.ds reads over
    # a row-tiled padded input) to avoid the ~2.25x HBM materialization.
    taps = jnp.concatenate(
        [xp[:, ky:ky + 2 * Ho - 1:2, kx:kx + 2 * Wo - 1:2, :]
         for ky in range(3) for kx in range(3)],
        axis=-1).reshape(N * Ho * Wo, 9 * Cp)                     # (M, 9*Cp)
    M = N * Ho * Wo
    if tile_m is None:
        tile_m = 256 if Cp >= 512 else 512
    tile_m = min(tile_m, _round_up(M, 8))
    Mp = _round_up(M, tile_m)
    if Mp != M:
        taps = jnp.pad(taps, ((0, Mp - M), (0, 0)))

    if vmem_limit_bytes is None:
        est = int(1.5 * (2 * tile_m * 9 * Cp * 2 + 2 * 9 * Cp * Cp * 2
                         + 2 * tile_m * Cp * 4 + 2 * Cp * 4)) + (2 << 20)
        if est > (12 << 20):
            vmem_limit_bytes = min(est, 64 << 20)

    out = pl.pallas_call(
        _extra_conv_kernel,
        out_shape=jax.ShapeDtypeStruct((Mp, Cp), jnp.float32),
        grid_spec=pltpu.PrefetchScalarGridSpec(
            num_scalar_prefetch=0,
            grid=(Mp // tile_m,),
            in_specs=[
                pl.BlockSpec((tile_m, 9 * Cp), lambda m: (m, 0)),
                pl.BlockSpec((9 * Cp, Cp), lambda m: (0, 0)),
                pl.BlockSpec((1, Cp), lambda m: (0, 0)),
            ],
            out_specs=pl.BlockSpec((tile_m, Cp), lambda m: (m, 0)),
        ),
        compiler_params=pltpu.CompilerParams(
            dimension_semantics=("parallel",),
            vmem_limit_bytes=vmem_limit_bytes),
    )(taps, wk, b)
    return out[:M].reshape(N, Ho, Wo, Cp)


# ----------------------------------------------------------------------------
# Decoder wrapper (parameter setup + per-level dispatch = glue).
# ----------------------------------------------------------------------------
class BottleneckLSTMDecoderPallas:
    def __init__(self, in_channels, lstm_cfgs, out_layers_type, key,
                 forget_bias=1.0):
        assert len(in_channels) == len(out_layers_type)
        self.out_layers_type = out_layers_type
        num_lstms = sum(1 for t in out_layers_type if t == 1)
        assert len(lstm_cfgs) == num_lstms

        def nrm(k, shape, scale):
            return scale * jax.random.normal(k, shape, jnp.float32)

        # ---- LSTM cells: split x/hidden halves, lane pad, fold biases -------
        self.lstm_params = []
        self.lstm_dims = []
        for cfg in lstm_cfgs:
            Cin, Ch = cfg['in_channels'], cfg['hidden_size']
            fb = cfg.get('forget_bias', forget_bias)
            Cin_p, Ch_p = _round_up(Cin, LANE), _round_up(Ch, LANE)
            key, *ks = jax.random.split(key, 9)
            dw1_w = nrm(ks[0], (3, 3, Cin + Ch), 0.1)
            dw1_b = nrm(ks[1], (Cin + Ch,), 0.01)
            pw1_w = nrm(ks[2], (Cin + Ch, Ch), 0.1)
            pw1_b = nrm(ks[3], (Ch,), 0.01)
            dw2_w = nrm(ks[4], (3, 3, Ch), 0.1)
            dw2_b = nrm(ks[5], (Ch,), 0.01)
            pw2_w = nrm(ks[6], (Ch, 4 * Ch), 0.1)
            pw2_b = nrm(ks[7], (4 * Ch,), 0.01)

            # Fold depthwise biases (and forget_bias, gate order i,j,f,o) into
            # the pointwise biases -- the pointwise convs are linear.
            pb1_f = pw1_b + dw1_b @ pw1_w                    # (Ch,)
            pb2_f = pw2_b + dw2_b @ pw2_w                    # (4*Ch,)
            pw2_gates, pb2_gates = [], []
            for g in range(4):
                col = pw2_w[:, g * Ch:(g + 1) * Ch]
                bg = pb2_f[g * Ch:(g + 1) * Ch]
                if g == 2:                                   # forget gate
                    bg = bg + fb
                pw2_gates.append(jnp.pad(col, ((0, Ch_p - Ch), (0, Ch_p - Ch))))
                pb2_gates.append(jnp.pad(bg, (0, Ch_p - Ch)))

            self.lstm_params.append(dict(
                dwx_w=_pad_last(dw1_w[..., :Cin], Cin_p),
                dwh_w=_pad_last(dw1_w[..., Cin:], Ch_p),
                pw1_x=jnp.pad(pw1_w[:Cin],
                              ((0, Cin_p - Cin), (0, Ch_p - Ch))
                              ).astype(jnp.bfloat16),
                pw1_h=jnp.pad(pw1_w[Cin:],
                              ((0, Ch_p - Ch), (0, Ch_p - Ch))
                              ).astype(jnp.bfloat16),
                pb1=_pad_last(pb1_f, Ch_p).reshape(1, Ch_p),
                dw2_w=_pad_last(dw2_w, Ch_p),
                pw2=jnp.stack(pw2_gates, axis=0).astype(jnp.bfloat16),
                pb2=jnp.stack(pb2_gates, axis=0).reshape(4, 1, Ch_p),
            ))
            self.lstm_dims.append((Cin, Ch, Cin_p, Ch_p))

        # ---- extra stride-2 convs -------------------------------------------
        self.extra_params = []
        for lvl, tp in enumerate(out_layers_type):
            if tp == 2:
                C = in_channels[lvl]
                Cp = _round_up(C, LANE)
                key, k1, k2 = jax.random.split(key, 3)
                w = nrm(k1, (3, 3, C, C), 0.1)
                bb = nrm(k2, (C,), 0.01)
                w_p = jnp.pad(w, ((0, 0), (0, 0), (0, Cp - C), (0, Cp - C)))
                self.extra_params.append(dict(
                    wk=w_p.reshape(9 * Cp, Cp).astype(jnp.bfloat16),
                    b=_pad_last(bb, Cp).reshape(1, Cp),
                    C=C, Cp=Cp))

    def __call__(self, input_list):
        """input_list: list of (T, B, C, H, W) arrays (NCHW per frame)."""
        final_outs = []
        out_states = []
        lstm_level = 0
        extra_level = 0
        feats_p = None                 # (T*B, H, W, Cp) NHWC, lane-padded
        for lvl, inputs in enumerate(input_list):
            tp = self.out_layers_type[lvl]
            if tp == 0:
                T, B, C, H, W = inputs.shape
                out = inputs.reshape(T * B, C, H, W)
            elif tp == 1:
                Cin, Ch, Cin_p, Ch_p = self.lstm_dims[lstm_level]
                T, B, C, H, W = inputs.shape
                x = jnp.transpose(inputs, (0, 1, 3, 4, 2))       # (T,B,H,W,C)
                h_seq_p, c_fin_p = run_bottleneck_lstm(
                    x, self.lstm_params[lstm_level])
                feats_p = h_seq_p.reshape(T * B, H, W, Ch_p)     # keep padded
                out = jnp.transpose(feats_p[..., :Ch],
                                    (0, 3, 1, 2)).astype(jnp.float32)
                out_states.append(dict(
                    cell=jnp.transpose(c_fin_p[..., :Ch], (0, 3, 1, 2)),
                    hidden=jnp.transpose(h_seq_p[-1, :, :, :, :Ch],
                                         (0, 3, 1, 2)).astype(jnp.float32)))
                lstm_level += 1
            else:  # tp == 2: conv (stride 2) + relu on previous feats
                p = self.extra_params[extra_level]
                feats_p = extra_conv_relu(feats_p, p['wk'], p['b'])
                out = jnp.transpose(feats_p[..., :p['C']], (0, 3, 1, 2))
                extra_level += 1
            final_outs.append(out)
        return final_outs, dict(state_dict_lists=out_states)


if __name__ == "__main__":
    key = jax.random.PRNGKey(0)
    T, B = 3, 2
    in_channels = [8, 8, 8]
    out_layers_type = [0, 1, 2]
    lstm_cfgs = [dict(in_channels=8, hidden_size=8)]
    shapes = [(T, B, 8, 16, 16), (T, B, 8, 8, 8), (T, B, 8, 4, 4)]

    key, pkey, *dks = jax.random.split(key, len(shapes) + 2)
    input_list = [jax.random.normal(dks[i], s, jnp.float32)
                  for i, s in enumerate(shapes)]

    decoder = BottleneckLSTMDecoderPallas(in_channels, lstm_cfgs,
                                          out_layers_type, pkey)
    final_outs, out_dict = decoder(input_list)
    jax.block_until_ready(final_outs)
    jax.block_until_ready(out_dict)

    assert final_outs[0].shape == (T * B, 8, 16, 16)
    assert final_outs[1].shape == (T * B, 8, 8, 8)
    assert final_outs[2].shape == (T * B, 8, 4, 4)
    assert out_dict['state_dict_lists'][0]['cell'].shape == (B, 8, 8, 8)
    assert out_dict['state_dict_lists'][0]['hidden'].shape == (B, 8, 8, 8)
    print("KERNEL_OK")
</pallas_src>

<mosaic_0001>
module attributes {stable_mosaic.version = 11 : i64} {
  func.func @kernel(%arg0: i32, %arg1: i32, %arg2: memref<1x1x10x8x128xbf16, #tpu.memory_space<vmem>>, %arg3: memref<3x3x128xf32, #tpu.memory_space<vmem>>, %arg4: memref<3x3x128xf32, #tpu.memory_space<vmem>>, %arg5: memref<128x128xbf16, #tpu.memory_space<vmem>>, %arg6: memref<128x128xbf16, #tpu.memory_space<vmem>>, %arg7: memref<1x128xf32, #tpu.memory_space<vmem>>, %arg8: memref<3x3x128xf32, #tpu.memory_space<vmem>>, %arg9: memref<4x128x128xbf16, #tpu.memory_space<vmem>>, %arg10: memref<4x1x128xf32, #tpu.memory_space<vmem>>, %arg11: memref<1x1x8x8x128xbf16, #tpu.memory_space<vmem>>, %arg12: memref<1x8x8x128xf32, #tpu.memory_space<vmem>>, %arg13: memref<1x10x8x128xf32, #tpu.memory_space<vmem>>, %arg14: memref<1x10x8x128xf32, #tpu.memory_space<vmem>>) attributes {dimension_semantics = [#tpu.dimension_semantics<parallel>, #tpu.dimension_semantics<arbitrary>], iteration_bounds = array<i64: 2, 3>, scalar_prefetch = 0 : i64, scratch_operands = 2 : i64, tpu.core_type = #tpu.core_type<tc>, window_params = [{transform_indices = @transform_0, window_bounds = array<i64: 1, 1, 10, 8, 128>}, {pipeline_mode = #tpu.pipeline_mode<synchronous>, transform_indices = @transform_1, window_bounds = array<i64: 3, 3, 128>}, {pipeline_mode = #tpu.pipeline_mode<synchronous>, transform_indices = @transform_2, window_bounds = array<i64: 3, 3, 128>}, {pipeline_mode = #tpu.pipeline_mode<synchronous>, transform_indices = @transform_3, window_bounds = array<i64: 128, 128>}, {pipeline_mode = #tpu.pipeline_mode<synchronous>, transform_indices = @transform_4, window_bounds = array<i64: 128, 128>}, {pipeline_mode = #tpu.pipeline_mode<synchronous>, transform_indices = @transform_5, window_bounds = array<i64: 1, 128>}, {pipeline_mode = #tpu.pipeline_mode<synchronous>, transform_indices = @transform_6, window_bounds = array<i64: 3, 3, 128>}, {pipeline_mode = #tpu.pipeline_mode<synchronous>, transform_indices = @transform_7, window_bounds = array<i64: 4, 128, 128>}, {pipeline_mode = #tpu.pipeline_mode<synchronous>, transform_indices = @transform_8, window_bounds = array<i64: 4, 1, 128>}, {transform_indices = @transform_9, window_bounds = array<i64: 1, 1, 8, 8, 128>}, {transform_indices = @transform_10, window_bounds = array<i64: 1, 8, 8, 128>}]} {
    %c0_i32 = arith.constant 0 : i32
    %0 = arith.cmpi eq, %arg1, %c0_i32 : i32
    %1 = arith.extui %0 : i1 to i32
    %c0_i32_0 = arith.constant 0 : i32
    %2 = arith.cmpi ne, %1, %c0_i32_0 : i32
    scf.if %2 {
      %cst_160 = arith.constant 0.000000e+00 : f32
      %314 = vector.broadcast %cst_160 : f32 to vector<1x10x8x128xf32>
      %c0_161 = arith.constant 0 : index
      %c0_162 = arith.constant 0 : index
      %c0_163 = arith.constant 0 : index
      %c0_164 = arith.constant 0 : index
      %315 = vector.load %arg13[%c0_161, %c0_162, %c0_163, %c0_164] : memref<1x10x8x128xf32, #tpu.memory_space<vmem>>, vector<1x10x8x128xf32>
      tpu.vector_store %arg13[%c0_161, %c0_162, %c0_163, %c0_164], %314 {strides = array<i32>} : memref<1x10x8x128xf32, #tpu.memory_space<vmem>>, vector<1x10x8x128xf32>,
      %cst_165 = arith.constant 0.000000e+00 : f32
      %316 = vector.broadcast %cst_165 : f32 to vector<1x10x8x128xf32>
      %c0_166 = arith.constant 0 : index
      %c0_167 = arith.constant 0 : index
      %c0_168 = arith.constant 0 : index
      %c0_169 = arith.constant 0 : index
      %317 = vector.load %arg14[%c0_166, %c0_167, %c0_168, %c0_169] : memref<1x10x8x128xf32, #tpu.memory_space<vmem>>, vector<1x10x8x128xf32>
      tpu.vector_store %arg14[%c0_166, %c0_167, %c0_168, %c0_169], %316 {strides = array<i32>} : memref<1x10x8x128xf32, #tpu.memory_space<vmem>>, vector<1x10x8x128xf32>,
      %cst_170 = arith.constant 0.000000e+00 : f32
      %318 = vector.broadcast %cst_170 : f32 to vector<1x8x8x128xf32>
      %c0_171 = arith.constant 0 : index
      %c0_172 = arith.constant 0 : index
      %c0_173 = arith.constant 0 : index
      %c0_174 = arith.constant 0 : index
      %319 = vector.load %arg12[%c0_171, %c0_172, %c0_173, %c0_174] : memref<1x8x8x128xf32, #tpu.memory_space<vmem>>, vector<1x8x8x128xf32>
      tpu.vector_store %arg12[%c0_171, %c0_172, %c0_173, %c0_174], %318 {strides = array<i32>} : memref<1x8x8x128xf32, #tpu.memory_space<vmem>>, vector<1x8x8x128xf32>,
    } else {
    }
    %3 = tpu.iota {dimensions = array<i32: 2>} : vector<1x1x8x1xi32>
    %c0_i32_1 = arith.constant 0 : i32
    %4 = vector.broadcast %c0_i32_1 : i32 to vector<1x1x8x1xi32>
    %5 = arith.cmpi sgt, %3, %4 : vector<1x1x8x1xi32>
    %6 = arith.extui %5 : vector<1x1x8x1xi1> to vector<1x1x8x1xi32>
    %7 = arith.sitofp %6 : vector<1x1x8x1xi32> to vector<1x1x8x1xf32>
    %c7_i32 = arith.constant 7 : i32
    %8 = vector.broadcast %c7_i32 : i32 to vector<1x1x8x1xi32>
    %9 = arith.cmpi slt, %3, %8 : vector<1x1x8x1xi32>
    %10 = arith.extui %9 : vector<1x1x8x1xi1> to vector<1x1x8x1xi32>
    %11 = arith.sitofp %10 : vector<1x1x8x1xi32> to vector<1x1x8x1xf32>
    %c0 = arith.constant 0 : index
    %c0_2 = arith.constant 0 : index
    %c0_3 = arith.constant 0 : index
    %c0_4 = arith.constant 0 : index
    %c0_5 = arith.constant 0 : index
    %12 = vector.load %arg2[%c0, %c0_2, %c0_3, %c0_4, %c0_5] : memref<1x1x10x8x128xbf16, #tpu.memory_space<vmem>>, vector<1x1x10x8x128xbf16>
    %13 = vector.shape_cast %12 : vector<1x1x10x8x128xbf16> to vector<1x10x8x128xbf16>
    %14 = arith.extf %13 : vector<1x10x8x128xbf16> to vector<1x10x8x128xf32>
    %c0_6 = arith.constant 0 : index
    %c0_7 = arith.constant 0 : index
    %c0_8 = arith.constant 0 : index
    %c0_9 = arith.constant 0 : index
    %15 = vector.load %arg13[%c0_6, %c0_7, %c0_8, %c0_9] : memref<1x10x8x128xf32, #tpu.memory_space<vmem>>, vector<1x10x8x128xf32>
    %16 = vector.shape_cast %14 : vector<1x10x8x128xf32> to vector<10x8x128xf32>
    %c1_i32 = arith.constant 1 : i32
    %17 = tpu.dynamic_rotate %16 by %c1_i32 dim 1 : vector<10x8x128xf32>, i32 -> vector<10x8x128xf32>
    %18 = vector.shape_cast %17 : vector<10x8x128xf32> to vector<1x10x8x128xf32>
    %19 = vector.broadcast %7 : vector<1x1x8x1xf32> to vector<1x10x8x128xf32>
    %20 = arith.mulf %18, %19 : vector<1x10x8x128xf32>
    %21 = vector.shape_cast %14 : vector<1x10x8x128xf32> to vector<10x8x128xf32>
    %c7_i32_10 = arith.constant 7 : i32
    %22 = tpu.dynamic_rotate %21 by %c7_i32_10 dim 1 : vector<10x8x128xf32>, i32 -> vector<10x8x128xf32>
    %23 = vector.shape_cast %22 : vector<10x8x128xf32> to vector<1x10x8x128xf32>
    %24 = vector.broadcast %11 : vector<1x1x8x1xf32> to vector<1x10x8x128xf32>
    %25 = arith.mulf %23, %24 : vector<1x10x8x128xf32>
    %26 = vector.extract_strided_slice %14 {offsets = [0, 0, 0, 0], sizes = [1, 8, 8, 128], strides = [1, 1, 1, 1]} : vector<1x10x8x128xf32> to vector<1x8x8x128xf32>
    %c0_11 = arith.constant 0 : index
    %c1 = arith.constant 1 : index
    %c0_12 = arith.constant 0 : index
    %27 = vector.load %arg3[%c0_11, %c1, %c0_12] : memref<3x3x128xf32, #tpu.memory_space<vmem>>, vector<1x1x128xf32>
    %28 = vector.shape_cast %27 : vector<1x1x128xf32> to vector<128xf32>
    %29 = vector.shape_cast %28 : vector<128xf32> to vector<1x1x1x128xf32>
    %30 = vector.broadcast %29 : vector<1x1x1x128xf32> to vector<1x8x8x128xf32>
    %31 = arith.mulf %26, %30 : vector<1x8x8x128xf32>
    %32 = vector.extract_strided_slice %20 {offsets = [0, 0, 0, 0], sizes = [1, 8, 8, 128], strides = [1, 1, 1, 1]} : vector<1x10x8x128xf32> to vector<1x8x8x128xf32>
    %c0_13 = arith.constant 0 : index
    %c0_14 = arith.constant 0 : index
    %c0_15 = arith.constant 0 : index
    %33 = vector.load %arg3[%c0_13, %c0_14, %c0_15] : memref<3x3x128xf32, #tpu.memory_space<vmem>>, vector<1x1x128xf32>
    %34 = vector.shape_cast %33 : vector<1x1x128xf32> to vector<128xf32>
    %35 = vector.shape_cast %34 : vector<128xf32> to vector<1x1x1x128xf32>
    %36 = vector.broadcast %35 : vector<1x1x1x128xf32> to vector<1x8x8x128xf32>
    %37 = arith.mulf %32, %36 : vector<1x8x8x128xf32>
    %38 = arith.addf %31, %37 : vector<1x8x8x128xf32>
    %39 = vector.extract_strided_slice %25 {offsets = [0, 0, 0, 0], sizes = [1, 8, 8, 128], strides = [1, 1, 1, 1]} : vector<1x10x8x128xf32> to vector<1x8x8x128xf32>
    %c0_16 = arith.constant 0 : index
    %c2 = arith.constant 2 : index
    %c0_17 = arith.constant 0 : index
    %40 = vector.load %arg3[%c0_16, %c2, %c0_17] : memref<3x3x128xf32, #tpu.memory_space<vmem>>, vector<1x1x128xf32>
    %41 = vector.shape_cast %40 : vector<1x1x128xf32> to vector<128xf32>
    %42 = vector.shape_cast %41 : vector<128xf32> to vector<1x1x1x128xf32>
    %43 = vector.broadcast %42 : vector<1x1x1x128xf32> to vector<1x8x8x128xf32>
    %44 = arith.mulf %39, %43 : vector<1x8x8x128xf32>
    %45 = arith.addf %38, %44 : vector<1x8x8x128xf32>
    %46 = vector.extract_strided_slice %20 {offsets = [0, 1, 0, 0], sizes = [1, 8, 8, 128], strides = [1, 1, 1, 1]} : vector<1x10x8x128xf32> to vector<1x8x8x128xf32>
    %c1_18 = arith.constant 1 : index
    %c0_19 = arith.constant 0 : index
    %c0_20 = arith.constant 0 : index
    %47 = vector.load %arg3[%c1_18, %c0_19, %c0_20] : memref<3x3x128xf32, #tpu.memory_space<vmem>>, vector<1x1x128xf32>
    %48 = vector.shape_cast %47 : vector<1x1x128xf32> to vector<128xf32>
    %49 = vector.shape_cast %48 : vector<128xf32> to vector<1x1x1x128xf32>
    %50 = vector.broadcast %49 : vector<1x1x1x128xf32> to vector<1x8x8x128xf32>
    %51 = arith.mulf %46, %50 : vector<1x8x8x128xf32>
    %52 = arith.addf %45, %51 : vector<1x8x8x128xf32>
    %53 = vector.extract_strided_slice %14 {offsets = [0, 1, 0, 0], sizes = [1, 8, 8, 128], strides = [1, 1, 1, 1]} : vector<1x10x8x128xf32> to vector<1x8x8x128xf32>
    %c1_21 = arith.constant 1 : index
    %c1_22 = arith.constant 1 : index
    %c0_23 = arith.constant 0 : index
    %54 = vector.load %arg3[%c1_21, %c1_22, %c0_23] : memref<3x3x128xf32, #tpu.memory_space<vmem>>, vector<1x1x128xf32>
    %55 = vector.shape_cast %54 : vector<1x1x128xf32> to vector<128xf32>
    %56 = vector.shape_cast %55 : vector<128xf32> to vector<1x1x1x128xf32>
    %57 = vector.broadcast %56 : vector<1x1x1x128xf32> to vector<1x8x8x128xf32>
    %58 = arith.mulf %53, %57 : vector<1x8x8x128xf32>
    %59 = arith.addf %52, %58 : vector<1x8x8x128xf32>
    %60 = vector.extract_strided_slice %25 {offsets = [0, 1, 0, 0], sizes = [1, 8, 8, 128], strides = [1, 1, 1, 1]} : vector<1x10x8x128xf32> to vector<1x8x8x128xf32>
    %c1_24 = arith.constant 1 : index
    %c2_25 = arith.constant 2 : index
    %c0_26 = arith.constant 0 : index
    %61 = vector.load %arg3[%c1_24, %c2_25, %c0_26] : memref<3x3x128xf32, #tpu.memory_space<vmem>>, vector<1x1x128xf32>
    %62 = vector.shape_cast %61 : vector<1x1x128xf32> to vector<128xf32>
    %63 = vector.shape_cast %62 : vector<128xf32> to vector<1x1x1x128xf32>
    %64 = vector.broadcast %63 : vector<1x1x1x128xf32> to vector<1x8x8x128xf32>
    %65 = arith.mulf %60, %64 : vector<1x8x8x128xf32>
    %66 = arith.addf %59, %65 : vector<1x8x8x128xf32>
    %67 = vector.extract_strided_slice %20 {offsets = [0, 2, 0, 0], sizes = [1, 8, 8, 128], strides = [1, 1, 1, 1]} : vector<1x10x8x128xf32> to vector<1x8x8x128xf32>
    %c2_27 = arith.constant 2 : index
    %c0_28 = arith.constant 0 : index
    %c0_29 = arith.constant 0 : index
    %68 = vector.load %arg3[%c2_27, %c0_28, %c0_29] : memref<3x3x128xf32, #tpu.memory_space<vmem>>, vector<1x1x128xf32>
    %69 = vector.shape_cast %68 : vector<1x1x128xf32> to vector<128xf32>
    %70 = vector.shape_cast %69 : vector<128xf32> to vector<1x1x1x128xf32>
    %71 = vector.broadcast %70 : vector<1x1x1x128xf32> to vector<1x8x8x128xf32>
    %72 = arith.mulf %67, %71 : vector<1x8x8x128xf32>
    %73 = arith.addf %66, %72 : vector<1x8x8x128xf32>
    %74 = vector.extract_strided_slice %14 {offsets = [0, 2, 0, 0], sizes = [1, 8, 8, 128], strides = [1, 1, 1, 1]} : vector<1x10x8x128xf32> to vector<1x8x8x128xf32>
    %c2_30 = arith.constant 2 : index
    %c1_31 = arith.constant 1 : index
    %c0_32 = arith.constant 0 : index
    %75 = vector.load %arg3[%c2_30, %c1_31, %c0_32] : memref<3x3x128xf32, #tpu.memory_space<vmem>>, vector<1x1x128xf32>
    %76 = vector.shape_cast %75 : vector<1x1x128xf32> to vector<128xf32>
    %77 = vector.shape_cast %76 : vector<128xf32> to vector<1x1x1x128xf32>
    %78 = vector.broadcast %77 : vector<1x1x1x128xf32> to vector<1x8x8x128xf32>
    %79 = arith.mulf %74, %78 : vector<1x8x8x128xf32>
    %80 = arith.addf %73, %79 : vector<1x8x8x128xf32>
    %81 = vector.extract_strided_slice %25 {offsets = [0, 2, 0, 0], sizes = [1, 8, 8, 128], strides = [1, 1, 1, 1]} : vector<1x10x8x128xf32> to vector<1x8x8x128xf32>
    %c2_33 = arith.constant 2 : index
    %c2_34 = arith.constant 2 : index
    %c0_35 = arith.constant 0 : index
    %82 = vector.load %arg3[%c2_33, %c2_34, %c0_35] : memref<3x3x128xf32, #tpu.memory_space<vmem>>, vector<1x1x128xf32>
    %83 = vector.shape_cast %82 : vector<1x1x128xf32> to vector<128xf32>
    %84 = vector.shape_cast %83 : vector<128xf32> to vector<1x1x1x128xf32>
    %85 = vector.broadcast %84 : vector<1x1x1x128xf32> to vector<1x8x8x128xf32>
    %86 = arith.mulf %81, %85 : vector<1x8x8x128xf32>
    %87 = arith.addf %80, %86 : vector<1x8x8x128xf32>
    %88 = vector.shape_cast %15 : vector<1x10x8x128xf32> to vector<10x8x128xf32>
    %c1_i32_36 = arith.constant 1 : i32
    %89 = tpu.dynamic_rotate %88 by %c1_i32_36 dim 1 : vector<10x8x128xf32>, i32 -> vector<10x8x128xf32>
    %90 = vector.shape_cast %89 : vector<10x8x128xf32> to vector<1x10x8x128xf32>
    %91 = vector.broadcast %7 : vector<1x1x8x1xf32> to vector<1x10x8x128xf32>
    %92 = arith.mulf %90, %91 : vector<1x10x8x128xf32>
    %93 = vector.shape_cast %15 : vector<1x10x8x128xf32> to vector<10x8x128xf32>
    %c7_i32_37 = arith.constant 7 : i32
    %94 = tpu.dynamic_rotate %93 by %c7_i32_37 dim 1 : vector<10x8x128xf32>, i32 -> vector<10x8x128xf32>
    %95 = vector.shape_cast %94 : vector<10x8x128xf32> to vector<1x10x8x128xf32>
    %96 = vector.broadcast %11 : vector<1x1x8x1xf32> to vector<1x10x8x128xf32>
    %97 = arith.mulf %95, %96 : vector<1x10x8x128xf32>
    %98 = vector.extract_strided_slice %15 {offsets = [0, 0, 0, 0], sizes = [1, 8, 8, 128], strides = [1, 1, 1, 1]} : vector<1x10x8x128xf32> to vector<1x8x8x128xf32>
    %c0_38 = arith.constant 0 : index
    %c1_39 = arith.constant 1 : index
    %c0_40 = arith.constant 0 : index
    %99 = vector.load %arg4[%c0_38, %c1_39, %c0_40] : memref<3x3x128xf32, #tpu.memory_space<vmem>>, vector<1x1x128xf32>
    %100 = vector.shape_cast %99 : vector<1x1x128xf32> to vector<128xf32>
    %101 = vector.shape_cast %100 : vector<128xf32> to vector<1x1x1x128xf32>
    %102 = vector.broadcast %101 : vector<1x1x1x128xf32> to vector<1x8x8x128xf32>
    %103 = arith.mulf %98, %102 : vector<1x8x8x128xf32>
    %104 = vector.extract_strided_slice %92 {offsets = [0, 0, 0, 0], sizes = [1, 8, 8, 128], strides = [1, 1, 1, 1]} : vector<1x10x8x128xf32> to vector<1x8x8x128xf32>
    %c0_41 = arith.constant 0 : index
    %c0_42 = arith.constant 0 : index
    %c0_43 = arith.constant 0 : index
    %105 = vector.load %arg4[%c0_41, %c0_42, %c0_43] : memref<3x3x128xf32, #tpu.memory_space<vmem>>, vector<1x1x128xf32>
    %106 = vector.shape_cast %105 : vector<1x1x128xf32> to vector<128xf32>
    %107 = vector.shape_cast %106 : vector<128xf32> to vector<1x1x1x128xf32>
    %108 = vector.broadcast %107 : vector<1x1x1x128xf32> to vector<1x8x8x128xf32>
    %109 = arith.mulf %104, %108 : vector<1x8x8x128xf32>
    %110 = arith.addf %103, %109 : vector<1x8x8x128xf32>
    %111 = vector.extract_strided_slice %97 {offsets = [0, 0, 0, 0], sizes = [1, 8, 8, 128], strides = [1, 1, 1, 1]} : vector<1x10x8x128xf32> to vector<1x8x8x128xf32>
    %c0_44 = arith.constant 0 : index
    %c2_45 = arith.constant 2 : index
    %c0_46 = arith.constant 0 : index
    %112 = vector.load %arg4[%c0_44, %c2_45, %c0_46] : memref<3x3x128xf32, #tpu.memory_space<vmem>>, vector<1x1x128xf32>
    %113 = vector.shape_cast %112 : vector<1x1x128xf32> to vector<128xf32>
    %114 = vector.shape_cast %113 : vector<128xf32> to vector<1x1x1x128xf32>
    %115 = vector.broadcast %114 : vector<1x1x1x128xf32> to vector<1x8x8x128xf32>
    %116 = arith.mulf %111, %115 : vector<1x8x8x128xf32>
    %117 = arith.addf %110, %116 : vector<1x8x8x128xf32>
    %118 = vector.extract_strided_slice %92 {offsets = [0, 1, 0, 0], sizes = [1, 8, 8, 128], strides = [1, 1, 1, 1]} : vector<1x10x8x128xf32> to vector<1x8x8x128xf32>
    %c1_47 = arith.constant 1 : index
    %c0_48 = arith.constant 0 : index
    %c0_49 = arith.constant 0 : index
    %119 = vector.load %arg4[%c1_47, %c0_48, %c0_49] : memref<3x3x128xf32, #tpu.memory_space<vmem>>, vector<1x1x128xf32>
    %120 = vector.shape_cast %119 : vector<1x1x128xf32> to vector<128xf32>
    %121 = vector.shape_cast %120 : vector<128xf32> to vector<1x1x1x128xf32>
    %122 = vector.broadcast %121 : vector<1x1x1x128xf32> to vector<1x8x8x128xf32>
    %123 = arith.mulf %118, %122 : vector<1x8x8x128xf32>
    %124 = arith.addf %117, %123 : vector<1x8x8x128xf32>
    %125 = vector.extract_strided_slice %15 {offsets = [0, 1, 0, 0], sizes = [1, 8, 8, 128], strides = [1, 1, 1, 1]} : vector<1x10x8x128xf32> to vector<1x8x8x128xf32>
    %c1_50 = arith.constant 1 : index
    %c1_51 = arith.constant 1 : index
    %c0_52 = arith.constant 0 : index
    %126 = vector.load %arg4[%c1_50, %c1_51, %c0_52] : memref<3x3x128xf32, #tpu.memory_space<vmem>>, vector<1x1x128xf32>
    %127 = vector.shape_cast %126 : vector<1x1x128xf32> to vector<128xf32>
    %128 = vector.shape_cast %127 : vector<128xf32> to vector<1x1x1x128xf32>
    %129 = vector.broadcast %128 : vector<1x1x1x128xf32> to vector<1x8x8x128xf32>
    %130 = arith.mulf %125, %129 : vector<1x8x8x128xf32>
    %131 = arith.addf %124, %130 : vector<1x8x8x128xf32>
    %132 = vector.extract_strided_slice %97 {offsets = [0, 1, 0, 0], sizes = [1, 8, 8, 128], strides = [1, 1, 1, 1]} : vector<1x10x8x128xf32> to vector<1x8x8x128xf32>
    %c1_53 = arith.constant 1 : index
    %c2_54 = arith.constant 2 : index
    %c0_55 = arith.constant 0 : index
    %133 = vector.load %arg4[%c1_53, %c2_54, %c0_55] : memref<3x3x128xf32, #tpu.memory_space<vmem>>, vector<1x1x128xf32>
    %134 = vector.shape_cast %133 : vector<1x1x128xf32> to vector<128xf32>
    %135 = vector.shape_cast %134 : vector<128xf32> to vector<1x1x1x128xf32>
    %136 = vector.broadcast %135 : vector<1x1x1x128xf32> to vector<1x8x8x128xf32>
    %137 = arith.mulf %132, %136 : vector<1x8x8x128xf32>
    %138 = arith.addf %131, %137 : vector<1x8x8x128xf32>
    %139 = vector.extract_strided_slice %92 {offsets = [0, 2, 0, 0], sizes = [1, 8, 8, 128], strides = [1, 1, 1, 1]} : vector<1x10x8x128xf32> to vector<1x8x8x128xf32>
    %c2_56 = arith.constant 2 : index
    %c0_57 = arith.constant 0 : index
    %c0_58 = arith.constant 0 : index
    %140 = vector.load %arg4[%c2_56, %c0_57, %c0_58] : memref<3x3x128xf32, #tpu.memory_space<vmem>>, vector<1x1x128xf32>
    %141 = vector.shape_cast %140 : vector<1x1x128xf32> to vector<128xf32>
    %142 = vector.shape_cast %141 : vector<128xf32> to vector<1x1x1x128xf32>
    %143 = vector.broadcast %142 : vector<1x1x1x128xf32> to vector<1x8x8x128xf32>
    %144 = arith.mulf %139, %143 : vector<1x8x8x128xf32>
    %145 = arith.addf %138, %144 : vector<1x8x8x128xf32>
    %146 = vector.extract_strided_slice %15 {offsets = [0, 2, 0, 0], sizes = [1, 8, 8, 128], strides = [1, 1, 1, 1]} : vector<1x10x8x128xf32> to vector<1x8x8x128xf32>
    %c2_59 = arith.constant 2 : index
    %c1_60 = arith.constant 1 : index
    %c0_61 = arith.constant 0 : index
    %147 = vector.load %arg4[%c2_59, %c1_60, %c0_61] : memref<3x3x128xf32, #tpu.memory_space<vmem>>, vector<1x1x128xf32>
    %148 = vector.shape_cast %147 : vector<1x1x128xf32> to vector<128xf32>
    %149 = vector.shape_cast %148 : vector<128xf32> to vector<1x1x1x128xf32>
    %150 = vector.broadcast %149 : vector<1x1x1x128xf32> to vector<1x8x8x128xf32>
    %151 = arith.mulf %146, %150 : vector<1x8x8x128xf32>
    %152 = arith.addf %145, %151 : vector<1x8x8x128xf32>
    %153 = vector.extract_strided_slice %97 {offsets = [0, 2, 0, 0], sizes = [1, 8, 8, 128], strides = [1, 1, 1, 1]} : vector<1x10x8x128xf32> to vector<1x8x8x128xf32>
    %c2_62 = arith.constant 2 : index
    %c2_63 = arith.constant 2 : index
    %c0_64 = arith.constant 0 : index
    %154 = vector.load %arg4[%c2_62, %c2_63, %c0_64] : memref<3x3x128xf32, #tpu.memory_space<vmem>>, vector<1x1x128xf32>
    %155 = vector.shape_cast %154 : vector<1x1x128xf32> to vector<128xf32>
    %156 = vector.shape_cast %155 : vector<128xf32> to vector<1x1x1x128xf32>
    %157 = vector.broadcast %156 : vector<1x1x1x128xf32> to vector<1x8x8x128xf32>
    %158 = arith.mulf %153, %157 : vector<1x8x8x128xf32>
    %159 = arith.addf %152, %158 : vector<1x8x8x128xf32>
    %160 = vector.shape_cast %87 : vector<1x8x8x128xf32> to vector<64x128xf32>
    %161 = arith.truncf %160 : vector<64x128xf32> to vector<64x128xbf16>
    %c0_65 = arith.constant 0 : index
    %c0_66 = arith.constant 0 : index
    %162 = vector.load %arg5[%c0_65, %c0_66] : memref<128x128xbf16, #tpu.memory_space<vmem>>, vector<128x128xbf16>
    %cst = arith.constant dense<0.000000e+00> : vector<64x128xf32>
    %163 = tpu.matmul %161, %162, %cst {dimension_numbers = #tpu.dot_dimension_numbers<[1], [0], [0], [1], [0, 0, 1, 1], [], []>} : vector<64x128xbf16>, vector<128x128xbf16>, vector<64x128xf32> -> vector<64x128xf32>
    %164 = vector.shape_cast %159 : vector<1x8x8x128xf32> to vector<64x128xf32>
    %165 = arith.truncf %164 : vector<64x128xf32> to vector<64x128xbf16>
    %c0_67 = arith.constant 0 : index
    %c0_68 = arith.constant 0 : index
    %166 = vector.load %arg6[%c0_67, %c0_68] : memref<128x128xbf16, #tpu.memory_space<vmem>>, vector<128x128xbf16>
    %cst_69 = arith.constant dense<0.000000e+00> : vector<64x128xf32>
    %167 = tpu.matmul %165, %166, %cst_69 {dimension_numbers = #tpu.dot_dimension_numbers<[1], [0], [0], [1], [0, 0, 1, 1], [], []>} : vector<64x128xbf16>, vector<128x128xbf16>, vector<64x128xf32> -> vector<64x128xf32>
    %168 = arith.addf %163, %167 : vector<64x128xf32>
    %c0_70 = arith.constant 0 : index
    %c0_71 = arith.constant 0 : index
    %169 = vector.load %arg7[%c0_70, %c0_71] : memref<1x128xf32, #tpu.memory_space<vmem>>, vector<1x128xf32>
    %170 = vector.broadcast %169 : vector<1x128xf32> to vector<64x128xf32>
    %171 = arith.addf %168, %170 : vector<64x128xf32>
    %172 = vector.shape_cast %171 : vector<64x128xf32> to vector<1x8x8x128xf32>
    %c0_72 = arith.constant 0 : index
    %c1_73 = arith.constant 1 : index
    %c0_74 = arith.constant 0 : index
    %c0_75 = arith.constant 0 : index
    %173 = vector.load %arg14[%c0_72, %c1_73, %c0_74, %c0_75] : memref<1x10x8x128xf32, #tpu.memory_space<vmem>>, vector<1x8x8x128xf32>
    tpu.vector_store %arg14[%c0_72, %c1_73, %c0_74, %c0_75], %172 {strides = array<i32>} : memref<1x10x8x128xf32, #tpu.memory_space<vmem>>, vector<1x8x8x128xf32>,
    %c0_76 = arith.constant 0 : index
    %c0_77 = arith.constant 0 : index
    %c0_78 = arith.constant 0 : index
    %c0_79 = arith.constant 0 : index
    %174 = vector.load %arg14[%c0_76, %c0_77, %c0_78, %c0_79] : memref<1x10x8x128xf32, #tpu.memory_space<vmem>>, vector<1x10x8x128xf32>
    %175 = vector.shape_cast %174 : vector<1x10x8x128xf32> to vector<10x8x128xf32>
    %c1_i32_80 = arith.constant 1 : i32
    %176 = tpu.dynamic_rotate %175 by %c1_i32_80 dim 1 : vector<10x8x128xf32>, i32 -> vector<10x8x128xf32>
    %177 = vector.shape_cast %176 : vector<10x8x128xf32> to vector<1x10x8x128xf32>
    %178 = vector.broadcast %7 : vector<1x1x8x1xf32> to vector<1x10x8x128xf32>
    %179 = arith.mulf %177, %178 : vector<1x10x8x128xf32>
    %180 = vector.shape_cast %174 : vector<1x10x8x128xf32> to vector<10x8x128xf32>
    %c7_i32_81 = arith.constant 7 : i32
    %181 = tpu.dynamic_rotate %180 by %c7_i32_81 dim 1 : vector<10x8x128xf32>, i32 -> vector<10x8x128xf32>
    %182 = vector.shape_cast %181 : vector<10x8x128xf32> to vector<1x10x8x128xf32>
    %183 = vector.broadcast %11 : vector<1x1x8x1xf32> to vector<1x10x8x128xf32>
    %184 = arith.mulf %182, %183 : vector<1x10x8x128xf32>
    %185 = vector.extract_strided_slice %174 {offsets = [0, 0, 0, 0], sizes = [1, 8, 8, 128], strides = [1, 1, 1, 1]} : vector<1x10x8x128xf32> to vector<1x8x8x128xf32>
    %c0_82 = arith.constant 0 : index
    %c1_83 = arith.constant 1 : index
    %c0_84 = arith.constant 0 : index
    %186 = vector.load %arg8[%c0_82, %c1_83, %c0_84] : memref<3x3x128xf32, #tpu.memory_space<vmem>>, vector<1x1x128xf32>
    %187 = vector.shape_cast %186 : vector<1x1x128xf32> to vector<128xf32>
    %188 = vector.shape_cast %187 : vector<128xf32> to vector<1x1x1x128xf32>
    %189 = vector.broadcast %188 : vector<1x1x1x128xf32> to vector<1x8x8x128xf32>
    %190 = arith.mulf %185, %189 : vector<1x8x8x128xf32>
    %191 = vector.extract_strided_slice %179 {offsets = [0, 0, 0, 0], sizes = [1, 8, 8, 128], strides = [1, 1, 1, 1]} : vector<1x10x8x128xf32> to vector<1x8x8x128xf32>
    %c0_85 = arith.constant 0 : index
    %c0_86 = arith.constant 0 : index
    %c0_87 = arith.constant 0 : index
    %192 = vector.load %arg8[%c0_85, %c0_86, %c0_87] : memref<3x3x128xf32, #tpu.memory_space<vmem>>, vector<1x1x128xf32>
    %193 = vector.shape_cast %192 : vector<1x1x128xf32> to vector<128xf32>
    %194 = vector.shape_cast %193 : vector<128xf32> to vector<1x1x1x128xf32>
    %195 = vector.broadcast %194 : vector<1x1x1x128xf32> to vector<1x8x8x128xf32>
    %196 = arith.mulf %191, %195 : vector<1x8x8x128xf32>
    %197 = arith.addf %190, %196 : vector<1x8x8x128xf32>
    %198 = vector.extract_strided_slice %184 {offsets = [0, 0, 0, 0], sizes = [1, 8, 8, 128], strides = [1, 1, 1, 1]} : vector<1x10x8x128xf32> to vector<1x8x8x128xf32>
    %c0_88 = arith.constant 0 : index
    %c2_89 = arith.constant 2 : index
    %c0_90 = arith.constant 0 : index
    %199 = vector.load %arg8[%c0_88, %c2_89, %c0_90] : memref<3x3x128xf32, #tpu.memory_space<vmem>>, vector<1x1x128xf32>
    %200 = vector.shape_cast %199 : vector<1x1x128xf32> to vector<128xf32>
    %201 = vector.shape_cast %200 : vector<128xf32> to vector<1x1x1x128xf32>
    %202 = vector.broadcast %201 : vector<1x1x1x128xf32> to vector<1x8x8x128xf32>
    %203 = arith.mulf %198, %202 : vector<1x8x8x128xf32>
    %204 = arith.addf %197, %203 : vector<1x8x8x128xf32>
    %205 = vector.extract_strided_slice %179 {offsets = [0, 1, 0, 0], sizes = [1, 8, 8, 128], strides = [1, 1, 1, 1]} : vector<1x10x8x128xf32> to vector<1x8x8x128xf32>
    %c1_91 = arith.constant 1 : index
    %c0_92 = arith.constant 0 : index
    %c0_93 = arith.constant 0 : index
    %206 = vector.load %arg8[%c1_91, %c0_92, %c0_93] : memref<3x3x128xf32, #tpu.memory_space<vmem>>, vector<1x1x128xf32>
    %207 = vector.shape_cast %206 : vector<1x1x128xf32> to vector<128xf32>
    %208 = vector.shape_cast %207 : vector<128xf32> to vector<1x1x1x128xf32>
    %209 = vector.broadcast %208 : vector<1x1x1x128xf32> to vector<1x8x8x128xf32>
    %210 = arith.mulf %205, %209 : vector<1x8x8x128xf32>
    %211 = arith.addf %204, %210 : vector<1x8x8x128xf32>
    %212 = vector.extract_strided_slice %174 {offsets = [0, 1, 0, 0], sizes = [1, 8, 8, 128], strides = [1, 1, 1, 1]} : vector<1x10x8x128xf32> to vector<1x8x8x128xf32>
    %c1_94 = arith.constant 1 : index
    %c1_95 = arith.constant 1 : index
    %c0_96 = arith.constant 0 : index
    %213 = vector.load %arg8[%c1_94, %c1_95, %c0_96] : memref<3x3x128xf32, #tpu.memory_space<vmem>>, vector<1x1x128xf32>
    %214 = vector.shape_cast %213 : vector<1x1x128xf32> to vector<128xf32>
    %215 = vector.shape_cast %214 : vector<128xf32> to vector<1x1x1x128xf32>
    %216 = vector.broadcast %215 : vector<1x1x1x128xf32> to vector<1x8x8x128xf32>
    %217 = arith.mulf %212, %216 : vector<1x8x8x128xf32>
    %218 = arith.addf %211, %217 : vector<1x8x8x128xf32>
    %219 = vector.extract_strided_slice %184 {offsets = [0, 1, 0, 0], sizes = [1, 8, 8, 128], strides = [1, 1, 1, 1]} : vector<1x10x8x128xf32> to vector<1x8x8x128xf32>
    %c1_97 = arith.constant 1 : index
    %c2_98 = arith.constant 2 : index
    %c0_99 = arith.constant 0 : index
    %220 = vector.load %arg8[%c1_97, %c2_98, %c0_99] : memref<3x3x128xf32, #tpu.memory_space<vmem>>, vector<1x1x128xf32>
    %221 = vector.shape_cast %220 : vector<1x1x128xf32> to vector<128xf32>
    %222 = vector.shape_cast %221 : vector<128xf32> to vector<1x1x1x128xf32>
    %223 = vector.broadcast %222 : vector<1x1x1x128xf32> to vector<1x8x8x128xf32>
    %224 = arith.mulf %219, %223 : vector<1x8x8x128xf32>
    %225 = arith.addf %218, %224 : vector<1x8x8x128xf32>
    %226 = vector.extract_strided_slice %179 {offsets = [0, 2, 0, 0], sizes = [1, 8, 8, 128], strides = [1, 1, 1, 1]} : vector<1x10x8x128xf32> to vector<1x8x8x128xf32>
    %c2_100 = arith.constant 2 : index
    %c0_101 = arith.constant 0 : index
    %c0_102 = arith.constant 0 : index
    %227 = vector.load %arg8[%c2_100, %c0_101, %c0_102] : memref<3x3x128xf32, #tpu.memory_space<vmem>>, vector<1x1x128xf32>
    %228 = vector.shape_cast %227 : vector<1x1x128xf32> to vector<128xf32>
    %229 = vector.shape_cast %228 : vector<128xf32> to vector<1x1x1x128xf32>
    %230 = vector.broadcast %229 : vector<1x1x1x128xf32> to vector<1x8x8x128xf32>
    %231 = arith.mulf %226, %230 : vector<1x8x8x128xf32>
    %232 = arith.addf %225, %231 : vector<1x8x8x128xf32>
    %233 = vector.extract_strided_slice %174 {offsets = [0, 2, 0, 0], sizes = [1, 8, 8, 128], strides = [1, 1, 1, 1]} : vector<1x10x8x128xf32> to vector<1x8x8x128xf32>
    %c2_103 = arith.constant 2 : index
    %c1_104 = arith.constant 1 : index
    %c0_105 = arith.constant 0 : index
    %234 = vector.load %arg8[%c2_103, %c1_104, %c0_105] : memref<3x3x128xf32, #tpu.memory_space<vmem>>, vector<1x1x128xf32>
    %235 = vector.shape_cast %234 : vector<1x1x128xf32> to vector<128xf32>
    %236 = vector.shape_cast %235 : vector<128xf32> to vector<1x1x1x128xf32>
    %237 = vector.broadcast %236 : vector<1x1x1x128xf32> to vector<1x8x8x128xf32>
    %238 = arith.mulf %233, %237 : vector<1x8x8x128xf32>
    %239 = arith.addf %232, %238 : vector<1x8x8x128xf32>
    %240 = vector.extract_strided_slice %184 {offsets = [0, 2, 0, 0], sizes = [1, 8, 8, 128], strides = [1, 1, 1, 1]} : vector<1x10x8x128xf32> to vector<1x8x8x128xf32>
    %c2_106 = arith.constant 2 : index
    %c2_107 = arith.constant 2 : index
    %c0_108 = arith.constant 0 : index
    %241 = vector.load %arg8[%c2_106, %c2_107, %c0_108] : memref<3x3x128xf32, #tpu.memory_space<vmem>>, vector<1x1x128xf32>
    %242 = vector.shape_cast %241 : vector<1x1x128xf32> to vector<128xf32>
    %243 = vector.shape_cast %242 : vector<128xf32> to vector<1x1x1x128xf32>
    %244 = vector.broadcast %243 : vector<1x1x1x128xf32> to vector<1x8x8x128xf32>
    %245 = arith.mulf %240, %244 : vector<1x8x8x128xf32>
    %246 = arith.addf %239, %245 : vector<1x8x8x128xf32>
    %247 = vector.shape_cast %246 : vector<1x8x8x128xf32> to vector<64x128xf32>
    %248 = arith.truncf %247 : vector<64x128xf32> to vector<64x128xbf16>
    %c0_109 = arith.constant 0 : index
    %c0_110 = arith.constant 0 : index
    %c0_111 = arith.constant 0 : index
    %c0_112 = arith.constant 0 : index
    %249 = vector.load %arg12[%c0_109, %c0_110, %c0_111, %c0_112] : memref<1x8x8x128xf32, #tpu.memory_space<vmem>>, vector<1x8x8x128xf32>
    %250 = vector.shape_cast %249 : vector<1x8x8x128xf32> to vector<64x128xf32>
    %c2_113 = arith.constant 2 : index
    %c0_114 = arith.constant 0 : index
    %c0_115 = arith.constant 0 : index
    %251 = vector.load %arg9[%c2_113, %c0_114, %c0_115] : memref<4x128x128xbf16, #tpu.memory_space<vmem>>, vector<1x128x128xbf16>
    %252 = vector.shape_cast %251 : vector<1x128x128xbf16> to vector<128x128xbf16>
    %cst_116 = arith.constant dense<0.000000e+00> : vector<64x128xf32>
    %253 = tpu.matmul %248, %252, %cst_116 {dimension_numbers = #tpu.dot_dimension_numbers<[1], [0], [0], [1], [0, 0, 1, 1], [], []>} : vector<64x128xbf16>, vector<128x128xbf16>, vector<64x128xf32> -> vector<64x128xf32>
    %c2_117 = arith.constant 2 : index
    %c0_118 = arith.constant 0 : index
    %c0_119 = arith.constant 0 : index
    %254 = vector.load %arg10[%c2_117, %c0_118, %c0_119] : memref<4x1x128xf32, #tpu.memory_space<vmem>>, vector<1x1x128xf32>
    %255 = vector.shape_cast %254 : vector<1x1x128xf32> to vector<1x128xf32>
    %256 = vector.broadcast %255 : vector<1x128xf32> to vector<64x128xf32>
    %257 = arith.addf %253, %256 : vector<64x128xf32>
    %258 = arith.negf %257 : vector<64x128xf32>
    %259 = math.exp %258 : vector<64x128xf32>
    %cst_120 = arith.constant 1.000000e+00 : f32
    %260 = vector.broadcast %cst_120 : f32 to vector<64x128xf32>
    %261 = arith.addf %260, %259 : vector<64x128xf32>
    %262 = arith.divf %260, %261 : vector<64x128xf32>
    %263 = arith.mulf %250, %262 : vector<64x128xf32>
    %c0_121 = arith.constant 0 : index
    %c0_122 = arith.constant 0 : index
    %c0_123 = arith.constant 0 : index
    %264 = vector.load %arg9[%c0_121, %c0_122, %c0_123] : memref<4x128x128xbf16, #tpu.memory_space<vmem>>, vector<1x128x128xbf16>
    %265 = vector.shape_cast %264 : vector<1x128x128xbf16> to vector<128x128xbf16>
    %cst_124 = arith.constant dense<0.000000e+00> : vector<64x128xf32>
    %266 = tpu.matmul %248, %265, %cst_124 {dimension_numbers = #tpu.dot_dimension_numbers<[1], [0], [0], [1], [0, 0, 1, 1], [], []>} : vector<64x128xbf16>, vector<128x128xbf16>, vector<64x128xf32> -> vector<64x128xf32>
    %c0_125 = arith.constant 0 : index
    %c0_126 = arith.constant 0 : index
    %c0_127 = arith.constant 0 : index
    %267 = vector.load %arg10[%c0_125, %c0_126, %c0_127] : memref<4x1x128xf32, #tpu.memory_space<vmem>>, vector<1x1x128xf32>
    %268 = vector.shape_cast %267 : vector<1x1x128xf32> to vector<1x128xf32>
    %269 = vector.broadcast %268 : vector<1x128xf32> to vector<64x128xf32>
    %270 = arith.addf %266, %269 : vector<64x128xf32>
    %271 = arith.negf %270 : vector<64x128xf32>
    %272 = math.exp %271 : vector<64x128xf32>
    %cst_128 = arith.constant 1.000000e+00 : f32
    %273 = vector.broadcast %cst_128 : f32 to vector<64x128xf32>
    %274 = arith.addf %273, %272 : vector<64x128xf32>
    %275 = arith.divf %273, %274 : vector<64x128xf32>
    %c1_129 = arith.constant 1 : index
    %c0_130 = arith.constant 0 : index
    %c0_131 = arith.constant 0 : index
    %276 = vector.load %arg9[%c1_129, %c0_130, %c0_131] : memref<4x128x128xbf16, #tpu.memory_space<vmem>>, vector<1x128x128xbf16>
    %277 = vector.shape_cast %276 : vector<1x128x128xbf16> to vector<128x128xbf16>
    %cst_132 = arith.constant dense<0.000000e+00> : vector<64x128xf32>
    %278 = tpu.matmul %248, %277, %cst_132 {dimension_numbers = #tpu.dot_dimension_numbers<[1], [0], [0], [1], [0, 0, 1, 1], [], []>} : vector<64x128xbf16>, vector<128x128xbf16>, vector<64x128xf32> -> vector<64x128xf32>
    %c1_133 = arith.constant 1 : index
    %c0_134 = arith.constant 0 : index
    %c0_135 = arith.constant 0 : index
    %279 = vector.load %arg10[%c1_133, %c0_134, %c0_135] : memref<4x1x128xf32, #tpu.memory_space<vmem>>, vector<1x1x128xf32>
    %280 = vector.shape_cast %279 : vector<1x1x128xf32> to vector<1x128xf32>
    %281 = vector.broadcast %280 : vector<1x128xf32> to vector<64x128xf32>
    %282 = arith.addf %278, %281 : vector<64x128xf32>
    %cst_136 = arith.constant 0.000000e+00 : f32
    %283 = vector.broadcast %cst_136 : f32 to vector<64x128xf32>
    %284 = arith.maximumf %282, %283 : vector<64x128xf32>
    %cst_137 = arith.constant 6.000000e+00 : f32
    %285 = vector.broadcast %cst_137 : f32 to vector<64x128xf32>
    %286 = arith.minimumf %284, %285 : vector<64x128xf32>
    %287 = arith.mulf %275, %286 : vector<64x128xf32>
    %288 = arith.addf %263, %287 : vector<64x128xf32>
    %cst_138 = arith.constant 0.000000e+00 : f32
    %289 = vector.broadcast %cst_138 : f32 to vector<64x128xf32>
    %290 = arith.maximumf %288, %289 : vector<64x128xf32>
    %cst_139 = arith.constant 6.000000e+00 : f32
    %291 = vector.broadcast %cst_139 : f32 to vector<64x128xf32>
    %292 = arith.minimumf %290, %291 : vector<64x128xf32>
    %c3 = arith.constant 3 : index
    %c0_140 = arith.constant 0 : index
    %c0_141 = arith.constant 0 : index
    %293 = vector.load %arg9[%c3, %c0_140, %c0_141] : memref<4x128x128xbf16, #tpu.memory_space<vmem>>, vector<1x128x128xbf16>
    %294 = vector.shape_cast %293 : vector<1x128x128xbf16> to vector<128x128xbf16>
    %cst_142 = arith.constant dense<0.000000e+00> : vector<64x128xf32>
    %295 = tpu.matmul %248, %294, %cst_142 {dimension_numbers = #tpu.dot_dimension_numbers<[1], [0], [0], [1], [0, 0, 1, 1], [], []>} : vector<64x128xbf16>, vector<128x128xbf16>, vector<64x128xf32> -> vector<64x128xf32>
    %c3_143 = arith.constant 3 : index
    %c0_144 = arith.constant 0 : index
    %c0_145 = arith.constant 0 : index
    %296 = vector.load %arg10[%c3_143, %c0_144, %c0_145] : memref<4x1x128xf32, #tpu.memory_space<vmem>>, vector<1x1x128xf32>
    %297 = vector.shape_cast %296 : vector<1x1x128xf32> to vector<1x128xf32>
    %298 = vector.broadcast %297 : vector<1x128xf32> to vector<64x128xf32>
    %299 = arith.addf %295, %298 : vector<64x128xf32>
    %300 = arith.negf %299 : vector<64x128xf32>
    %301 = math.exp %300 : vector<64x128xf32>
    %cst_146 = arith.constant 1.000000e+00 : f32
    %302 = vector.broadcast %cst_146 : f32 to vector<64x128xf32>
    %303 = arith.addf %302, %301 : vector<64x128xf32>
    %304 = arith.divf %302, %303 : vector<64x128xf32>
    %305 = arith.mulf %292, %304 : vector<64x128xf32>
    %306 = vector.shape_cast %288 : vector<64x128xf32> to vector<1x8x8x128xf32>
    %c0_147 = arith.constant 0 : index
    %c0_148 = arith.constant 0 : index
    %c0_149 = arith.constant 0 : index
    %c0_150 = arith.constant 0 : index
    %307 = vector.load %arg12[%c0_147, %c0_148, %c0_149, %c0_150] : memref<1x8x8x128xf32, #tpu.memory_space<vmem>>, vector<1x8x8x128xf32>
    tpu.vector_store %arg12[%c0_147, %c0_148, %c0_149, %c0_150], %306 {strides = array<i32>} : memref<1x8x8x128xf32, #tpu.memory_space<vmem>>, vector<1x8x8x128xf32>,
    %308 = vector.shape_cast %305 : vector<64x128xf32> to vector<1x8x8x128xf32>
    %c0_151 = arith.constant 0 : index
    %c1_152 = arith.constant 1 : index
    %c0_153 = arith.constant 0 : index
    %c0_154 = arith.constant 0 : index
    %309 = vector.load %arg13[%c0_151, %c1_152, %c0_153, %c0_154] : memref<1x10x8x128xf32, #tpu.memory_space<vmem>>, vector<1x8x8x128xf32>
    tpu.vector_store %arg13[%c0_151, %c1_152, %c0_153, %c0_154], %308 {strides = array<i32>} : memref<1x10x8x128xf32, #tpu.memory_space<vmem>>, vector<1x8x8x128xf32>,
    %310 = arith.truncf %308 : vector<1x8x8x128xf32> to vector<1x8x8x128xbf16>
    %c0_155 = arith.constant 0 : index
    %c0_156 = arith.constant 0 : index
    %c0_157 = arith.constant 0 : index
    %c0_158 = arith.constant 0 : index
    %c0_159 = arith.constant 0 : index
    %311 = vector.load %arg11[%c0_155, %c0_156, %c0_157, %c0_158, %c0_159] : memref<1x1x8x8x128xbf16, #tpu.memory_space<vmem>>, vector<1x1x8x8x128xbf16>
    %312 = vector.shape_cast %311 : vector<1x1x8x8x128xbf16> to vector<1x8x8x128xbf16>
    %313 = vector.shape_cast %310 : vector<1x8x8x128xbf16> to vector<1x1x8x8x128xbf16>
    tpu.vector_store %arg11[%c0_155, %c0_156, %c0_157, %c0_158, %c0_159], %313 {strides = array<i32>} : memref<1x1x8x8x128xbf16, #tpu.memory_space<vmem>>, vector<1x1x8x8x128xbf16>,
    return
  }
  func.func @transform_0(%arg0: i32, %arg1: i32) -> (i32, i32, i32, i32, i32) {
    %c0_i32 = arith.constant 0 : i32
    %c0_i32_0 = arith.constant 0 : i32
    %c0_i32_1 = arith.constant 0 : i32
    %c0_i32_2 = arith.constant 0 : i32
    return %arg1, %arg0, %c0_i32, %c0_i32_0, %c0_i32_1 : i32, i32, i32, i32, i32
  }
  func.func @transform_1(%arg0: i32, %arg1: i32) -> (i32, i32, i32) {
    %c0_i32 = arith.constant 0 : i32
    %c0_i32_0 = arith.constant 0 : i32
    %c0_i32_1 = arith.constant 0 : i32
    %c0_i32_2 = arith.constant 0 : i32
    return %c0_i32, %c0_i32_0, %c0_i32_1 : i32, i32, i32
  }
  func.func @transform_2(%arg0: i32, %arg1: i32) -> (i32, i32, i32) {
    %c0_i32 = arith.constant 0 : i32
    %c0_i32_0 = arith.constant 0 : i32
    %c0_i32_1 = arith.constant 0 : i32
    %c0_i32_2 = arith.constant 0 : i32
    return %c0_i32, %c0_i32_0, %c0_i32_1 : i32, i32, i32
  }
  func.func @transform_3(%arg0: i32, %arg1: i32) -> (i32, i32) {
    %c0_i32 = arith.constant 0 : i32
    %c0_i32_0 = arith.constant 0 : i32
    %c0_i32_1 = arith.constant 0 : i32
    return %c0_i32, %c0_i32_0 : i32, i32
  }
  func.func @transform_4(%arg0: i32, %arg1: i32) -> (i32, i32) {
    %c0_i32 = arith.constant 0 : i32
    %c0_i32_0 = arith.constant 0 : i32
    %c0_i32_1 = arith.constant 0 : i32
    return %c0_i32, %c0_i32_0 : i32, i32
  }
  func.func @transform_5(%arg0: i32, %arg1: i32) -> (i32, i32) {
    %c0_i32 = arith.constant 0 : i32
    %c0_i32_0 = arith.constant 0 : i32
    %c0_i32_1 = arith.constant 0 : i32
    return %c0_i32, %c0_i32_0 : i32, i32
  }
  func.func @transform_6(%arg0: i32, %arg1: i32) -> (i32, i32, i32) {
    %c0_i32 = arith.constant 0 : i32
    %c0_i32_0 = arith.constant 0 : i32
    %c0_i32_1 = arith.constant 0 : i32
    %c0_i32_2 = arith.constant 0 : i32
    return %c0_i32, %c0_i32_0, %c0_i32_1 : i32, i32, i32
  }
  func.func @transform_7(%arg0: i32, %arg1: i32) -> (i32, i32, i32) {
    %c0_i32 = arith.constant 0 : i32
    %c0_i32_0 = arith.constant 0 : i32
    %c0_i32_1 = arith.constant 0 : i32
    %c0_i32_2 = arith.constant 0 : i32
    return %c0_i32, %c0_i32_0, %c0_i32_1 : i32, i32, i32
  }
  func.func @transform_8(%arg0: i32, %arg1: i32) -> (i32, i32, i32) {
    %c0_i32 = arith.constant 0 : i32
    %c0_i32_0 = arith.constant 0 : i32
    %c0_i32_1 = arith.constant 0 : i32
    %c0_i32_2 = arith.constant 0 : i32
    return %c0_i32, %c0_i32_0, %c0_i32_1 : i32, i32, i32
  }
  func.func @transform_9(%arg0: i32, %arg1: i32) -> (i32, i32, i32, i32, i32) {
    %c0_i32 = arith.constant 0 : i32
    %c0_i32_0 = arith.constant 0 : i32
    %c0_i32_1 = arith.constant 0 : i32
    %c0_i32_2 = arith.constant 0 : i32
    return %arg1, %arg0, %c0_i32, %c0_i32_0, %c0_i32_1 : i32, i32, i32, i32, i32
  }
  func.func @transform_10(%arg0: i32, %arg1: i32) -> (i32, i32, i32, i32) {
    %c0_i32 = arith.constant 0 : i32
    %c0_i32_0 = arith.constant 0 : i32
    %c0_i32_1 = arith.constant 0 : i32
    %c0_i32_2 = arith.constant 0 : i32
    return %arg0, %c0_i32, %c0_i32_0, %c0_i32_1 : i32, i32, i32, i32
  }
}

</mosaic_0001>

<bundles_post_ra>
// kernel: tpu_custom_call.1
= control target key start
LH: loop header
LB: loop body
LE: loop exit
PB: predicated region body
PF: predicated region fallthrough
CT: control target
= control target key end

     0   :  { %s4814_s0 = inlined_call_operand.hbm [shape: bf16[3,2,10,8,128], index: 0, kind: input, shape index: {}]   ;;  %s4815_s1 = inlined_call_operand.hbm [shape: f32[3,3,128], index: 1, kind: input, shape index: {}]   ;;  %s4816_s2 = inlined_call_operand.hbm [shape: f32[3,3,128], index: 2, kind: input, shape index: {}]   ;;  %s4817_s3 = inlined_call_operand.hbm [shape: bf16[128,128], index: 3, kind: input, shape index: {}]   ;;  %s4818_s4 = inlined_call_operand.hbm [shape: bf16[128,128], index: 4, kind: input, shape index: {}]   ;;  %s4819_s5 = inlined_call_operand.vmem [shape: f32[1,128], index: 5, kind: input, shape index: {}]   ;;  %s4820_s6 = inlined_call_operand.hbm [shape: f32[3,3,128], index: 6, kind: input, shape index: {}]   ;;  %s4821_s7 = inlined_call_operand.hbm [shape: bf16[4,128,128], index: 7, kind: input, shape index: {}]   ;;  %s4822_s8 = inlined_call_operand.vmem [shape: f32[4,1,128], index: 8, kind: input, shape index: {}]   ;;  %s4823_s9 = inlined_call_operand.hbm [shape: bf16[3,2,8,8,128], index: 9, kind: output, shape index: {0}]   ;;  %s4824_s10 = inlined_call_operand.hbm [shape: f32[2,8,8,128], index: 10, kind: output, shape index: {1}]  }
   0x1   :  { %4841 = sst [smem:[#allocation34_spill]] %s4815_s1 }
   0x2   :  { %4842 = sst [smem:[#allocation35_spill]] %s4816_s2 }
   0x3   :  { %4843 = sst [smem:[#allocation36_spill]] %s4817_s3 }
   0x4   :  { %4844 = sst [smem:[#allocation37_spill]] %s4818_s4 }
   0x5   :  { %4845 = sst [smem:[#allocation38_spill]] %s4819_s5 }
   0x6   :  { %4846 = sst [smem:[#allocation39_spill]] %s4820_s6 }
   0x7   :  { %4847 = sst [smem:[#allocation40_spill]] %s4821_s7 }
   0x8   :  { %4848 = sst [smem:[#allocation41_spill]] %s4822_s8 }
   0x9   :  { %4849 = sst [smem:[#allocation42_spill]] %s4823_s9 }
   0xa   :  { %4850 = sst [smem:[#allocation43_spill]] %s4824_s10 }
   0xb   :  { %16 = vsyncpa [#allocation5], 0 }
   0xc   :  { %18 = vsyncpa [#allocation5 + $0x1], 0 }
   0xd   :  { %19 = vsyncpa [#allocation8], 0 }
   0xe   :  { %20 = vsyncpa [#allocation11], 0 }
   0xf   :  { %21 = vsyncpa [#allocation14], 0 }
  0x10   :  { %22 = vsyncpa [#allocation6], 0 }
  0x11   :  { %24 = vsyncpa [#allocation6 + $0x1], 0 }
  0x12   :  { %25 = vsyncpa [#allocation18], 0 }
  0x13   :  { %27 = vsyncpa [#allocation18 + $0x1], 0  ;;  %s3700_s13 = smov 0   ;;  %s3702_s14 = smov 0  }
  0x14   :  { %s3704_s15 = smov 0   ;;  %s3706_s16 = smov 0  }
  0x15   :  { %s3708_s17 = smov 0   ;;  %s3710_s18 = smov 0  }
  0x16   :  { %s3712_s19 = smov 0   ;;  %s3714_s20 = smov 0  }
  0x17   :  { %s3716_s21 = smov 0   ;;  %s3718_s22 = smov 0  }
  0x18   :  { %s3720_s23 = smov 0  }
  0x19 LB: > { %4851 = sst [smem:[#allocation25_spill]] %s3594_s15  ;;  %s4825_s24 = sadd.s32 4294967295, %s3626_s23   ;;  %s3626_s23 = sphi %s3720_s23, %s33_s23   ;;  %s3622_s22 = sphi %s3718_s22, %s4896_s22   ;;  %s3618_s21 = sphi %s3716_s21, %s4902_s21   ;;  %s3614_s20 = sphi %s3714_s20, %s4894_s20   ;;  %s3610_s19 = sphi %s3712_s19, %s4901_s19   ;;  %s3606_s18 = sphi %s3710_s18, %s4893_s18   ;;  %s3602_s17 = sphi %s3708_s17, %s4900_s17   ;;  %s3598_s16 = sphi %s3706_s16, %s4899_s16   ;;  %s3594_s15 = sphi %s3704_s15, %s4891_s15   ;;  %s3590_s14 = sphi %s3702_s14, %s4898_s14   ;;  %s3586_s13 = sphi %s3700_s13, %s4897_s13  }
  0x1a   : > { %4852 = sst [smem:[#allocation26_spill]] %s3606_s18  ;;  %p2555_p0 = scmp.ge.s32.totalorder %s3626_s23, 1 }
  0x1b   : > { %4853 = sst [smem:[#allocation27_spill]] %s3614_s20  ;;  %p3759_p1 = scmp.eq.s32.totalorder %s4825_s24, 0 }
  0x1c   : > { %4854 = sst [smem:[#allocation28_spill]] %s3622_s22  ;;  %p300_p2 = scmp.lt.s32.totalorder %s3626_s23, 7 }
  0x1d   : > { %s4855_s25 = scalar_select %p3759_p1, 1, 0 }
  0x1e   : > { %p3764_p3 = pnand %p2555_p0, %p300_p2  ;;  %s3628_s27 = smov [#allocation7]  }
  0x1f   : > { %s312_s28 = sshll.u32 %s3628_s27, 4  ;;  %s3629_s30 = smov [#allocation10]   ;;  %s313_s28 = int_to_ptr.vmem [resolvable:$true] %s312_s28 }
  0x20   : > { %p2990_p4 = pneg %p3764_p3  ;;  %s338_s11 = sshll.u32 %s3629_s30, 4  ;;  %s339_s11 = int_to_ptr.vmem [resolvable:$true] %s338_s11 }
  0x21   : > { %s3630_s12 = smov [#allocation13]   ;;  %s3291_s27 = scalar_lea.vmem %s313_s28, 192 }
  0x22   : > { %p3772_p5 = pnand %p2990_p4, %p3759_p1  ;;  %s367_s24 = sshll.u32 %s3630_s12, 4  ;;  %s368_s24 = int_to_ptr.vmem [resolvable:$true] %s367_s24 }
  0x23   : > { %p3292_p7 = scmp.ne.s32.totalorder %s313_s28, %s3291_s27  ;;  %p3299_p10 = scmp.lt.s32.totalorder %s313_s28, %s313_s28 }
  0x24   : > { %p3778_p6 = pneg %p3772_p5  ;;  %p3300_p11 = scmp.lt.s32.totalorder %s3291_s27, %s3291_s27 }
  0x26   : > { %p3294_p8 = pnand %p3292_p7, %p3778_p6  ;;  %p3301_p12 = por %p3300_p11, %p3299_p10 }
  0x28   : > { %p3295_p9 = pneg %p3294_p8 }
  0x2a   : > { %p3302_p13 = pnand %p3301_p12, %p3295_p9 }
  0x2c   : > { %3305 = shalt.err (!%p3302_p13)
}
  0x2d   : > { %s4830_s30 = smov 64   ;;  %s4831_s12 = smov 4  }
  0x2e   : > { %s4859_s1 = sld [smem:[#allocation34_spill]]  ;;  %s3317_s8 = scalar_lea.vmem %s339_s11, 1024 }
  0x2f   : > { %p3318_p0 = scmp.ne.s32.totalorder %s339_s11, %s3317_s8  ;;  %p3325_p7 = scmp.lt.s32.totalorder %s339_s11, %s339_s11 }
  0x30   : > { %p3326_p8 = scmp.lt.s32.totalorder %s3317_s8, %s3317_s8 }
  0x31   : > { %p3320_p2 = pnand %p3318_p0, %p3778_p6 }
  0x32   : > { %p3327_p9 = por %p3326_p8, %p3325_p7 }
  0x33   : > { %p3321_p4 = pneg %p3320_p2 }
  0x34   : > { %2993 = dma.hbm_to_vmem [thread:$0]  (!%p3772_p5), %s4859_s1, 192, %s313_s28, [#allocation8], %s4830_s30, %s4830_s30, %s4831_s12  }
  0x35   : > { %p3328_p10 = pnand %p3327_p9, %p3321_p4 }
  0x37   : > { %3331 = shalt.err (!%p3328_p10)
}
  0x38   : > { %s4860_s3 = sld [smem:[#allocation36_spill]]  ;;  %s3343_s10 = scalar_lea.vmem %s368_s24, 192 }
  0x39   : > { %p3344_p11 = scmp.ne.s32.totalorder %s368_s24, %s3343_s10  ;;  %p3351_p0 = scmp.lt.s32.totalorder %s368_s24, %s368_s24 }
  0x3a   : > { %p3352_p2 = scmp.lt.s32.totalorder %s3343_s10, %s3343_s10 }
  0x3b   : > { %p3346_p12 = pnand %p3344_p11, %p3778_p6 }
  0x3c   : > { %p3353_p4 = por %p3352_p2, %p3351_p0 }
  0x3d   : > { %p3347_p13 = pneg %p3346_p12 }
  0x3e   : > { %2999 = dma.hbm_to_vmem [thread:$0]  (!%p3772_p5), %s4860_s3, 1024, %s339_s11, [#allocation11], %s4830_s30, %s4830_s30, %s4831_s12  }
  0x3f   : > { %p3354_p7 = pnand %p3353_p4, %p3347_p13 }
  0x41   : > { %3357 = shalt.err (!%p3354_p7)
}
  0x42   : > { %s4861_s6 = sld [smem:[#allocation39_spill]]  ;;  %s3633_s20 = smov [#allocation9]  }
  0x43   : > { %s325_s28 = sshll.u32 %s3633_s20, 4  ;;  %s3634_s11 = smov [#allocation12]   ;;  %s326_s28 = int_to_ptr.vmem [resolvable:$true] %s325_s28 }
  0x44   : > { %s351_s27 = sshll.u32 %s3634_s11, 4  ;;  %s3369_s1 = scalar_lea.vmem %s326_s28, 192  ;;  %s352_s27 = int_to_ptr.vmem [resolvable:$true] %s351_s27 }
  0x45   : > { %p3370_p8 = scmp.ne.s32.totalorder %s326_s28, %s3369_s1  ;;  %p3377_p11 = scmp.lt.s32.totalorder %s326_s28, %s326_s28 }
  0x46   : > { %p3378_p12 = scmp.lt.s32.totalorder %s3369_s1, %s3369_s1 }
  0x47   : > { %p3372_p9 = pnand %p3370_p8, %p3778_p6 }
  0x48   : > { %3005 = dma.hbm_to_vmem [thread:$0]  (!%p3772_p5), %s4861_s6, 192, %s368_s24, [#allocation14], %s4830_s30, %s4830_s30, %s4831_s12  }
  0x49   : > { %p3373_p10 = pneg %p3372_p9  ;;  %p3379_p13 = por %p3378_p12, %p3377_p11 }
  0x4b   : > { %p3380_p0 = pnand %p3379_p13, %p3373_p10 }
  0x4d   : > { %3383 = shalt.err (!%p3380_p0)
}
  0x4e   : > { %s4862_s2 = sld [smem:[#allocation35_spill]]  ;;  %s3395_s8 = scalar_lea.vmem %s352_s27, 1024 }
  0x4f   : > { %p3396_p2 = scmp.ne.s32.totalorder %s352_s27, %s3395_s8  ;;  %p3403_p8 = scmp.lt.s32.totalorder %s352_s27, %s352_s27 }
  0x50   : > { %p3404_p9 = scmp.lt.s32.totalorder %s3395_s8, %s3395_s8 }
  0x51   : > { %p3398_p4 = pnand %p3396_p2, %p3778_p6 }
  0x52   : > { %p3405_p10 = por %p3404_p9, %p3403_p8 }
  0x53   : > { %p3399_p7 = pneg %p3398_p4 }
  0x54   : > { %2996 = dma.hbm_to_vmem [thread:$0]  (!%p3772_p5), %s4862_s2, 192, %s326_s28, [#allocation8], %s4830_s30, %s4830_s30, %s4831_s12  }
  0x55   : > { %p3406_p11 = pnand %p3405_p10, %p3399_p7 }
  0x57   : > { %3409 = shalt.err (!%p3406_p11)
}
  0x58   : > { %s4863_s4 = sld [smem:[#allocation37_spill]]  ;;  %s3635_s20 = smov [#allocation15]  }
  0x59   : > { %s380_s28 = sshll.u32 %s3635_s20, 4  ;;  %s381_s28 = int_to_ptr.vmem [resolvable:$true] %s380_s28 }
  0x5a   : > { %s3421_s11 = scalar_lea.vmem %s381_s28, 4096  ;;  %p3429_p2 = scmp.lt.s32.totalorder %s381_s28, %s381_s28 }
  0x5b   : > { %p3422_p12 = scmp.ne.s32.totalorder %s381_s28, %s3421_s11  ;;  %p3430_p4 = scmp.lt.s32.totalorder %s3421_s11, %s3421_s11 }
  0x5d   : > { %p3424_p13 = pnand %p3422_p12, %p3778_p6  ;;  %p3431_p7 = por %p3430_p4, %p3429_p2 }
  0x5e   : > { %3002 = dma.hbm_to_vmem [thread:$0]  (!%p3772_p5), %s4863_s4, 1024, %s352_s27, [#allocation11], %s4830_s30, %s4830_s30, %s4831_s12  }
  0x5f   : > { %p3425_p0 = pneg %p3424_p13 }
  0x61   : > { %p3432_p8 = pnand %p3431_p7, %p3425_p0 }
  0x63   : > { %3435 = shalt.err (!%p3432_p8)
}
  0x64   : > { %s4864_s7 = sld [smem:[#allocation40_spill]]  ;;  %s2554_s9 = sadd.s32 4294967294, %s3626_s23  }
  0x65   : > { %s42_s29 = sadd.s32 1, %s3618_s21  ;;  %s45_s10 = sadd.s32 1, %s3622_s22 }
  0x66   : > { %p43_p6 = scmp.ge.s32.totalorder %s42_s29, 3  ;;  %s54_s8 = sadd.s32 1, %s3606_s18 }
  0x67   : > { %p61_p9 = scmp.ne.s32.totalorder %s3606_s18, %s3602_s17  ;;  %p62_p10 = scmp.eq.s32.totalorder %s3626_s23, 0 }
  0x68   : > { %s4904_s29 = smov (%p43_p6, %s42_s29), 0  ;;  %s4906_s10 = smov (!%p43_p6, %s45_s10), %s3622_s22 }
  0x69   : > { %4865 = sst [smem:[#allocation29_spill]] %s4904_s29  ;;  %s49_s1 = ssub.s32 %s3618_s21, %s4904_s29 }
  0x6a   : > { %3008 = dma.hbm_to_vmem [thread:$0]  (!%p3772_p5), %s4864_s7, 4096, %s381_s28, [#allocation14], %s4830_s30, %s4830_s30, %s4831_s12  }
  0x6b   : > { %p47_p11 = scmp.ge.s32.totalorder %s4906_s10, 2  ;;  %p67_p5 = scmp.ne.s32.totalorder %s3602_s17, %s3598_s16 }
  0x6c   : > { %p3856_p12 = por %p62_p10, %p61_p9  ;;  %s4867_s20 = sadd.s32 4294967295, %s3626_s23  }
  0x6d   : > { %p3862_p13 = scmp.eq.s32.totalorder %s4867_s20, 5  ;;  %s4908_s10 = smov (%p47_p11, %s4906_s10), 0 }
  0x6e   : > { %4869 = sst [smem:[#allocation30_spill]] %s4908_s10  ;;  %p3870_p0 = por %p3759_p1, %p67_p5 }
  0x6f   : > { %p3876_p2 = por %p3862_p13, %p61_p9  ;;  %s50_s27 = ssub.s32 %s3622_s22, %s4908_s10 }
  0x70   : > { %p3882_p4 = scmp.eq.s32.totalorder %s2554_s9, 5  ;;  %s51_s30 = sor.u32 %s50_s27, %s49_s1 }
  0x71   : > { %s4871_s24 = scalar_select %p3876_p2, 1, 0 }
  0x72   : > { %p274_p7 = scmp.eq.s32.totalorder %s50_s27, 0  ;;  %p52_p8 = scmp.eq.s32.totalorder %s51_s30, 0 }
  0x73   : > { %p3888_p6 = por %p3882_p4, %p67_p5  ;;  %s276_s2 = sadd.s32 1, %s3594_s15 }
  0x74   : > { %p286_p9 = scmp.ne.s32.totalorder %s3594_s15, %s3590_s14  ;;  %p292_p11 = scmp.ne.s32.totalorder %s3590_s14, %s3586_s13 }
  0x75   : > { %s3896_s3 = scalar_select %p52_p8, %s3606_s18, %s54_s8  }
  0x76   : > { %s3899_s9 = scalar_select %p274_p7, %s3594_s15, %s276_s2  }
  0x77   : > { %4874 = sst [smem:[#allocation31_spill]] %s3896_s3  ;;  %p3903_p10 = por %p286_p9, %p3862_p13 }
  0x78   : > { %4875 = sst [smem:[#allocation32_spill]] %s3899_s9  ;;  %p3026_p2 = scmp.lt.s32.totalorder %s3626_s23, 6 }
  0x79   : > { %s397_s1 = sand.u32 1, %s3606_s18   ;;  %p3913_p1 = por %p292_p11, %p3882_p4 }
  0x7a   : > { %s2956_s27 = smul.u32 40, %s397_s1  ;;  %p3919_p5 = pnand %p3026_p2, %p3856_p12 }
  0x7b   : > { %s4877_s30 = scalar_select %p3913_p1, 1, 0 }
  0x7c   : > { %s2957_s2 = smul.u32 10, %s3622_s22  ;;  %s401_s6 = scalar_lea.vmem [#allocation4], %s2956_s27 }
  0x7d   : > { %4878 = sst [smem:[#allocation33_spill]] %s4877_s30  ;;  %s2958_s28 = smul.u32 20, %s3618_s21 }
  0x7e   : > { %s410_s7 = sshll.u32 %s401_s6, 4  ;;  %s398_s9 = scalar_lea.sflag [#allocation5], %s397_s1  ;;  %s411_s7 = int_to_ptr.vmem [resolvable:$true] %s410_s7 }
  0x7f   : > { %s407_s10 = sadd.s32 %s2958_s28, %s2957_s2  ;;  %p3438_p13 = pneg %p3919_p5 }
  0x80   : > { %s2563_s29 = sshll.u32 %s407_s10, 6  ;;  %s3449_s5 = scalar_lea.vmem %s411_s7, 640 }
  0x81   : > { %s409_s18 = scalar_lea.hbm %s4814_s0, %s2563_s29  ;;  %p3450_p12 = scmp.ne.s32.totalorder %s411_s7, %s3449_s5 }
  0x82   : > { %s3636_s15 = smov [#allocation4]  }
  0x83   : > { %p3452_p2 = pnand %p3450_p12, %p3438_p13  ;;  %s3454_s30 = sshll.u32 %s3636_s15, 4  ;;  %s3455_s30 = int_to_ptr.vmem [resolvable:$false] %s3454_s30 }
  0x84   : > { %s3456_s22 = scalar_lea.vmem %s3455_s30, 1280  ;;  %p3457_p7 = scmp.lt.s32.totalorder %s411_s7, %s3455_s30 }
  0x85   : > { %p3453_p4 = pneg %p3452_p2  ;;  %p3458_p8 = scmp.lt.s32.totalorder %s3456_s22, %s3449_s5 }
  0x87   : > { %p3459_p9 = por %p3458_p8, %p3457_p7 }
  0x89   : > { %p3460_p11 = pnand %p3459_p9, %p3453_p4 }
  0x8b   : > { %3463 = shalt.err (!%p3460_p11)
}
  0x8c   : > { %s4880_s3 = smov 4   ;;  %s4881_s6 = smov 64  }
  0x8d   : > { %3012 = dma.hbm_to_vmem [thread:$0]  (!%p3919_p5), %s409_s18, 640, %s411_s7, %s398_s9, %s4881_s6, %s4881_s6, %s4880_s3  }
  0x8e   : > { %422 = sbr.rel (%p3764_p3) target bundleno = 808 (0x328), region = 56  ;;  %s3938_s29 = sand.u32 (!%p3764_p3), 1, %s3602_s17  }
  0x8f   : > { %s2959_s15 = smul.u32 (!%p3764_p3), 40, %s3938_s29  ;;  %s425_s22 = scalar_lea.sflag (!%p3764_p3), [#allocation5], %s3938_s29 }
  0x91   : > { %s3942_s10 = scalar_lea.vmem (!%p3764_p3), [#allocation4], %s2959_s15 }
  0x93   : > { %3561 = dma.done.wait (%p3870_p0), %s425_s22, 640  }
  0x94   : > { %3563 = vsyncadd (%p3870_p0), %s425_s22, 4294966656  ;;  %p4882_p5 = scmp.ne.s32.totalorder %s4855_s25, 0 }
  0x96   : > { %3565 = dma.done.wait (%p4882_p5), [#allocation8], 384  }
  0x97   : > { %3567 = vsyncadd (%p4882_p5), [#allocation8], 4294966912 }
  0x98   : > { %3569 = dma.done.wait (%p4882_p5), [#allocation11], 2048  }
  0x99   : > { %3571 = vsyncadd (%p4882_p5), [#allocation11], 4294965248 }
  0x9a   : > { %3573 = dma.done.wait (%p4882_p5), [#allocation14], 4288  }
  0x9b   : > { %3575 = vsyncadd (%p4882_p5), [#allocation14], 4294963008  ;;  %s2571_s7 = sshll.u32 %s3938_s29, 5  ;;  %s491_s18 = sand.u32 1, %s3590_s14  }
  0x9c   : > { %s2572_s26 = sshll.u32 %s491_s18, 6  ;;  %s3964_s11 = scalar_lea.vmem [#allocation16], %s2571_s7 }
  0x9d   : > { %s3966_s9 = scalar_lea.vmem [#allocation17], %s2572_s26  ;;  %p2573_p3 = scmp.ne.s32.totalorder %s3610_s19, 0 }
  0x9f   : > { %498 = sbr.rel (%p2573_p3) target bundleno = 175 (0xaf), region = 88 }
  0xa4   : > { %v3637_v0 = vmov 0.0  }
  0xa5   : > { %499 = vst [vmem:[#allocation2 + $0x30] sm:$0xff] %v3637_v0  ;;  %500 = vst [vmem:[#allocation2] sm:$0xff] %v3637_v0 }
  0xa6   : > { %501 = vst [vmem:[#allocation2 + $0x18] sm:$0xff] %v3637_v0  ;;  %502 = vst [vmem:[#allocation2 + $0x10] sm:$0xff] %v3637_v0 }
  0xa7   : > { %503 = vst [vmem:[#allocation2 + $0x48] sm:$0xff] %v3637_v0  ;;  %504 = vst [vmem:[#allocation2 + $0x28] sm:$0xff] %v3637_v0 }
  0xa8   : > { %505 = vst [vmem:[#allocation2 + $0x8] sm:$0xff] %v3637_v0  ;;  %506 = vst [vmem:[#allocation2 + $0x20] sm:$0xff] %v3637_v0 }
  0xa9   : > { %507 = vst [vmem:[#allocation2 + $0x40] sm:$0xff] %v3637_v0  ;;  %508 = vst [vmem:[#allocation2 + $0x38] sm:$0xff] %v3637_v0 }
  0xaa   : > { %509 = vst [vmem:[#allocation3 + $0x48] sm:$0xff] %v3637_v0  ;;  %518 = vst [vmem:[#allocation3 + $0x20] sm:$0xff] %v3637_v0 }
  0xab   : > { %519 = vst [vmem:[%s3966_s9] sm:$0xff] %v3637_v0  ;;  %520 = vst [vmem:[%s3966_s9 + $0x8] sm:$0xff] %v3637_v0 }
  0xac   : > { %521 = vst [vmem:[%s3966_s9 + $0x10] sm:$0xff] %v3637_v0  ;;  %522 = vst [vmem:[%s3966_s9 + $0x18] sm:$0xff] %v3637_v0 }
  0xad   : > { %523 = vst [vmem:[%s3966_s9 + $0x20] sm:$0xff] %v3637_v0  ;;  %524 = vst [vmem:[%s3966_s9 + $0x28] sm:$0xff] %v3637_v0 }
  0xae   : > { %525 = vst [vmem:[%s3966_s9 + $0x30] sm:$0xff] %v3637_v0  ;;  %526 = vst [vmem:[%s3966_s9 + $0x38] sm:$0xff] %v3637_v0 }
  0xaf PF: > { %v3136_v1 = vld [vmem:[#allocation12 + $0x38] sm:$0xff]   ;;  %v3138_v3 = vld [vmem:[#allocation12 + $0x30] sm:$0xff]   ;;  %v3140_v5 = vld [vmem:[#allocation12 + $0x28] sm:$0xff]   ;;  %v527_v6 = vlaneseq  ;;  %v3638_v14 = vmov 0.0   ;;  %s4883_s30 = sld [smem:[#allocation38_spill]]  ;;  %s2374_s7 = sshll.u32 %s3966_s9, 4  ;;  %s4698_s7 = int_to_ptr.vmem [resolvable:$true] %s2374_s7 }
  0xb0   : > { %v3137_v2 = vld [vmem:[#allocation10 + $0x38] sm:$0xff]   ;;  %2812 = vmatprep.subr.bf16.mxu0 %v3136_v1  ;;  %v3139_v4 = vld [vmem:[#allocation10 + $0x30] sm:$0xff]   ;;  %v3141_v7 = vld [vmem:[#allocation10 + $0x28] sm:$0xff]   ;;  %s4884_s2 = sld [smem:[#allocation41_spill]]  ;;  %s4709_s27 = scalar_lea.sflag [#allocation18], %s491_s18 }
  0xb1   : > { %2836 = vmatprep.subr.bf16.mxu1 %v3137_v2  ;;  %2813 = vmatpush3.bf16.msra.mxu0 %v3136_v1  ;;  %v3142_v8 = vld [vmem:[#allocation12 + $0x20] sm:$0xff]   ;;  %v528_v9 = vshrl.u32 %v527_v6, 7  ;;  %v3144_v11 = vld [vmem:[#allocation12 + $0x18] sm:$0xff]   ;;  %v3146_v13 = vld [vmem:[#allocation12 + $0x10] sm:$0xff]   ;;  %s4885_s22 = sld [smem:[#allocation27_spill]]  ;;  %s3464_s8 = scalar_lea.vmem %s4698_s7, 1024 }
  0xb2   : > { %2837 = vmatpush3.bf16.msra.mxu1 %v3137_v2  ;;  %2814 = vmatprep.subr.bf16.mxu0 %v3138_v3  ;;  %v3143_v10 = vld [vmem:[#allocation10 + $0x20] sm:$0xff]   ;;  %v3145_v12 = vld [vmem:[#allocation10 + $0x18] sm:$0xff]   ;;  %v555_v17 = vld [vmem:[#allocation2 + $0x30] sm:$0xff]  ;;  %s4886_s1 = sld [smem:[#allocation43_spill]]  ;;  %p3465_p0 = scmp.ne.s32.totalorder %s4698_s7, %s3464_s8 }
  0xb3   : > { %2838 = vmatprep.subr.bf16.mxu1 %v3139_v4  ;;  %vm529_vm0 = vcmp.gt.s32.totalorder %v528_v9, 0  ;;  %vm532_vm1 = vcmp.lt.s32.totalorder %v528_v9, 7  ;;  %v3981_v18 = vld [vmem:[#allocation2] sm:$0xff]  ;;  %v3983_v19 = vld [vmem:[#allocation2 + $0x18] sm:$0xff]  ;;  %v3985_v21 = vld [vmem:[#allocation2 + $0x10] sm:$0xff]  ;;  %v788_v22 = vrot.slane %v555_v17, 7 }
  0xb4   : > { %v3977_v15 = vsel %vm529_vm0, 1.0, %v3638_v14  ;;  %v3979_v16 = vsel %vm532_vm1, 1.0, %v3638_v14  ;;  %v3147_v20 = vld [vmem:[#allocation10 + $0x10] sm:$0xff]   ;;  %v789_v23 = vrot.slane %v3981_v18, 7  ;;  %v790_v24 = vrot.slane %v3983_v19, 7  ;;  %v3148_v36 = vld [vmem:[#allocation12 + $0x8] sm:$0xff]   ;;  %p3466_p13 = pnand %p3465_p0, %p3903_p10 }
  0xb5   : > { %2815 = vmatpush3.bf16.msra.mxu0 %v3138_v3  ;;  %v808_v25 = vrot.slane %v555_v17, 1  ;;  %v791_v26 = vrot.slane %v3985_v21, 7  ;;  %v809_v27 = vrot.slane %v3981_v18, 1  ;;  %v810_v28 = vrot.slane %v3983_v19, 1  ;;  %v3993_v30 = vld [vmem:[#allocation9 + $0x1] ss:$0 sm:$0xff] }
  0xb6   : > { %2839 = vmatpush3.bf16.msra.mxu1 %v3139_v4  ;;  %2816 = vmatprep.subr.bf16.mxu0 %v3140_v5  ;;  %v811_v29 = vrot.slane %v3985_v21, 1  ;;  %v798_v31 = vmul.f32 %v3977_v15, %v788_v22  ;;  %v799_v32 = vmul.f32 %v3977_v15, %v789_v23  ;;  %v3998_v33 = vmul.f32 %v3977_v15, %v790_v24  ;;  %v4001_v35 = vld [vmem:[#allocation9] ss:$0 sm:$0xff]  ;;  %v4006_v40 = vld [vmem:[#allocation9 + $0x2] ss:$0 sm:$0xff]  ;;  %v3149_v41 = vld [vmem:[#allocation10 + $0x8] sm:$0xff]   ;;  %p3467_p12 = pneg %p3466_p13 }
  0xb7   : > { %2840 = vmatprep.subr.bf16.mxu1 %v3141_v7  ;;  %v818_v34 = vmul.f32 %v3979_v16, %v808_v25  ;;  %v801_v37 = vmul.f32 %v3977_v15, %v791_v26  ;;  %v819_v38 = vmul.f32 %v3979_v16, %v809_v27  ;;  %v820_v39 = vmul.f32 %v3979_v16, %v810_v28  ;;  %v2694_v46 = vld [vmem:[%s3942_s10] sm:$0xff]   ;;  %v2733_v4 = vld [vmem:[%s3942_s10 + $0x8] sm:$0xff]   ;;  %s3639_s28 = smov [#allocation17]  }
  0xb8   : > { %v4009_v42 = vmul.f32 %v3979_v16, %v811_v29  ;;  %v833_v43 = vmul.f32 %v3993_v30, %v555_v17  ;;  %v834_v44 = vmul.f32 %v3993_v30, %v3981_v18  ;;  %v835_v45 = vmul.f32 %v3993_v30, %v3983_v19  ;;  %v4023_v51 = vld [vmem:[#allocation9 + $0x4] ss:$0 sm:$0xff]  ;;  %v3150_v56 = vld [vmem:[#allocation12] sm:$0xff]   ;;  %v4029_v60 = vld [vmem:[#allocation9 + $0x5] ss:$0 sm:$0xff]  ;;  %s3468_s20 = sshll.u32 %s3639_s28, 4  ;;  %s3469_s20 = int_to_ptr.vmem [resolvable:$false] %s3468_s20 }
  0xb9   : > { %2817 = vmatpush3.bf16.msra.mxu0 %v3140_v5  ;;  %v836_v47 = vmul.f32 %v3993_v30, %v3985_v21  ;;  %v846_v48 = vmul.f32 %v4001_v35, %v798_v31  ;;  %v847_v49 = vmul.f32 %v4001_v35, %v799_v32  ;;  %v848_v50 = vmul.f32 %v4001_v35, %v3998_v33  ;;  %v4031_v61 = vld [vmem:[#allocation9 + $0x6] ss:$0 sm:$0xff]  ;;  %v3151_v63 = vld [vmem:[#allocation10] sm:$0xff]   ;;  %v4045_v9 = vld [vmem:[#allocation9 + $0x9] ss:$0 sm:$0xff]  ;;  %s3470_s5 = scalar_lea.vmem %s3469_s20, 2048  ;;  %p3471_p2 = scmp.lt.s32.totalorder %s4698_s7, %s3469_s20 }
  0xba   : > { %2841 = vmatpush3.bf16.msra.mxu1 %v3141_v7  ;;  %2818 = vmatprep.subr.bf16.mxu0 %v3142_v8  ;;  %v849_v52 = vmul.f32 %v4001_v35, %v801_v37  ;;  %v867_v53 = vmul.f32 %v4006_v40, %v818_v34  ;;  %v868_v54 = vmul.f32 %v4006_v40, %v819_v38  ;;  %v4033_v62 = vunpack.c.l.bf16 %v2694_v46  ;;  %v4057_v17 = vld [vmem:[#allocation9 + $0xa] ss:$0 sm:$0xff]  ;;  %p3472_p4 = scmp.lt.s32.totalorder %s3470_s5, %s3464_s8 }
  0xbb   : > { %2842 = vmatprep.subr.bf16.mxu1 %v3143_v10  ;;  %v869_v55 = vmul.f32 %v4006_v40, %v820_v39  ;;  %v854_v57 = vadd.f32 %v846_v48, %v833_v43  ;;  %v855_v58 = vadd.f32 %v847_v49, %v834_v44  ;;  %v856_v59 = vadd.f32 %v848_v50, %v835_v45  ;;  %v4086_v48 = vld [vmem:[#allocation7] ss:$0 sm:$0xff] }
  0xbc   : > { %v857_v0 = vadd.f32 %v849_v52, %v836_v47  ;;  %v870_v1 = vmul.f32 %v4006_v40, %v4009_v42  ;;  %v889_v2 = vmul.f32 %v4023_v51, %v799_v32  ;;  %v890_v3 = vmul.f32 %v4023_v51, %v3998_v33  ;;  %p3473_p7 = por %p3472_p4, %p3471_p2 }
  0xbd   : > { %2819 = vmatpush3.bf16.msra.mxu0 %v3142_v8  ;;  %v875_v5 = vadd.f32 %v867_v53, %v854_v57  ;;  %v876_v6 = vadd.f32 %v868_v54, %v855_v58  ;;  %v4041_v7 = vadd.f32 %v869_v55, %v856_v59  ;;  %v4043_v8 = vld [vmem:[#allocation9 + $0x8] ss:$0 sm:$0xff]  ;;  %v931_v14 = vmul.f32 %v4031_v61, %v819_v38  ;;  %v4078_v38 = vld [vmem:[#allocation7 + $0x1] ss:$0 sm:$0xff]  ;;  %v4090_v54 = vld [vmem:[#allocation7 + $0x2] ss:$0 sm:$0xff] }
  0xbe   : > { %2843 = vmatpush3.bf16.msra.mxu1 %v3143_v10  ;;  %2820 = vmatprep.subr.bf16.mxu0 %v3144_v11  ;;  %v4047_v10 = vunpack.c.h.bf16 %v2694_v46  ;;  %v932_v23 = vmul.f32 %v4031_v61, %v820_v39  ;;  %v4060_v24 = vunpack.c.l.bf16 %v2733_v4  ;;  %v4062_v25 = vadd.f32 %v870_v1, %v857_v0  ;;  %p3474_p8 = pnand %p3473_p7, %p3467_p12 }
  0xbf   : > { %2844 = vmatprep.subr.bf16.mxu1 %v3145_v12  ;;  %v898_v22 = vadd.f32 %v890_v3, %v876_v6  ;;  %v954_v26 = vmul.f32 %v4043_v8, %v801_v37  ;;  %v974_v27 = vmul.f32 %v4045_v9, %v3983_v19  ;;  %v975_v31 = vmul.f32 %v4045_v9, %v3985_v21 }
  0xc0   : > { %v995_v32 = vmul.f32 %v4057_v17, %v820_v39  ;;  %v996_v34 = vmul.f32 %v4057_v17, %v4009_v42  ;;  %v567_v43 = vrot.slane %v4060_v24, 7  ;;  %v585_v44 = vrot.slane %v4033_v62, 1 }
  0xc1   : > { %2821 = vmatpush3.bf16.msra.mxu0 %v3144_v11  ;;  %v4050_v11 = vmul.f32 %v4023_v51, %v801_v37  ;;  %v566_v37 = vrot.slane %v4047_v10, 7  ;;  %v586_v47 = vrot.slane %v4047_v10, 1  ;;  %v587_v53 = vrot.slane %v4060_v24, 1 }
  0xc2   : > { %2845 = vmatpush3.bf16.msra.mxu1 %v3145_v12  ;;  %2822 = vmatprep.subr.bf16.mxu0 %v3146_v13  ;;  %v910_v12 = vmul.f32 %v4029_v60, %v3981_v18  ;;  %v953_v18 = vmul.f32 %v4043_v8, %v3998_v33  ;;  %v565_v33 = vrot.slane %v4033_v62, 7  ;;  %v577_v52 = vmul.f32 %v3977_v15, %v567_v43  ;;  %v4123_v43 = vld [vmem:[#allocation7 + $0x9] ss:$0 sm:$0xff] }
  0xc3   : > { %2846 = vmatprep.subr.bf16.mxu1 %v3147_v20  ;;  %v576_v46 = vmul.f32 %v3977_v15, %v566_v37  ;;  %v595_v57 = vmul.f32 %v3979_v16, %v585_v44  ;;  %v596_v58 = vmul.f32 %v3979_v16, %v586_v47  ;;  %v597_v0 = vmul.f32 %v3979_v16, %v587_v53  ;;  %v4132_v53 = vld [vmem:[#allocation2 + $0x28] sm:$0xff] }
  0xc4   : > { %v575_v45 = vmul.f32 %v3977_v15, %v565_v33  ;;  %v610_v1 = vmul.f32 %v4033_v62, %v4078_v38  ;;  %v4110_v62 = vld [vmem:[#allocation7 + $0x5] ss:$0 sm:$0xff]  ;;  %v933_v44 = vmul.f32 %v4031_v61, %v4009_v42 }
  0xc5   : > { %2823 = vmatpush3.bf16.msra.mxu0 %v3146_v13  ;;  %v911_v13 = vmul.f32 %v4029_v60, %v3983_v19  ;;  %v688_v42 = vmul.f32 %v4060_v24, %v4110_v62 }
  0xc6   : > { %2847 = vmatpush3.bf16.msra.mxu1 %v3147_v20  ;;  %2824 = vmatprep.subr.bf16.mxu0 %v3148_v36  ;;  %v897_v20 = vadd.f32 %v889_v2, %v875_v5  ;;  %v4099_v2 = vld [vmem:[#allocation7 + $0x4] ss:$0 sm:$0xff]  ;;  %v612_v5 = vmul.f32 %v4060_v24, %v4078_v38 }
  0xc7   : > { %2848 = vmatprep.subr.bf16.mxu1 %v3149_v41  ;;  %v919_v29 = vadd.f32 %v911_v13, %v898_v22  ;;  %v625_v22 = vmul.f32 %v4086_v48, %v577_v52  ;;  %v667_v47 = vmul.f32 %v4099_v2, %v577_v52 }
  0xc8   : > { %v918_v28 = vadd.f32 %v910_v12, %v897_v20  ;;  %v624_v20 = vmul.f32 %v4086_v48, %v576_v46 }
  0xc9   : > { %2825 = vmatpush3.bf16.msra.mxu0 %v3148_v36  ;;  %v4074_v36 = vunpack.c.h.bf16 %v2733_v4  ;;  %v611_v4 = vmul.f32 %v4047_v10, %v4078_v38  ;;  %v633_v33 = vadd.f32 %v625_v22, %v612_v5 }
  0xca   : > { %2849 = vmatpush3.bf16.msra.mxu1 %v3149_v41  ;;  %2826 = vmatprep.subr.bf16.mxu0 %v3150_v56  ;;  %v939_v19 = vadd.f32 %v931_v14, %v918_v28  ;;  %v940_v41 = vadd.f32 %v932_v23, %v919_v29  ;;  %v623_v14 = vmul.f32 %v4086_v48, %v575_v45 }
  0xcb   : > { %2850 = vmatprep.subr.bf16.mxu1 %v3151_v63  ;;  %v568_v39 = vrot.slane %v4074_v36, 7  ;;  %v613_v6 = vmul.f32 %v4074_v36, %v4078_v38  ;;  %v752_v22 = vmul.f32 %v4074_v36, %v4123_v43 }
  0xcc   : > { %v961_v49 = vadd.f32 %v953_v18, %v939_v19  ;;  %v962_v50 = vadd.f32 %v954_v26, %v940_v41  ;;  %v644_v18 = vmul.f32 %v4090_v54, %v595_v57  ;;  %v645_v26 = vmul.f32 %v4090_v54, %v596_v58 }
  0xcd   : > { %2827 = vmatpush3.bf16.msra.mxu0 %v3150_v56  ;;  %v578_v55 = vmul.f32 %v3977_v15, %v568_v39  ;;  %v588_v56 = vrot.slane %v4074_v36, 1  ;;  %v631_v29 = vadd.f32 %v623_v14, %v610_v1  ;;  %v666_v41 = vmul.f32 %v4099_v2, %v576_v46 }
  0xce   : > { %2851 = vmatpush3.bf16.msra.mxu1 %v3151_v63  ;;  %v982_v59 = vadd.f32 %v974_v27, %v961_v49  ;;  %v983_v63 = vadd.f32 %v975_v31, %v962_v50  ;;  %v4116_v27 = vld [vmem:[#allocation7 + $0x6] ss:$0 sm:$0xff]  ;;  %v632_v31 = vadd.f32 %v624_v20, %v611_v4  ;;  %v4128_v49 = vld [vmem:[#allocation7 + $0xa] ss:$0 sm:$0xff]  ;;  %v4130_v50 = vld [vmem:[#allocation2 + $0x48] sm:$0xff]  ;;  %v687_v46 = vmul.f32 %v4047_v10, %v4110_v62 }
  0xcf   : > { %v598_v3 = vmul.f32 %v3979_v16, %v588_v56  ;;  %v626_v23 = vmul.f32 %v4086_v48, %v578_v55  ;;  %v652_v39 = vadd.f32 %v644_v18, %v631_v29  ;;  %v668_v57 = vmul.f32 %v4099_v2, %v578_v55 }
  0xd0   : > { %v1003_v12 = vadd.f32 %v995_v32, %v982_v59  ;;  %v1004_v13 = vadd.f32 %v996_v34, %v983_v63  ;;  %v646_v32 = vmul.f32 %v4090_v54, %v597_v0  ;;  %v4119_v34 = vld [vmem:[#allocation7 + $0x8] ss:$0 sm:$0xff]  ;;  %v653_v45 = vadd.f32 %v645_v26, %v632_v31 }
  0xd1   : > { %v634_v37 = vadd.f32 %v626_v23, %v613_v6  ;;  %v647_v19 = vmul.f32 %v4090_v54, %v598_v3  ;;  %v674_v59 = vadd.f32 %v666_v41, %v652_v39  ;;  %v708_v1 = vmul.f32 %v4116_v27, %v596_v58 }
  0xd2   : > { %v1031_v28 = vpack.c.bf16 %v1004_v13, %v1003_v12  ;;  %v654_v56 = vadd.f32 %v646_v32, %v633_v33  ;;  %v675_v63 = vadd.f32 %v667_v47, %v653_v45  ;;  %v709_v4 = vmul.f32 %v4116_v27, %v597_v0 }
  0xd3   : > { %v4141_v5 = vadd.f32 %v647_v19, %v634_v37  ;;  %v4144_v6 = vmul.f32 %v4116_v27, %v598_v3  ;;  %v730_v12 = vmul.f32 %v4119_v34, %v577_v52  ;;  %v731_v13 = vmul.f32 %v4119_v34, %v578_v55 }
  0xd4   : > { %2828 = vmatprep.mubr.bf16.mxu0 %v1031_v28  ;;  %v695_v14 = vadd.f32 %v687_v46, %v674_v59  ;;  %v696_v10 = vadd.f32 %v688_v42, %v675_v63  ;;  %v751_v20 = vmul.f32 %v4060_v24, %v4123_v43  ;;  %v772_v58 = vmul.f32 %v4128_v49, %v597_v0 }
  0xd5   : > { %v792_v23 = vrot.slane %v4130_v50, 7  ;;  %v793_v18 = vrot.slane %v4132_v53, 7  ;;  %v812_v26 = vrot.slane %v4130_v50, 1  ;;  %v813_v55 = vrot.slane %v4132_v53, 1 }
  0xd6   : > { %v716_v28 = vadd.f32 %v708_v1, %v695_v14  ;;  %v717_v52 = vadd.f32 %v709_v4, %v696_v10  ;;  %v899_v29 = vadd.f32 %v4050_v11, %v4041_v7  ;;  %v912_v32 = vmul.f32 %v4029_v60, %v3985_v21  ;;  %v2734_v4 = vld [vmem:[%s3942_s10 + $0x10] sm:$0xff]  }
  0xd7   : > { %v802_v24 = vmul.f32 %v3977_v15, %v792_v23  ;;  %v4161_v31 = vmul.f32 %v3977_v15, %v793_v18  ;;  %v822_v0 = vmul.f32 %v3979_v16, %v812_v26  ;;  %v773_v19 = vmul.f32 %v4128_v49, %v598_v3 }
  0xd8   : > { %v738_v33 = vadd.f32 %v730_v12, %v716_v28  ;;  %v739_v37 = vadd.f32 %v731_v13, %v717_v52  ;;  %v4168_v41 = vmul.f32 %v3979_v16, %v813_v55  ;;  %v913_v21 = vmul.f32 %v4029_v60, %v4130_v50 }
  0xd9   : > { %v4171_v7 = vmul.f32 %v4001_v35, %v802_v24  ;;  %v4175_v11 = vmul.f32 %v4001_v35, %v4161_v31  ;;  %v892_v39 = vmul.f32 %v4023_v51, %v802_v24  ;;  %v4181_v46 = vmul.f32 %v4006_v40, %v822_v0 }
  0xda   : > { %v759_v45 = vadd.f32 %v751_v20, %v738_v33  ;;  %v760_v47 = vadd.f32 %v752_v22, %v739_v37  ;;  %v920_v3 = vadd.f32 %v912_v32, %v899_v29  ;;  %v4185_v42 = vmul.f32 %v4006_v40, %v4168_v41 }
  0xdb   : > { %v900_v59 = vadd.f32 %v892_v39, %v4062_v25  ;;  %v934_v63 = vmul.f32 %v4031_v61, %v822_v0  ;;  %v955_v1 = vmul.f32 %v4043_v8, %v802_v24  ;;  %v976_v10 = vmul.f32 %v4045_v9, %v4130_v50 }
  0xdc   : > { %v780_v12 = vadd.f32 %v772_v58, %v759_v45  ;;  %v781_v13 = vadd.f32 %v773_v19, %v760_v47  ;;  %v941_v14 = vadd.f32 %v933_v44, %v920_v3  ;;  %v956_v22 = vmul.f32 %v4043_v8, %v4161_v31  ;;  %v4202_v58 = vld [vmem:[#allocation2 + $0x8] sm:$0xff] }
  0xdd   : > { %v921_v20 = vadd.f32 %v913_v21, %v900_v59  ;;  %v977_v23 = vmul.f32 %v4045_v9, %v4132_v53  ;;  %v997_v25 = vmul.f32 %v4057_v17, %v822_v0  ;;  %v4198_v28 = vunpack.c.l.bf16 %v2734_v4 }
  0xde   : > { %v1011_v18 = vpack.c.bf16 %v781_v13, %v780_v12  ;;  %v963_v26 = vadd.f32 %v955_v1, %v941_v14  ;;  %v4200_v52 = vunpack.c.h.bf16 %v2734_v4  ;;  %v998_v55 = vmul.f32 %v4057_v17, %v4168_v41 }
  0xdf   : > { %v942_v44 = vadd.f32 %v934_v63, %v921_v20  ;;  %v676_v29 = vadd.f32 %v668_v57, %v654_v56  ;;  %v689_v24 = vmul.f32 %v4074_v36, %v4110_v62  ;;  %v569_v0 = vrot.slane %v4198_v28, 7 }
  0xe0   : > { %2852 = vmatprep.mubr.bf16.mxu1 %v1011_v18  ;;  %v984_v32 = vadd.f32 %v976_v10, %v963_v26  ;;  %v570_v33 = vrot.slane %v4200_v52, 7  ;;  %v589_v37 = vrot.slane %v4198_v28, 1  ;;  %v590_v39 = vrot.slane %v4200_v52, 1  ;;  %v4234_v10 = vld [vmem:[#allocation2 + $0x20] sm:$0xff] }
  0xe1   : > { %v964_v19 = vadd.f32 %v956_v22, %v942_v44  ;;  %v697_v21 = vadd.f32 %v689_v24, %v676_v29  ;;  %v794_v45 = vrot.slane %v4202_v58, 7  ;;  %v579_v47 = vmul.f32 %v3977_v15, %v569_v0 }
  0xe2   : > { %v4215_v56 = vmul.f32 %v3977_v15, %v570_v33  ;;  %v599_v36 = vmul.f32 %v3979_v16, %v589_v37  ;;  %v690_v57 = vmul.f32 %v4198_v28, %v4110_v62  ;;  %v1005_v59 = vadd.f32 %v997_v25, %v984_v32 }
  0xe3   : > { %v985_v3 = vadd.f32 %v977_v23, %v964_v19  ;;  %v4221_v63 = vmul.f32 %v3979_v16, %v590_v39  ;;  %v718_v1 = vadd.f32 %v4144_v6, %v697_v21  ;;  %v4225_v4 = vmul.f32 %v4086_v48, %v579_v47 }
  0xe4   : > { %v4229_v12 = vmul.f32 %v4086_v48, %v4215_v56  ;;  %v669_v13 = vmul.f32 %v4099_v2, %v579_v47  ;;  %v753_v14 = vmul.f32 %v4198_v28, %v4123_v43  ;;  %v4237_v22 = vmul.f32 %v4090_v54, %v599_v36 }
  0xe5   : > { %v1006_v20 = vadd.f32 %v998_v55, %v985_v3  ;;  %v4241_v6 = vmul.f32 %v4090_v54, %v4221_v63  ;;  %v732_v23 = vmul.f32 %v4119_v34, %v579_v47  ;;  %v711_v18 = vmul.f32 %v4116_v27, %v599_v36 }
  0xe6   : > { %v677_v25 = vadd.f32 %v669_v13, %v4141_v5  ;;  %v733_v26 = vmul.f32 %v4119_v34, %v4215_v56  ;;  %v754_v44 = vmul.f32 %v4200_v52, %v4123_v43  ;;  %v774_v24 = vmul.f32 %v4128_v49, %v599_v36 }
  0xe7   : > { %v1032_v55 = vpack.c.bf16 %v1006_v20, %v1005_v59  ;;  %v740_v29 = vadd.f32 %v732_v23, %v718_v1  ;;  %v795_v32 = vrot.slane %v4234_v10, 7  ;;  %v804_v33 = vmul.f32 %v3977_v15, %v794_v45 }
  0xe8   : > { %v698_v0 = vadd.f32 %v690_v57, %v677_v25  ;;  %v814_v37 = vrot.slane %v4202_v58, 1  ;;  %v815_v5 = vrot.slane %v4234_v10, 1  ;;  %v837_v21 = vmul.f32 %v3993_v30, %v4130_v50 }
  0xe9   : > { %2829 = vmatmul.mubr.bf16.vlgmr.msra.gmra.mxu0 %v1032_v55  ;;  %v761_v19 = vadd.f32 %v753_v14, %v740_v29  ;;  %v4256_v39 = vmul.f32 %v3977_v15, %v795_v32  ;;  %v838_v47 = vmul.f32 %v3993_v30, %v4132_v53  ;;  %v775_v57 = vmul.f32 %v4128_v49, %v4221_v63  ;;  %v2735_v32 = vld [vmem:[%s3942_s10 + $0x18] sm:$0xff]  }
  0xea   : > { %v719_v36 = vadd.f32 %v711_v18, %v698_v0  ;;  %v824_v45 = vmul.f32 %v3979_v16, %v814_v37  ;;  %v4266_v3 = vmul.f32 %v3979_v16, %v815_v5  ;;  %v4269_v1 = vmul.f32 %v4001_v35, %v804_v33 }
  0xeb   : > { %v782_v59 = vadd.f32 %v774_v24, %v761_v19  ;;  %v858_v13 = vadd.f32 %v4171_v7, %v837_v21  ;;  %v859_v50 = vadd.f32 %v4175_v11, %v838_v47  ;;  %v4275_v20 = vmul.f32 %v4001_v35, %v4256_v39 }
  0xec   : > { %v741_v14 = vadd.f32 %v733_v26, %v719_v36  ;;  %v4278_v23 = vmul.f32 %v4006_v40, %v824_v45  ;;  %v893_v25 = vmul.f32 %v4023_v51, %v4161_v31  ;;  %v894_v29 = vmul.f32 %v4023_v51, %v804_v33 }
  0xed   : > { %v879_v18 = vadd.f32 %v4181_v46, %v858_v13  ;;  %v880_v55 = vadd.f32 %v4185_v42, %v859_v50  ;;  %v914_v7 = vmul.f32 %v4029_v60, %v4132_v53  ;;  %v915_v35 = vmul.f32 %v4029_v60, %v4202_v58 }
  0xee   : > { %v762_v11 = vadd.f32 %v754_v44, %v741_v14  ;;  %v935_v26 = vmul.f32 %v4031_v61, %v4168_v41  ;;  %v936_v24 = vmul.f32 %v4031_v61, %v824_v45  ;;  %v957_v46 = vmul.f32 %v4043_v8, %v804_v33 }
  0xef   : > { %v901_v31 = vadd.f32 %v893_v25, %v879_v18  ;;  %v902_v0 = vadd.f32 %v894_v29, %v880_v55  ;;  %v958_v42 = vmul.f32 %v4043_v8, %v4256_v39  ;;  %v978_v53 = vmul.f32 %v4045_v9, %v4202_v58 }
  0xf0   : > { %v783_v37 = vadd.f32 %v775_v57, %v762_v11  ;;  %v979_v44 = vmul.f32 %v4045_v9, %v4234_v10  ;;  %v999_v5 = vmul.f32 %v4057_v17, %v824_v45  ;;  %v1000_v21 = vmul.f32 %v4057_v17, %v4266_v3 }
  0xf1   : > { %v922_v41 = vadd.f32 %v914_v7, %v901_v31  ;;  %v923_v19 = vadd.f32 %v915_v35, %v902_v0  ;;  %v4303_v47 = vunpack.c.l.bf16 %v2735_v32  ;;  %v4305_v36 = vunpack.c.h.bf16 %v2735_v32 }
  0xf2   : > { %v1012_v33 = vpack.c.bf16 %v783_v37, %v782_v59  ;;  %v614_v57 = vmul.f32 %v4198_v28, %v4078_v38  ;;  %v615_v13 = vmul.f32 %v4200_v52, %v4078_v38 }
  0xf3   : > { %v943_v50 = vadd.f32 %v935_v26, %v922_v41  ;;  %v944_v14 = vadd.f32 %v936_v24, %v923_v19  ;;  %v571_v45 = vrot.slane %v4303_v47, 7  ;;  %v591_v25 = vrot.slane %v4303_v47, 1 }
  0xf4   : > { %2853 = vmatmul.mubr.bf16.vlgmr.msra.gmra.mxu1 %v1012_v33  ;;  %v572_v18 = vrot.slane %v4305_v36, 7  ;;  %v592_v55 = vrot.slane %v4305_v36, 1  ;;  %v635_v59 = vadd.f32 %v4225_v4, %v614_v57  ;;  %v636_v29 = vadd.f32 %v4229_v12, %v615_v13  ;;  %v563_v13 = vld [vmem:[#allocation2 + $0x40] sm:$0xff] }
  0xf5   : > { %v965_v7 = vadd.f32 %v957_v46, %v943_v50  ;;  %v966_v28 = vadd.f32 %v958_v42, %v944_v14  ;;  %v581_v11 = vmul.f32 %v3977_v15, %v571_v45  ;;  %v601_v35 = vmul.f32 %v3979_v16, %v591_v25  ;;  %v564_v50 = vld [vmem:[#allocation2 + $0x38] sm:$0xff] }
  0xf6   : > { %v874_v26 = vmul.f32 %v4006_v40, %v4266_v3  ;;  %v4322_v24 = vmul.f32 %v3977_v15, %v572_v18  ;;  %v656_v32 = vadd.f32 %v4237_v22, %v635_v59  ;;  %v657_v31 = vadd.f32 %v4241_v6, %v636_v29 }
  0xf7   : > { %v986_v0 = vadd.f32 %v978_v53, %v965_v7  ;;  %v987_v4 = vadd.f32 %v979_v44, %v966_v28  ;;  %v4327_v12 = vmul.f32 %v3979_v16, %v592_v55  ;;  %v4330_v46 = vmul.f32 %v4086_v48, %v581_v11 }
  0xf8   : > { %v4334_v42 = vmul.f32 %v4086_v48, %v4322_v24  ;;  %v4337_v40 = vmul.f32 %v4090_v54, %v601_v35  ;;  %v670_v22 = vmul.f32 %v4099_v2, %v4215_v56  ;;  %v671_v6 = vmul.f32 %v4099_v2, %v581_v11 }
  0xf9   : > { %v1007_v37 = vadd.f32 %v999_v5, %v986_v0  ;;  %v1008_v53 = vadd.f32 %v1000_v21, %v987_v4  ;;  %v691_v44 = vmul.f32 %v4200_v52, %v4110_v62  ;;  %v692_v41 = vmul.f32 %v4303_v47, %v4110_v62 }
  0xfa   : > { %v678_v19 = vadd.f32 %v670_v22, %v656_v32  ;;  %v679_v33 = vadd.f32 %v671_v6, %v657_v31  ;;  %v712_v48 = vmul.f32 %v4116_v27, %v4221_v63  ;;  %v713_v57 = vmul.f32 %v4116_v27, %v601_v35 }
  0xfb   : > { %v1033_v56 = vpack.c.bf16 %v1008_v53, %v1007_v37  ;;  %v4351_v5 = vmul.f32 %v4090_v54, %v4327_v12  ;;  %v734_v21 = vmul.f32 %v4119_v34, %v581_v11  ;;  %v735_v52 = vmul.f32 %v4119_v34, %v4322_v24 }
  0xfc   : > { %v699_v14 = vadd.f32 %v691_v44, %v678_v19  ;;  %v700_v45 = vadd.f32 %v692_v41, %v679_v33  ;;  %v755_v25 = vmul.f32 %v4303_v47, %v4123_v43  ;;  %v756_v63 = vmul.f32 %v4305_v36, %v4123_v43 }
  0xfd   : > { %2832 = vmatprep.mubr.bf16.mxu0 %v1033_v56  ;;  %v776_v18 = vmul.f32 %v4128_v49, %v601_v35  ;;  %v796_v55 = vrot.slane %v563_v13, 7  ;;  %v797_v59 = vrot.slane %v564_v50, 7  ;;  %v816_v54 = vrot.slane %v563_v13, 1 }
  0xfe   : > { %v720_v29 = vadd.f32 %v712_v48, %v699_v14  ;;  %v721_v7 = vadd.f32 %v713_v57, %v700_v45  ;;  %v817_v28 = vrot.slane %v564_v50, 1  ;;  %v839_v11 = vmul.f32 %v3993_v30, %v4202_v58 }
  0xff   : > { %v777_v32 = vmul.f32 %v4128_v49, %v4327_v12  ;;  %v806_v31 = vmul.f32 %v3977_v15, %v796_v55  ;;  %v826_v0 = vmul.f32 %v3979_v16, %v816_v54  ;;  %v840_v4 = vmul.f32 %v3993_v30, %v4234_v10 }
 0x100   : > { %v742_v35 = vadd.f32 %v734_v21, %v720_v29  ;;  %v743_v22 = vadd.f32 %v735_v52, %v721_v7  ;;  %v807_v6 = vmul.f32 %v3977_v15, %v797_v59  ;;  %v860_v37 = vadd.f32 %v4269_v1, %v839_v11  ;;  %v2736_v21 = vld [vmem:[%s3942_s10 + $0x20] sm:$0xff]   ;;  %s2692_s10 = sshll.u32 %s4885_s22, 10 }
 0x101   : > { %v827_v53 = vmul.f32 %v3979_v16, %v817_v28  ;;  %v861_v58 = vadd.f32 %v4275_v20, %v840_v4  ;;  %v895_v44 = vmul.f32 %v4023_v51, %v4256_v39  ;;  %v896_v41 = vmul.f32 %v4023_v51, %v806_v31 }
 0x102   : > { %v763_v19 = vadd.f32 %v755_v25, %v742_v35  ;;  %v764_v33 = vadd.f32 %v756_v63, %v743_v22  ;;  %v881_v30 = vadd.f32 %v4278_v23, %v860_v37  ;;  %v916_v48 = vmul.f32 %v4029_v60, %v4234_v10 }
 0x103   : > { %v882_v57 = vadd.f32 %v874_v26, %v861_v58  ;;  %v917_v56 = vmul.f32 %v4029_v60, %v563_v13  ;;  %v937_v1 = vmul.f32 %v4031_v61, %v4266_v3  ;;  %v938_v20 = vmul.f32 %v4031_v61, %v826_v0 }
 0x104   : > { %v784_v52 = vadd.f32 %v776_v18, %v763_v19  ;;  %v785_v39 = vadd.f32 %v777_v32, %v764_v33  ;;  %v903_v14 = vadd.f32 %v895_v44, %v881_v30  ;;  %v959_v51 = vmul.f32 %v4043_v8, %v806_v31 }
 0x105   : > { %v904_v45 = vadd.f32 %v896_v41, %v882_v57  ;;  %v960_v23 = vmul.f32 %v4043_v8, %v807_v6  ;;  %v980_v25 = vmul.f32 %v4045_v9, %v563_v13  ;;  %v981_v10 = vmul.f32 %v4045_v9, %v564_v50 }
 0x106   : > { %v1013_v26 = vpack.c.bf16 %v785_v39, %v784_v52  ;;  %v924_v60 = vadd.f32 %v916_v48, %v903_v14  ;;  %v1001_v63 = vmul.f32 %v4057_v17, %v826_v0  ;;  %v2711_v3 = vunpack.c.l.bf16 %v2736_v21 }
 0x107   : > { %v925_v55 = vadd.f32 %v917_v56, %v904_v45  ;;  %v2712_v61 = vunpack.c.h.bf16 %v2736_v21  ;;  %v616_v18 = vmul.f32 %v4303_v47, %v4078_v38  ;;  %v617_v59 = vmul.f32 %v4305_v36, %v4078_v38  ;;  %v3153_v45 = vld [vmem:[#allocation15 + $0x38] sm:$0xff]  }
 0x108   : > { %2856 = vmatprep.mubr.bf16.mxu1 %v1013_v26  ;;  %v945_v54 = vadd.f32 %v937_v1, %v924_v60  ;;  %v1002_v8 = vmul.f32 %v4057_v17, %v827_v53  ;;  %v573_v13 = vrot.slane %v2711_v3, 7  ;;  %v593_v29 = vrot.slane %v2711_v3, 1  ;;  %2884 = vmatprep.subr.bf16.mxu1 %v3153_v45  ;;  %v3159_v26 = vld [vmem:[#allocation15 + $0x20] sm:$0xff]   ;;  %v3160_v60 = vld [vmem:[#allocation15 + $0x98] sm:$0xff]  }
 0x109   : > { %v946_v9 = vadd.f32 %v938_v20, %v925_v55  ;;  %v574_v50 = vrot.slane %v2712_v61, 7  ;;  %v637_v7 = vadd.f32 %v4330_v46, %v616_v18  ;;  %v672_v28 = vmul.f32 %v4099_v2, %v4322_v24  ;;  %2885 = vmatpush3.bf16.msra.mxu1 %v3153_v45  ;;  %v3163_v55 = vld [vmem:[#allocation15 + $0x10] sm:$0xff]   ;;  %v3165_v18 = vld [vmem:[#allocation15 + $0x8] sm:$0xff]  }
 0x10a   : > { %v967_v11 = vadd.f32 %v959_v51, %v945_v54  ;;  %v583_v32 = vmul.f32 %v3977_v15, %v573_v13  ;;  %v603_v47 = vmul.f32 %v3979_v16, %v593_v29  ;;  %v638_v38 = vadd.f32 %v4334_v42, %v617_v59  ;;  %v3166_v59 = vld [vmem:[#allocation15 + $0x80] sm:$0xff]   ;;  %v4419_v13 = vld [vmem:[#allocation15 + $0xf8] sm:$0xff]  }
 0x10b   : > { %v968_v31 = vadd.f32 %v960_v23, %v946_v9  ;;  %v584_v0 = vmul.f32 %v3977_v15, %v574_v50  ;;  %v594_v17 = vrot.slane %v2712_v61, 1  ;;  %v658_v4 = vadd.f32 %v4337_v40, %v637_v7  ;;  %v3155_v23 = vld [vmem:[#allocation15 + $0x30] sm:$0xff]   ;;  %v3167_v54 = vld [vmem:[#allocation15] sm:$0xff]  }
 0x10c   : > { %v988_v35 = vadd.f32 %v980_v25, %v967_v11  ;;  %v659_v22 = vadd.f32 %v4351_v5, %v638_v38  ;;  %v673_v46 = vmul.f32 %v4099_v2, %v583_v32  ;;  %v693_v24 = vmul.f32 %v4305_v36, %v4110_v62  ;;  %2886 = vmatprep.subr.bf16.mxu1 %v3155_v23  ;;  %v3156_v25 = vld [vmem:[#allocation15 + $0xa8] sm:$0xff]  }
 0x10d   : > { %v989_v6 = vadd.f32 %v981_v10, %v968_v31  ;;  %v680_v37 = vadd.f32 %v672_v28, %v658_v4  ;;  %v694_v53 = vmul.f32 %v2711_v3, %v4110_v62  ;;  %v714_v42 = vmul.f32 %v4116_v27, %v4327_v12  ;;  %2887 = vmatpush3.bf16.msra.mxu1 %v3155_v23  ;;  %v3158_v10 = vld [vmem:[#allocation15 + $0xa0] sm:$0xff]   ;;  %v4429_v38 = vld [vmem:[%s4883_s30] ss:$0 sm:$0xff]  ;;  %s4696_s30 = scalar_lea.hbm %s4886_s1, %s2692_s10 }
 0x10e   : > { %v1009_v58 = vadd.f32 %v1001_v63, %v988_v35  ;;  %v681_v44 = vadd.f32 %v673_v46, %v659_v22  ;;  %v715_v41 = vmul.f32 %v4116_v27, %v603_v47  ;;  %v736_v5 = vmul.f32 %v4119_v34, %v583_v32  ;;  %v3161_v63 = vld [vmem:[#allocation15 + $0x18] sm:$0xff]   ;;  %v1301_v29 = vld [vmem:[#allocation3 + $0x48] sm:$0xff]  ;;  %v4424_v32 = vld [vmem:[#allocation13] ss:$0 sm:$0xff] }
 0x10f   : > { %v1010_v40 = vadd.f32 %v1002_v8, %v989_v6  ;;  %v701_v19 = vadd.f32 %v693_v24, %v680_v37  ;;  %v604_v2 = vmul.f32 %v3979_v16, %v594_v17  ;;  %v737_v36 = vmul.f32 %v4119_v34, %v584_v0  ;;  %v3152_v34 = vld [vmem:[#allocation15 + $0xb8] sm:$0xff]   ;;  %v4431_v17 = vld [vmem:[#allocation13 + $0x1] ss:$0 sm:$0xff]  ;;  %v4439_v37 = vld [vmem:[#allocation13 + $0x2] ss:$0 sm:$0xff] }
 0x110   : > { %v702_v33 = vadd.f32 %v694_v53, %v681_v44  ;;  %v757_v62 = vmul.f32 %v2711_v3, %v4123_v43  ;;  %v758_v12 = vmul.f32 %v2712_v61, %v4123_v43  ;;  %v778_v27 = vmul.f32 %v4128_v49, %v603_v47  ;;  %2860 = vmatprep.subr.bf16.mxu0 %v3152_v34  ;;  %v3154_v43 = vld [vmem:[#allocation15 + $0xb0] sm:$0xff]   ;;  %v3164_v61 = vld [vmem:[#allocation15 + $0x88] sm:$0xff]   ;;  %v4417_v8 = vld [vmem:[#allocation15 + $0x78] sm:$0xff]  }
 0x111   : > { %v1034_v30 = vpack.c.bf16 %v1010_v40, %v1009_v58  ;;  %v722_v48 = vadd.f32 %v714_v42, %v701_v19  ;;  %v779_v20 = vmul.f32 %v4128_v49, %v604_v2  ;;  %2861 = vmatpush3.bf16.msra.mxu0 %v3152_v34  ;;  %v3157_v49 = vld [vmem:[#allocation15 + $0x28] sm:$0xff]   ;;  %v3162_v3 = vld [vmem:[#allocation15 + $0x90] sm:$0xff]   ;;  %v1311_v50 = vrot.slane %v1301_v29, 7  ;;  %v4457_v34 = vld [vmem:[#allocation13 + $0x5] ss:$0 sm:$0xff] }
 0x112   : > { %v723_v57 = vadd.f32 %v715_v41, %v702_v33  ;;  %2862 = vmatprep.subr.bf16.mxu0 %v3154_v43  ;;  %2888 = vmatprep.subr.bf16.mxu1 %v3157_v49  ;;  %v1331_v11 = vrot.slane %v1301_v29, 1  ;;  %v1356_v22 = vmul.f32 %v4431_v17, %v1301_v29 }
 0x113   : > { %2833 = vmatmul.mubr.bf16.gmra.mxu0 %v1034_v30  ;;  %v744_v56 = vadd.f32 %v736_v5, %v722_v48  ;;  %2889 = vmatpush3.bf16.msra.mxu1 %v3157_v49  ;;  %v1321_v28 = vmul.f32 %v3977_v15, %v1311_v50 }
 0x114   : > { %v745_v1 = vadd.f32 %v737_v36, %v723_v57  ;;  %2890 = vmatprep.subr.bf16.mxu1 %v3159_v26  ;;  %v1341_v35 = vmul.f32 %v3979_v16, %v1331_v11  ;;  %v4474_v11 = vld [vmem:[#allocation13 + $0x9] ss:$0 sm:$0xff] }
 0x115   : > { %v765_v21 = vadd.f32 %v757_v62, %v744_v56  ;;  %2863 = vmatpush3.bf16.msra.mxu0 %v3154_v43  ;;  %v1369_v46 = vmul.f32 %v4424_v32, %v1321_v28 }
 0x116   : > { %v766_v52 = vadd.f32 %v758_v12, %v745_v1  ;;  %2864 = vmatprep.subr.bf16.mxu0 %v3156_v25  ;;  %v1390_v19 = vmul.f32 %v4439_v37, %v1341_v35 }
 0x117   : > { %v786_v39 = vadd.f32 %v778_v27, %v765_v21  ;;  %2891 = vmatpush3.bf16.msra.mxu1 %v3159_v26  ;;  %v1377_v40 = vadd.f32 %v1369_v46, %v1356_v22  ;;  %v4479_v22 = vld [vmem:[#allocation13 + $0xa] ss:$0 sm:$0xff] }
 0x118   : > { %v787_v14 = vadd.f32 %v779_v20, %v766_v52  ;;  %2892 = vmatprep.subr.bf16.mxu1 %v3161_v63  ;;  %v4451_v20 = vld [vmem:[#allocation13 + $0x4] ss:$0 sm:$0xff] }
 0x119   : > { %2865 = vmatpush3.bf16.msra.mxu0 %v3156_v25  ;;  %v1398_v57 = vadd.f32 %v1390_v19, %v1377_v40 }
 0x11a   : > { %v1014_v51 = vpack.c.bf16 %v787_v14, %v786_v39  ;;  %2866 = vmatprep.subr.bf16.mxu0 %v3158_v10 }
 0x11b   : > { %2893 = vmatpush3.bf16.msra.mxu1 %v3161_v63 }
 0x11c   : > { %2857 = vmatmul.mubr.bf16.gmra.mxu1 %v1014_v51  ;;  %2894 = vmatprep.subr.bf16.mxu1 %v3163_v55 }
 0x11d   : > { %2867 = vmatpush3.bf16.msra.mxu0 %v3158_v10  ;;  %v4462_v10 = vld [vmem:[#allocation13 + $0x6] ss:$0 sm:$0xff] }
 0x11e   : > { %2868 = vmatprep.subr.bf16.mxu0 %v3160_v60 }
 0x11f   : > { %2895 = vmatpush3.bf16.msra.mxu1 %v3163_v55 }
 0x120   : > { %2896 = vmatprep.subr.bf16.mxu1 %v3165_v18 }
 0x121   : > { %2869 = vmatpush3.bf16.msra.mxu0 %v3160_v60 }
 0x122   : > { %2870 = vmatprep.subr.bf16.mxu0 %v3162_v3 }
 0x123   : > { %2897 = vmatpush3.bf16.msra.mxu1 %v3165_v18  ;;  %v4468_v18 = vld [vmem:[#allocation13 + $0x8] ss:$0 sm:$0xff] }
 0x124   : > { %2898 = vmatprep.subr.bf16.mxu1 %v3167_v54 }
 0x125   : > { %2871 = vmatpush3.bf16.msra.mxu0 %v3162_v3 }
 0x126   : > { %2872 = vmatprep.subr.bf16.mxu0 %v3164_v61 }
 0x127   : > { %2899 = vmatpush3.bf16.msra.mxu1 %v3167_v54 }
 0x128   : > { %2932 = vmatprep.subr.bf16.mxu1 %v4419_v13 }
 0x129   : > { %2873 = vmatpush3.bf16.msra.mxu0 %v3164_v61 }
 0x12a   : > { %2874 = vmatprep.subr.bf16.mxu0 %v3166_v59 }
 0x12d   : > { %2875 = vmatpush3.bf16.msra.mxu0 %v3166_v59 }
 0x12e   : > { %2908 = vmatprep.subr.bf16.mxu0 %v4417_v8 }
 0x1a9   : > { %v2830_v9 = vpop.f32.mrf.mxu0 }
 0x1ab   : > { %v1133_v7 = vpop.f32.mrf.mxu0 }
 0x1ad   : > { %v2831_v31 = vpop.f32.mrf.mxu0 }
 0x1af   : > { %v1136_v42 = vpop.f32.mrf.mxu0 }
 0x1b4   : > { %v2854_v47 = vpop.f32.mrf.mxu1 }
 0x1b5   : > { %v1255_v0 = vadd.f32 %v2854_v47, %v2830_v9 }
 0x1b6   : > { %v1246_v4 = vpop.f32.mrf.mxu1 }
 0x1b7   : > { %v4437_v24 = vadd.f32 %v4429_v38, %v1255_v0  ;;  %v1247_v6 = vadd.f32 %v1246_v4, %v1133_v7 }
 0x1b8   : > { %v2855_v53 = vpop.f32.mrf.mxu1 }
 0x1b9   : > { %v1284_v58 = vadd.f32 %v4429_v38, %v1247_v6  ;;  %v1258_v44 = vadd.f32 %v2855_v53, %v2831_v31  ;;  %v1314_v52 = vrot.slane %v4437_v24, 7  ;;  %v1334_v3 = vrot.slane %v4437_v24, 1 }
 0x1ba   : > { %v1249_v41 = vpop.f32.mrf.mxu1  ;;  %v1498_v6 = vmul.f32 %v4474_v11, %v4437_v24 }
 0x1bb   : > { %v4444_v5 = vadd.f32 %v4429_v38, %v1258_v44  ;;  %v1250_v2 = vadd.f32 %v1249_v41, %v1136_v42  ;;  %v1312_v33 = vrot.slane %v1284_v58, 7  ;;  %v1332_v36 = vrot.slane %v1284_v58, 1 }
 0x1bc   : > { %v1357_v27 = vmul.f32 %v4431_v17, %v1284_v58  ;;  %v1433_v43 = vmul.f32 %v4457_v34, %v1284_v58  ;;  %v1324_v63 = vmul.f32 %v3977_v15, %v1314_v52  ;;  %v1344_v47 = vmul.f32 %v3979_v16, %v1334_v3 }
 0x1bd   : > { %v1285_v30 = vadd.f32 %v4429_v38, %v1250_v2  ;;  %v1322_v48 = vmul.f32 %v3977_v15, %v1312_v33  ;;  %v1342_v62 = vmul.f32 %v3979_v16, %v1332_v36 }
 0x1be   : > { %v1477_v0 = vmul.f32 %v4468_v18, %v1324_v63  ;;  %v1519_v41 = vmul.f32 %v4479_v22, %v1344_v47  ;;  %v1372_v33 = vmul.f32 %v4424_v32, %v1324_v63  ;;  %v1414_v36 = vmul.f32 %v4451_v20, %v1324_v63 }
 0x1bf   : > { %v1313_v12 = vrot.slane %v1285_v30, 7  ;;  %v1333_v56 = vrot.slane %v1285_v30, 1  ;;  %v1370_v1 = vmul.f32 %v4424_v32, %v1322_v48  ;;  %v1412_v21 = vmul.f32 %v4451_v20, %v1322_v48 }
 0x1c0   : > { %v1391_v51 = vmul.f32 %v4439_v37, %v1342_v62  ;;  %v1454_v60 = vmul.f32 %v4462_v10, %v1342_v62  ;;  %v1434_v61 = vmul.f32 %v4457_v34, %v1285_v30  ;;  %v1358_v7 = vmul.f32 %v4431_v17, %v1285_v30 }
 0x1c1   : > { %v1323_v39 = vmul.f32 %v3977_v15, %v1313_v12  ;;  %v1378_v14 = vadd.f32 %v1370_v1, %v1357_v27  ;;  %v1420_v45 = vadd.f32 %v1412_v21, %v1398_v57  ;;  %v1343_v23 = vmul.f32 %v3979_v16, %v1333_v56 }
 0x1c2   : > { %v1497_v4 = vmul.f32 %v4474_v11, %v1285_v30  ;;  %v1315_v30 = vrot.slane %v4444_v5, 7  ;;  %v1359_v62 = vmul.f32 %v4431_v17, %v4437_v24  ;;  %v1435_v1 = vmul.f32 %v4457_v34, %v4437_v24 }
 0x1c3   : > { %v1399_v25 = vadd.f32 %v1391_v51, %v1378_v14  ;;  %v1413_v49 = vmul.f32 %v4451_v20, %v1323_v39  ;;  %v1441_v26 = vadd.f32 %v1433_v43, %v1420_v45  ;;  %v1371_v59 = vmul.f32 %v4424_v32, %v1323_v39  ;;  %v4501_v43 = vld [vmem:[#allocation3 + $0x20] sm:$0xff] }
 0x1c4   : > { %v1476_v29 = vmul.f32 %v4468_v18, %v1323_v39  ;;  %v1455_v50 = vmul.f32 %v4462_v10, %v1343_v23  ;;  %v1392_v42 = vmul.f32 %v4439_v37, %v1343_v23  ;;  %v1518_v44 = vmul.f32 %v4479_v22, %v1343_v23 }
 0x1c5   : > { %v1421_v55 = vadd.f32 %v1413_v49, %v1399_v25  ;;  %v1462_v54 = vadd.f32 %v1454_v60, %v1441_v26  ;;  %v1379_v35 = vadd.f32 %v1371_v59, %v1358_v7  ;;  %v1380_v56 = vadd.f32 %v1372_v33, %v1359_v62 }
 0x1c6   : > { %v1325_v27 = vmul.f32 %v3977_v15, %v1315_v30  ;;  %v1393_v21 = vmul.f32 %v4439_v37, %v1344_v47  ;;  %v1456_v51 = vmul.f32 %v4462_v10, %v1344_v47  ;;  %v1335_v23 = vrot.slane %v4444_v5, 1 }
 0x1c7   : > { %v1442_v9 = vadd.f32 %v1434_v61, %v1421_v55  ;;  %v1484_v28 = vadd.f32 %v1476_v29, %v1462_v54  ;;  %v1400_v40 = vadd.f32 %v1392_v42, %v1379_v35  ;;  %v1320_v3 = vrot.slane %v4501_v43, 7 }
 0x1c8   : > { %v1401_v14 = vadd.f32 %v1393_v21, %v1380_v56  ;;  %v1415_v45 = vmul.f32 %v4451_v20, %v1325_v27  ;;  %v1478_v63 = vmul.f32 %v4468_v18, %v1325_v27  ;;  %v1373_v24 = vmul.f32 %v4424_v32, %v1325_v27 }
 0x1c9   : > { %v1463_v31 = vadd.f32 %v1455_v50, %v1442_v9  ;;  %v1505_v53 = vadd.f32 %v1497_v4, %v1484_v28  ;;  %v1422_v57 = vadd.f32 %v1414_v36, %v1400_v40  ;;  %v1340_v61 = vrot.slane %v4501_v43, 1 }
 0x1ca   : > { %v1423_v60 = vadd.f32 %v1415_v45, %v1401_v14  ;;  %v1345_v54 = vmul.f32 %v3979_v16, %v1335_v23  ;;  %v1436_v29 = vmul.f32 %v4457_v34, %v4444_v5  ;;  %v1360_v50 = vmul.f32 %v4431_v17, %v4444_v5 }
 0x1cb   : > { %v1485_v46 = vadd.f32 %v1477_v0, %v1463_v31  ;;  %v1526_v19 = vadd.f32 %v1518_v44, %v1505_v53  ;;  %v1443_v52 = vadd.f32 %v1435_v1, %v1422_v57  ;;  %v1499_v4 = vmul.f32 %v4474_v11, %v4444_v5 }
 0x1cc   : > { %v1444_v0 = vadd.f32 %v1436_v29, %v1423_v60  ;;  %v1381_v35 = vadd.f32 %v1373_v24, %v1360_v50  ;;  %v1520_v57 = vmul.f32 %v4479_v22, %v1345_v54 }
 0x1cd   : > { %v1506_v58 = vadd.f32 %v1498_v6, %v1485_v46  ;;  %v1464_v25 = vadd.f32 %v1456_v51, %v1443_v52  ;;  %v1330_v46 = vmul.f32 %v3977_v15, %v1320_v3 }
 0x1cf   : > { %v1527_v2 = vadd.f32 %v1519_v41, %v1506_v58  ;;  %v1486_v9 = vadd.f32 %v1478_v63, %v1464_v25  ;;  %v4522_v58 = vmul.f32 %v3979_v16, %v1340_v61  ;;  %v1457_v41 = vmul.f32 %v4462_v10, %v1345_v54 }
 0x1d0   : > { %v4532_v56 = vmul.f32 %v4468_v18, %v1330_v46 }
 0x1d1   : > { %v4489_v48 = vpack.c.bf16 %v1527_v2, %v1526_v19  ;;  %v1507_v40 = vadd.f32 %v1499_v4, %v1486_v9  ;;  %v1394_v2 = vmul.f32 %v4439_v37, %v1345_v54  ;;  %v1465_v62 = vadd.f32 %v1457_v41, %v1444_v0 }
 0x1d3   : > { %2876 = vmatprep.mubr.bf16.mxu0 %v4489_v48  ;;  %2900 = vmatprep.mubr.bf16.mxu1 %v4489_v48  ;;  %v2834_v12 = vpop.f32.mrf.mxu0  ;;  %v1528_v14 = vadd.f32 %v1520_v57, %v1507_v40 }
 0x1d5   : > { %v1149_v39 = vpop.f32.mrf.mxu0 }
 0x1d7   : > { %v2835_v26 = vpop.f32.mrf.mxu0 }
 0x1d9   : > { %v1152_v31 = vpop.f32.mrf.mxu0 }
 0x1dc   : > { %v2858_v49 = vpop.f32.mrf.mxu1 }
 0x1dd   : > { %v1271_v55 = vadd.f32 %v2858_v49, %v2834_v12  ;;  %v1402_v12 = vadd.f32 %v1394_v2, %v1381_v35 }
 0x1de   : > { %v1262_v59 = vpop.f32.mrf.mxu1 }
 0x1df   : > { %v4514_v7 = vadd.f32 %v4429_v38, %v1271_v55  ;;  %v1263_v28 = vadd.f32 %v1262_v59, %v1149_v39 }
 0x1e0   : > { %v2859_v47 = vpop.f32.mrf.mxu1 }
 0x1e1   : > { %v1288_v6 = vadd.f32 %v4429_v38, %v1263_v28  ;;  %v1274_v53 = vadd.f32 %v2859_v47, %v2835_v26  ;;  %v1318_v42 = vrot.slane %v4514_v7, 7  ;;  %v1338_v19 = vrot.slane %v4514_v7, 1 }
 0x1e2   : > { %v1265_v44 = vpop.f32.mrf.mxu1  ;;  %v1363_v45 = vmul.f32 %v4431_v17, %v4514_v7 }
 0x1e3   : > { %v4528_v5 = vadd.f32 %v4429_v38, %v1274_v53  ;;  %v1266_v33 = vadd.f32 %v1265_v44, %v1152_v31  ;;  %v1316_v36 = vrot.slane %v1288_v6, 7  ;;  %v1336_v30 = vrot.slane %v1288_v6, 1 }
 0x1e4   : > { %v1328_v52 = vmul.f32 %v3977_v15, %v1318_v42  ;;  %v1500_v39 = vmul.f32 %v4474_v11, %v1288_v6  ;;  %v1361_v51 = vmul.f32 %v4431_v17, %v1288_v6  ;;  %v1437_v24 = vmul.f32 %v4457_v34, %v1288_v6 }
 0x1e5   : > { %v1289_v27 = vadd.f32 %v4429_v38, %v1266_v33  ;;  %v1326_v1 = vmul.f32 %v3977_v15, %v1316_v36  ;;  %v1346_v21 = vmul.f32 %v3979_v16, %v1336_v30  ;;  %v4544_v38 = vmul.f32 %v3979_v16, %v1338_v19  ;;  %v3170_v30 = vld [vmem:[#allocation15 + $0x70] sm:$0xff]  }
 0x1e6   : > { %v1376_v59 = vmul.f32 %v4424_v32, %v1328_v52  ;;  %v1319_v50 = vrot.slane %v4528_v5, 7  ;;  %v1339_v41 = vrot.slane %v4528_v5, 1 }
 0x1e7   : > { %v1479_v23 = vmul.f32 %v4468_v18, %v1326_v1  ;;  %v1317_v25 = vrot.slane %v1289_v27, 7  ;;  %v1337_v49 = vrot.slane %v1289_v27, 1  ;;  %v1374_v26 = vmul.f32 %v4424_v32, %v1326_v1 }
 0x1e8   : > { %v1395_v60 = vmul.f32 %v4439_v37, %v1346_v21  ;;  %v1416_v63 = vmul.f32 %v4451_v20, %v1326_v1  ;;  %v1521_v55 = vmul.f32 %v4479_v22, %v1346_v21  ;;  %v1458_v9 = vmul.f32 %v4462_v10, %v1346_v21 }
 0x1e9   : > { %v1487_v3 = vadd.f32 %v1479_v23, %v1465_v62  ;;  %v1327_v61 = vmul.f32 %v3977_v15, %v1317_v25  ;;  %v1382_v54 = vadd.f32 %v1374_v26, %v1361_v51  ;;  %v1347_v47 = vmul.f32 %v3979_v16, %v1337_v49  ;;  %v3172_v49 = vld [vmem:[#allocation15 + $0x68] sm:$0xff]  }
 0x1ea   : > { %v1424_v29 = vadd.f32 %v1416_v63, %v1402_v12  ;;  %v1397_v31 = vmul.f32 %v4439_v37, %v4544_v38  ;;  %v1438_v46 = vmul.f32 %v4457_v34, %v1289_v27  ;;  %v1329_v44 = vmul.f32 %v3977_v15, %v1319_v50  ;;  %v3173_v26 = vld [vmem:[#allocation15 + $0xe8] sm:$0xff]  }
 0x1eb   : > { %v1508_v28 = vadd.f32 %v1500_v39, %v1487_v3  ;;  %v1417_v0 = vmul.f32 %v4451_v20, %v1327_v61  ;;  %v1375_v4 = vmul.f32 %v4424_v32, %v1327_v61  ;;  %v1403_v35 = vadd.f32 %v1395_v60, %v1382_v54  ;;  %v3171_v32 = vld [vmem:[#allocation15 + $0xf0] sm:$0xff]  }
 0x1ec   : > { %v1445_v6 = vadd.f32 %v1437_v24, %v1424_v29  ;;  %v1480_v42 = vmul.f32 %v4468_v18, %v1327_v61  ;;  %v1362_v2 = vmul.f32 %v4431_v17, %v1289_v27  ;;  %v1384_v33 = vadd.f32 %v1376_v59, %v1363_v45  ;;  %v3175_v29 = vld [vmem:[#allocation15 + $0xe0] sm:$0xff]  }
 0x1ed   : > { %v1529_v53 = vadd.f32 %v1521_v55, %v1508_v28  ;;  %v1425_v40 = vadd.f32 %v1417_v0, %v1403_v35  ;;  %v1396_v62 = vmul.f32 %v4439_v37, %v1347_v47  ;;  %v1459_v57 = vmul.f32 %v4462_v10, %v1347_v47  ;;  %v3176_v35 = vld [vmem:[#allocation15 + $0x58] sm:$0xff]  }
 0x1ee   : > { %v1466_v19 = vadd.f32 %v1458_v9, %v1445_v6  ;;  %v1419_v12 = vmul.f32 %v4451_v20, %v1329_v44  ;;  %v1383_v15 = vadd.f32 %v1375_v4, %v1362_v2  ;;  %v1405_v39 = vadd.f32 %v1397_v31, %v1384_v33 }
 0x1ef   : > { %v4565_v36 = vpack.c.bf16 %v1529_v53, %v1528_v14  ;;  %v1446_v1 = vadd.f32 %v1438_v46, %v1425_v40  ;;  %v1481_v17 = vmul.f32 %v4468_v18, %v1328_v52  ;;  %v1501_v14 = vmul.f32 %v4474_v11, %v1289_v27  ;;  %v3177_v46 = vld [vmem:[#allocation15 + $0xd8] sm:$0xff]   ;;  %v4611_v40 = vld [vmem:[%s4884_s2] ss:$0 sm:$0xff] }
 0x1f0   : > { %v1488_v21 = vadd.f32 %v1480_v42, %v1466_v19  ;;  %v1349_v51 = vmul.f32 %v3979_v16, %v1339_v41  ;;  %v1404_v45 = vadd.f32 %v1396_v62, %v1383_v15  ;;  %v1418_v23 = vmul.f32 %v4451_v20, %v1328_v52  ;;  %v3181_v42 = vld [vmem:[#allocation15 + $0xc8] sm:$0xff]   ;;  %v3183_v41 = vld [vmem:[#allocation15 + $0xc0] sm:$0xff]  }
 0x1f1   : > { %2877 = vmatmul.mubr.bf16.vlgmr.msra.gmra.mxu0 %v4565_v36  ;;  %2901 = vmatmul.mubr.bf16.vlgmr.msra.gmra.mxu1 %v4565_v36  ;;  %v1467_v37 = vadd.f32 %v1459_v57, %v1446_v1  ;;  %v1502_v25 = vmul.f32 %v4474_v11, %v4514_v7  ;;  %v1427_v60 = vadd.f32 %v1419_v12, %v1405_v39 }
 0x1f2   : > { %2909 = vmatpush3.bf16.msra.mxu0 %v4417_v8  ;;  %2933 = vmatpush3.bf16.msra.mxu1 %v4419_v13  ;;  %v1440_v27 = vmul.f32 %v4457_v34, %v4528_v5  ;;  %v1509_v63 = vadd.f32 %v1501_v14, %v1488_v21  ;;  %v1426_v8 = vadd.f32 %v1418_v23, %v1404_v45 }
 0x1f3   : > { %2910 = vmatprep.subr.bf16.mxu0 %v3170_v30  ;;  %2934 = vmatprep.subr.bf16.mxu1 %v3171_v32  ;;  %v1489_v16 = vadd.f32 %v1481_v17, %v1467_v37  ;;  %v1439_v13 = vmul.f32 %v4457_v34, %v4514_v7  ;;  %v1522_v24 = vmul.f32 %v4479_v22, %v1347_v47  ;;  %v3174_v7 = vld [vmem:[#allocation15 + $0x60] sm:$0xff]  }
 0x1f4   : > { %v1523_v20 = vmul.f32 %v4479_v22, %v4544_v38  ;;  %v1448_v52 = vadd.f32 %v1440_v27, %v1427_v60  ;;  %v1461_v3 = vmul.f32 %v4462_v10, %v1349_v51  ;;  %v1460_v59 = vmul.f32 %v4462_v10, %v4544_v38 }
 0x1f5   : > { %v1510_v55 = vadd.f32 %v1502_v25, %v1489_v16  ;;  %v1447_v61 = vadd.f32 %v1439_v13, %v1426_v8  ;;  %v1504_v34 = vmul.f32 %v4474_v11, %v4501_v43  ;;  %v1530_v9 = vadd.f32 %v1522_v24, %v1509_v63 }
 0x1f6   : > { %2911 = vmatpush3.bf16.msra.mxu0 %v3170_v30  ;;  %2935 = vmatpush3.bf16.msra.mxu1 %v3171_v32  ;;  %v1469_v54 = vadd.f32 %v1461_v3, %v1448_v52  ;;  %v1482_v47 = vmul.f32 %v4468_v18, %v1329_v44  ;;  %v1525_v0 = vmul.f32 %v4479_v22, %v4522_v58  ;;  %v3182_v44 = vld [vmem:[#allocation15 + $0x40] sm:$0xff]  }
 0x1f7   : > { %2912 = vmatprep.subr.bf16.mxu0 %v3172_v49  ;;  %2936 = vmatprep.subr.bf16.mxu1 %v3173_v26  ;;  %v1531_v50 = vadd.f32 %v1523_v20, %v1510_v55  ;;  %v1468_v28 = vadd.f32 %v1460_v59, %v1447_v61  ;;  %v1503_v38 = vmul.f32 %v4474_v11, %v4528_v5  ;;  %v3178_v11 = vld [vmem:[#allocation15 + $0x50] sm:$0xff]  }
 0x1f8   : > { %v1491_v31 = vadd.f32 %v4532_v56, %v1469_v54  ;;  %v1524_v56 = vmul.f32 %v4479_v22, %v1349_v51  ;;  %v3179_v5 = vld [vmem:[#allocation15 + $0xd0] sm:$0xff]   ;;  %v3180_v22 = vld [vmem:[#allocation15 + $0x48] sm:$0xff]  }
 0x1f9   : > { %v1536_v4 = vpack.c.bf16 %v1531_v50, %v1530_v9  ;;  %v1490_v10 = vadd.f32 %v1482_v47, %v1468_v28 }
 0x1fa   : > { %2913 = vmatpush3.bf16.msra.mxu0 %v3172_v49  ;;  %2937 = vmatpush3.bf16.msra.mxu1 %v3173_v26  ;;  %v1512_v43 = vadd.f32 %v1504_v34, %v1491_v31 }
 0x1fb   : > { %2914 = vmatprep.subr.bf16.mxu0 %v3174_v7  ;;  %2938 = vmatprep.subr.bf16.mxu1 %v3175_v29  ;;  %v1511_v18 = vadd.f32 %v1503_v38, %v1490_v10 }
 0x1fc   : > { %2880 = vmatprep.mubr.bf16.mxu0 %v1536_v4  ;;  %2904 = vmatprep.mubr.bf16.mxu1 %v1536_v4  ;;  %v1533_v53 = vadd.f32 %v1525_v0, %v1512_v43 }
 0x1fd   : > { %v1532_v6 = vadd.f32 %v1524_v56, %v1511_v18 }
 0x1fe   : > { %2915 = vmatpush3.bf16.msra.mxu0 %v3174_v7  ;;  %2939 = vmatpush3.bf16.msra.mxu1 %v3175_v29 }
 0x1ff   : > { %2916 = vmatprep.subr.bf16.mxu0 %v3176_v35  ;;  %2940 = vmatprep.subr.bf16.mxu1 %v3177_v46  ;;  %v1537_v58 = vpack.c.bf16 %v1533_v53, %v1532_v6 }
 0x201   : > { %2881 = vmatmul.mubr.bf16.gmra.mxu0 %v1537_v58  ;;  %2905 = vmatmul.mubr.bf16.gmra.mxu1 %v1537_v58 }
 0x202   : > { %2924 = vmatprep.mubr.bf16.mxu0 %v4489_v48  ;;  %2948 = vmatprep.mubr.bf16.mxu1 %v4489_v48  ;;  %v4606_v48 = vld [vmem:[%s4884_s2 + $0x2] ss:$0 sm:$0xff] }
 0x203   : > { %2917 = vmatpush3.bf16.msra.mxu0 %v3176_v35  ;;  %2941 = vmatpush3.bf16.msra.mxu1 %v3177_v46 }
 0x204   : > { %2918 = vmatprep.subr.bf16.mxu0 %v3178_v11  ;;  %2942 = vmatprep.subr.bf16.mxu1 %v3179_v5 }
 0x207   : > { %2919 = vmatpush3.bf16.msra.mxu0 %v3178_v11  ;;  %2943 = vmatpush3.bf16.msra.mxu1 %v3179_v5 }
 0x208   : > { %2920 = vmatprep.subr.bf16.mxu0 %v3180_v22  ;;  %2944 = vmatprep.subr.bf16.mxu1 %v3181_v42 }
 0x20b   : > { %2921 = vmatpush3.bf16.msra.mxu0 %v3180_v22  ;;  %2945 = vmatpush3.bf16.msra.mxu1 %v3181_v42 }
 0x20c   : > { %2922 = vmatprep.subr.bf16.mxu0 %v3182_v44  ;;  %2946 = vmatprep.subr.bf16.mxu1 %v3183_v41 }
 0x20f   : > { %2923 = vmatpush3.bf16.msra.mxu0 %v3182_v44  ;;  %2947 = vmatpush3.bf16.msra.mxu1 %v3183_v41 }
 0x212   : > { %2925 = vmatmul.mubr.bf16.vlgmr.msra.gmra.mxu0 %v4565_v36  ;;  %2949 = vmatmul.mubr.bf16.vlgmr.msra.gmra.mxu1 %v4565_v36 }
 0x213   : > { %2928 = vmatprep.mubr.bf16.mxu0 %v1536_v4  ;;  %2952 = vmatprep.mubr.bf16.mxu1 %v1536_v4 }
 0x21a   : > { %2929 = vmatmul.mubr.bf16.gmra.mxu0 %v1537_v58  ;;  %2953 = vmatmul.mubr.bf16.gmra.mxu1 %v1537_v58 }
 0x2b1   : > { %v2878_v19 = vpop.f32.mrf.mxu0  ;;  %v2902_v2 = vpop.f32.mrf.mxu1 }
 0x2b2   : > { %v1662_v33 = vadd.f32 %v2878_v19, %v4606_v48  ;;  %v1854_v36 = vadd.f32 %v2902_v2, %v4611_v40 }
 0x2b3   : > { %v1653_v30 = vpop.f32.mrf.mxu0  ;;  %v1845_v32 = vpop.f32.mrf.mxu1 }
 0x2b4   : > { %v2632_v62 = vmul.f32 -1.442695, %v1662_v33  ;;  %v2649_v57 = vmul.f32 -1.442695, %v1854_v36  ;;  %v1654_v12 = vadd.f32 %v4606_v48, %v1653_v30  ;;  %v1846_v1 = vadd.f32 %v4611_v40, %v1845_v32  ;;  %v4632_v33 = vld [vmem:[%s4884_s2 + $0x1] ss:$0 sm:$0xff] }
 0x2b5   : > { %v2879_v21 = vpop.f32.mrf.mxu0  ;;  %v2903_v15 = vpop.f32.mrf.mxu1 }
 0x2b6   : > { %3184 = vpow2.f32 %v2632_v62  ;;  %v2630_v39 = vmul.f32 -1.442695, %v1654_v12  ;;  %v2647_v17 = vmul.f32 -1.442695, %v1846_v1  ;;  %v1665_v14 = vadd.f32 %v2879_v21, %v4606_v48 }
 0x2b7   : > { %3186 = vpow2.f32 %v2649_v57  ;;  %v1857_v51 = vadd.f32 %v2903_v15, %v4611_v40  ;;  %v1656_v37 = vpop.f32.mrf.mxu0  ;;  %v1848_v45 = vpop.f32.mrf.mxu1 }
 0x2b8   : > { %3188 = vpow2.f32 %v2630_v39  ;;  %v2633_v23 = vmul.f32 -1.442695, %v1665_v14  ;;  %v1657_v25 = vadd.f32 %v4606_v48, %v1656_v37  ;;  %v1849_v49 = vadd.f32 %v4611_v40, %v1848_v45  ;;  %v1540_v37 = vld [vmem:[%s3966_s9 + $0x10] sm:$0xff] }
 0x2b9   : > { %3190 = vpow2.f32 %v2647_v17  ;;  %v2650_v26 = vmul.f32 -1.442695, %v1857_v51 }
 0x2ba   : > { %3192 = vpow2.f32 %v2633_v23  ;;  %v2631_v60 = vmul.f32 -1.442695, %v1657_v25  ;;  %v2648_v27 = vmul.f32 -1.442695, %v1849_v49 }
 0x2bb   : > { %3194 = vpow2.f32 %v2650_v26 }
 0x2bc   : > { %3196 = vpow2.f32 %v2631_v60  ;;  %v1538_v60 = vld [vmem:[%s3966_s9] sm:$0xff] }
 0x2bd   : > { %3198 = vpow2.f32 %v2648_v27 }
 0x2c1   : > { %v2882_v16 = vpop.f32.mrf.mxu0  ;;  %v2906_v63 = vpop.f32.mrf.mxu1 }
 0x2c2   : > { %v1678_v54 = vadd.f32 %v2882_v16, %v4606_v48  ;;  %v1870_v50 = vadd.f32 %v2906_v63, %v4611_v40 }
 0x2c3   : > { %v3185_v8 = vpop.eup %3184  ;;  %v1669_v20 = vpop.f32.mrf.mxu0 }
 0x2c4   : > { %v3187_v13 = vpop.eup %3186  ;;  %v1710_v24 = vadd.f32 1.0, %v3185_v8  ;;  %v1861_v52 = vpop.f32.mrf.mxu1  ;;  %v1670_v31 = vadd.f32 %v4606_v48, %v1669_v20  ;;  %v2636_v46 = vmul.f32 -1.442695, %v1678_v54  ;;  %v2653_v53 = vmul.f32 -1.442695, %v1870_v50 }
 0x2c5   : > { %v3189_v3 = vpop.eup %3188  ;;  %v1902_v55 = vadd.f32 1.0, %v3187_v13  ;;  %v2883_v34 = vpop.f32.mrf.mxu0  ;;  %v1862_v10 = vadd.f32 %v4611_v40, %v1861_v52 }
 0x2c6   : > { %v3191_v61 = vpop.eup %3190  ;;  %3200 = vrcp.f32 %v1710_v24  ;;  %v1708_v59 = vadd.f32 1.0, %v3189_v3  ;;  %v2907_v7 = vpop.f32.mrf.mxu1  ;;  %v1681_v18 = vadd.f32 %v2883_v34, %v4606_v48  ;;  %v2634_v11 = vmul.f32 -1.442695, %v1670_v31 }
 0x2c7   : > { %v3193_v29 = vpop.eup %3192  ;;  %3202 = vrcp.f32 %v1902_v55  ;;  %v1900_v9 = vadd.f32 1.0, %v3191_v61  ;;  %v1672_v38 = vpop.f32.mrf.mxu0  ;;  %v1873_v58 = vadd.f32 %v2907_v7, %v4611_v40  ;;  %v2651_v22 = vmul.f32 -1.442695, %v1862_v10 }
 0x2c8   : > { %v3195_v28 = vpop.eup %3194  ;;  %3204 = vrcp.f32 %v1708_v59  ;;  %v1711_v47 = vadd.f32 1.0, %v3193_v29  ;;  %v1864_v56 = vpop.f32.mrf.mxu1  ;;  %v1673_v5 = vadd.f32 %v4606_v48, %v1672_v38  ;;  %v2637_v44 = vmul.f32 -1.442695, %v1681_v18  ;;  %v4637_v48 = vld [vmem:[%s4884_s2 + $0x3] ss:$0 sm:$0xff]  ;;  %v1541_v59 = vld [vmem:[%s3966_s9 + $0x18] sm:$0xff] }
 0x2c9   : > { %v3197_v0 = vpop.eup %3196  ;;  %3206 = vrcp.f32 %v1900_v9  ;;  %v1903_v4 = vadd.f32 1.0, %v3195_v28  ;;  %v1865_v42 = vadd.f32 %v4611_v40, %v1864_v56  ;;  %v2654_v41 = vmul.f32 -1.442695, %v1873_v58  ;;  %v1539_v18 = vld [vmem:[%s3966_s9 + $0x8] sm:$0xff] }
 0x2ca   : > { %v3199_v43 = vpop.eup %3198  ;;  %3208 = vrcp.f32 %v1711_v47  ;;  %v1709_v35 = vadd.f32 1.0, %v3197_v0  ;;  %v2635_v19 = vmul.f32 -1.442695, %v1673_v5 }
 0x2cb   : > { %3210 = vrcp.f32 %v1903_v4  ;;  %v1901_v6 = vadd.f32 1.0, %v3199_v43  ;;  %v2652_v2 = vmul.f32 -1.442695, %v1865_v42 }
 0x2cc   : > { %3212 = vrcp.f32 %v1709_v35 }
 0x2cd   : > { %3214 = vrcp.f32 %v1901_v6 }
 0x2ce   : > { %3216 = vpow2.f32 %v2636_v46 }
 0x2cf   : > { %3218 = vpow2.f32 %v2653_v53 }
 0x2d0   : > { %3220 = vpow2.f32 %v2634_v11 }
 0x2d1   : > { %3222 = vpow2.f32 %v2651_v22 }
 0x2d2   : > { %3224 = vpow2.f32 %v2637_v44  ;;  %v2926_v36 = vpop.f32.mrf.mxu0  ;;  %v2950_v30 = vpop.f32.mrf.mxu1 }
 0x2d3   : > { %v3201_v40 = vpop.eup %3200  ;;  %3226 = vpow2.f32 %v2654_v41  ;;  %v2040_v62 = vadd.f32 %v2926_v36, %v4632_v33  ;;  %v2226_v57 = vadd.f32 %v2950_v30, %v4637_v48 }
 0x2d4   : > { %v3203_v32 = vpop.eup %3202  ;;  %3228 = vpow2.f32 %v2635_v19  ;;  %v2031_v1 = vpop.f32.mrf.mxu0  ;;  %v1734_v3 = vmul.f32 %v3201_v40, %v1540_v37 }
 0x2d5   : > { %v3205_v12 = vpop.eup %3204  ;;  %3230 = vpow2.f32 %v2652_v2  ;;  %v2217_v21 = vpop.f32.mrf.mxu1  ;;  %v2064_v39 = vmax.f32 %v2040_v62, 0.0  ;;  %v2677_v17 = vmul.f32 -1.442695, %v2226_v57  ;;  %v2032_v14 = vadd.f32 %v4632_v33, %v2031_v1 }
 0x2d6   : > { %v3207_v15 = vpop.eup %3206  ;;  %v2218_v45 = vadd.f32 %v4637_v48, %v2217_v21  ;;  %v2927_v23 = vpop.f32.mrf.mxu0  ;;  %v1732_v7 = vmul.f32 %v3205_v12, %v1538_v60 }
 0x2d7   : > { %v3209_v51 = vpop.eup %3208  ;;  %v2951_v25 = vpop.f32.mrf.mxu1  ;;  %v2072_v26 = vmin.f32 %v2064_v39, 6.0  ;;  %3232 = vpow2.f32 %v2677_v17  ;;  %v2062_v27 = vmax.f32 %v2032_v14, 0.0  ;;  %v2043_v8 = vadd.f32 %v2927_v23, %v4632_v33 }
 0x2d8   : > { %v3211_v49 = vpop.eup %3210  ;;  %v2675_v63 = vmul.f32 -1.442695, %v2218_v45  ;;  %v2229_v13 = vadd.f32 %v2951_v25, %v4637_v48  ;;  %v2034_v24 = vpop.f32.mrf.mxu0  ;;  %v1735_v35 = vmul.f32 %v3209_v51, %v1541_v59 }
 0x2d9   : > { %v3213_v16 = vpop.eup %3212  ;;  %v2220_v20 = vpop.f32.mrf.mxu1  ;;  %v2080_v55 = vmul.f32 %v3203_v32, %v2072_v26  ;;  %v2070_v61 = vmin.f32 %v2062_v27, 6.0  ;;  %v2035_v54 = vadd.f32 %v4632_v33, %v2034_v24  ;;  %v2065_v29 = vmax.f32 %v2043_v8, 0.0 }
 0x2da   : > { %v3215_v52 = vpop.eup %3214  ;;  %3234 = vpow2.f32 %v2675_v63  ;;  %v2678_v9 = vmul.f32 -1.442695, %v2229_v13  ;;  %v2930_v50 = vpop.f32.mrf.mxu0  ;;  %v2221_v5 = vadd.f32 %v4637_v48, %v2220_v20  ;;  %v1733_v40 = vmul.f32 %v3213_v16, %v1539_v18 }
 0x2db   : > { %v3217_v34 = vpop.eup %3216  ;;  %v2954_v28 = vpop.f32.mrf.mxu1  ;;  %v4649_v0 = vadd.f32 %v2080_v55, %v1734_v3  ;;  %v2078_v4 = vmul.f32 %v3207_v15, %v2070_v61  ;;  %v2063_v10 = vmax.f32 %v2035_v54, 0.0  ;;  %v2073_v46 = vmin.f32 %v2065_v29, 6.0  ;;  %v1544_v54 = vld [vmem:[%s3966_s9 + $0x30] sm:$0xff] }
 0x2dc   : > { %v3219_v47 = vpop.eup %3218  ;;  %v1714_v31 = vadd.f32 1.0, %v3217_v34  ;;  %3236 = vpow2.f32 %v2678_v9  ;;  %v2047_v56 = vpop.f32.mrf.mxu0  ;;  %v2676_v15 = vmul.f32 -1.442695, %v2221_v5  ;;  %v2056_v39 = vadd.f32 %v2930_v50, %v4632_v33  ;;  %v1543_v5 = vld [vmem:[%s3966_s9 + $0x28] sm:$0xff] }
 0x2dd   : > { %v3221_v38 = vpop.eup %3220  ;;  %v1906_v43 = vadd.f32 1.0, %v3219_v47  ;;  %v2233_v6 = vpop.f32.mrf.mxu1  ;;  %2306 = vst [vmem:[%s3966_s9 + $0x10] sm:$0xff] %v4649_v0  ;;  %v4654_v11 = vadd.f32 %v2078_v4, %v1732_v7  ;;  %v2081_v44 = vmul.f32 %v3211_v49, %v2073_v46  ;;  %v2071_v41 = vmin.f32 %v2063_v10, 6.0 }
 0x2de   : > { %v3223_v53 = vpop.eup %3222  ;;  %3238 = vrcp.f32 %v1714_v31  ;;  %v1712_v58 = vadd.f32 1.0, %v3221_v38  ;;  %v2931_v57 = vpop.f32.mrf.mxu0  ;;  %v2242_v51 = vadd.f32 %v2954_v28, %v4637_v48  ;;  %v2048_v37 = vadd.f32 %v4632_v33, %v2047_v56 }
 0x2df   : > { %v3225_v22 = vpop.eup %3224  ;;  %3240 = vrcp.f32 %v1906_v43  ;;  %v1904_v42 = vadd.f32 1.0, %v3223_v53  ;;  %2304 = vst [vmem:[%s3966_s9] sm:$0xff] %v4654_v11  ;;  %v4659_v32 = vadd.f32 %v2081_v44, %v1735_v35  ;;  %v2079_v62 = vmul.f32 %v3215_v52, %v2071_v41  ;;  %v2955_v12 = vpop.f32.mrf.mxu1  ;;  %v1545_v43 = vld [vmem:[%s3966_s9 + $0x38] sm:$0xff] }
 0x2e0   : > { %v3227_v19 = vpop.eup %3226  ;;  %3242 = vrcp.f32 %v1712_v58  ;;  %v1715_v2 = vadd.f32 1.0, %v3225_v22  ;;  %v2068_v23 = vmax.f32 %v2056_v39, 0.0  ;;  %v2234_v25 = vadd.f32 %v4637_v48, %v2233_v6  ;;  %v2050_v49 = vpop.f32.mrf.mxu0 }
 0x2e1   : > { %v3229_v36 = vpop.eup %3228  ;;  %3244 = vrcp.f32 %v1904_v42  ;;  %v1907_v30 = vadd.f32 1.0, %v3227_v19  ;;  %2307 = vst [vmem:[%s3966_s9 + $0x18] sm:$0xff] %v4659_v32  ;;  %v4664_v14 = vadd.f32 %v2079_v62, %v1733_v40  ;;  %v2236_v26 = vpop.f32.mrf.mxu1  ;;  %v2681_v27 = vmul.f32 -1.442695, %v2242_v51 }
 0x2e2   : > { %v3231_v1 = vpop.eup %3230  ;;  %3246 = vrcp.f32 %v1715_v2  ;;  %v1713_v21 = vadd.f32 1.0, %v3229_v36  ;;  %v2066_v16 = vmax.f32 %v2048_v37, 0.0  ;;  %v2679_v63 = vmul.f32 -1.442695, %v2234_v25 }
 0x2e3   : > { %3248 = vrcp.f32 %v1907_v30  ;;  %v1905_v17 = vadd.f32 1.0, %v3231_v1  ;;  %2305 = vst [vmem:[%s3966_s9 + $0x8] sm:$0xff] %v4664_v14  ;;  %v2059_v8 = vadd.f32 %v2931_v57, %v4632_v33  ;;  %v2245_v24 = vadd.f32 %v2955_v12, %v4637_v48 }
 0x2e4   : > { %3250 = vrcp.f32 %v1713_v21  ;;  %v3233_v45 = vpop.eup %3232  ;;  %v2051_v20 = vadd.f32 %v4632_v33, %v2050_v49  ;;  %v2237_v52 = vadd.f32 %v4637_v48, %v2236_v26  ;;  %v2076_v55 = vmin.f32 %v2068_v23, 6.0  ;;  %v1542_v33 = vld [vmem:[%s3966_s9 + $0x20] sm:$0xff] }
 0x2e5   : > { %3252 = vrcp.f32 %v1905_v17  ;;  %v2274_v60 = vadd.f32 1.0, %v3233_v45  ;;  %v2069_v61 = vmax.f32 %v2059_v8, 0.0  ;;  %v2682_v34 = vmul.f32 -1.442695, %v2245_v24 }
 0x2e6   : > { %3254 = vpow2.f32 %v2676_v15  ;;  %v2680_v7 = vmul.f32 -1.442695, %v2237_v52  ;;  %v2074_v50 = vmin.f32 %v2066_v16, 6.0  ;;  %v2067_v28 = vmax.f32 %v2051_v20, 0.0 }
 0x2e7   : > { %v3235_v13 = vpop.eup %3234  ;;  %3256 = vrcp.f32 %v2274_v60  ;;  %v2077_v10 = vmin.f32 %v2069_v61, 6.0  ;;  %v2096_v58 = vmax.f32 %v4649_v0, 0.0  ;;  %v2094_v40 = vmax.f32 %v4654_v11, 0.0 }
 0x2e8   : > { %v2272_v3 = vadd.f32 1.0, %v3235_v13  ;;  %3258 = vpow2.f32 %v2681_v27  ;;  %v2075_v6 = vmin.f32 %v2067_v28, 6.0  ;;  %v2097_v11 = vmax.f32 %v4659_v32, 0.0 }
 0x2e9   : > { %v3237_v59 = vpop.eup %3236  ;;  %3260 = vpow2.f32 %v2679_v63  ;;  %v2104_v62 = vmin.f32 %v2096_v58, 6.0  ;;  %v2102_v17 = vmin.f32 %v2094_v40, 6.0 }
 0x2ea   : > { %3262 = vrcp.f32 %v2272_v3  ;;  %v2275_v9 = vadd.f32 1.0, %v3237_v59 }
 0x2eb   : > { %v3239_v29 = vpop.eup %3238  ;;  %3264 = vpow2.f32 %v2682_v34 }
 0x2ec   : > { %v3241_v47 = vpop.eup %3240  ;;  %3266 = vrcp.f32 %v2275_v9  ;;  %v1738_v31 = vmul.f32 %v3239_v29, %v1544_v54 }
 0x2ed   : > { %v3243_v48 = vpop.eup %3242  ;;  %v2084_v4 = vmul.f32 %v3241_v47, %v2076_v55  ;;  %3268 = vpow2.f32 %v2680_v7 }
 0x2ee   : > { %v3245_v38 = vpop.eup %3244  ;;  %v1736_v18 = vmul.f32 %v3243_v48, %v1542_v33 }
 0x2ef   : > { %v3247_v35 = vpop.eup %3246  ;;  %v4678_v46 = vadd.f32 %v2084_v4, %v1738_v31  ;;  %v2082_v56 = vmul.f32 %v3245_v38, %v2074_v50 }
 0x2f0   : > { %v3249_v53 = vpop.eup %3248  ;;  %v1739_v44 = vmul.f32 %v3247_v35, %v1545_v43 }
 0x2f1   : > { %v3251_v22 = vpop.eup %3250  ;;  %2310 = vst [vmem:[%s3966_s9 + $0x30] sm:$0xff] %v4678_v46  ;;  %v4684_v42 = vadd.f32 %v2082_v56, %v1736_v18  ;;  %v2085_v41 = vmul.f32 %v3249_v53, %v2077_v10 }
 0x2f2   : > { %v3253_v19 = vpop.eup %3252  ;;  %v1737_v0 = vmul.f32 %v3251_v22, %v1543_v5 }
 0x2f3   : > { %v3255_v2 = vpop.eup %3254  ;;  %2308 = vst [vmem:[%s3966_s9 + $0x20] sm:$0xff] %v4684_v42  ;;  %v4691_v36 = vadd.f32 %v2085_v41, %v1739_v44  ;;  %v2083_v30 = vmul.f32 %v3253_v19, %v2075_v6 }
 0x2f4   : > { %v2273_v57 = vadd.f32 1.0, %v3255_v2  ;;  %v3257_v12 = vpop.eup %3256 }
 0x2f5   : > { %2311 = vst [vmem:[%s3966_s9 + $0x38] sm:$0xff] %v4691_v36  ;;  %v4703_v1 = vadd.f32 %v2083_v30, %v1737_v0  ;;  %v3259_v21 = vpop.eup %3258  ;;  %v2298_v15 = vmul.f32 %v3257_v12, %v2104_v62 }
 0x2f6   : > { %3270 = vrcp.f32 %v2273_v57  ;;  %v3261_v39 = vpop.eup %3260  ;;  %v2278_v51 = vadd.f32 1.0, %v3259_v21 }
 0x2f7   : > { %2309 = vst [vmem:[%s3966_s9 + $0x28] sm:$0xff] %v4703_v1  ;;  %v3263_v37 = vpop.eup %3262  ;;  %2315 = vst [vmem:[#allocation2 + $0x10] sm:$0xff] %v2298_v15  ;;  %v2276_v45 = vadd.f32 1.0, %v3261_v39 }
 0x2f8   : > { %3477 = shalt.err (!%p3474_p8)
}
 0x2f9   : > { %s3478_s18 = scalar_lea.hbm %s4696_s30, 1024  ;;  %s3482_s6 = scalar_lea.hbm %s4886_s1, 2048 }
 0x2fa   : > { %p3479_p9 = scmp.ne.s32.totalorder %s4696_s30, %s3478_s18  ;;  %p3483_p3 = scmp.lt.s32.totalorder %s4696_s30, %s4886_s1 }
 0x2fb   : > { %p3484_p0 = scmp.lt.s32.totalorder %s3482_s6, %s3478_s18 }
 0x2fc   : > { %p3480_p11 = pnand %p3479_p9, %p3903_p10 }
 0x2fd   : > { %p3485_p13 = por %p3484_p0, %p3483_p3 }
 0x2fe   : > { %p3481_p5 = pneg %p3480_p11 }
 0x300   : > { %p3486_p12 = pnand %p3485_p13, %p3481_p5 }
 0x302   : > { %3489 = shalt.err (!%p3486_p12)
}
 0x303   : > { %s3640_s26 = smov 128   ;;  %s3641_s25 = smov 8   ;;  %v3265_v32 = vpop.eup %3264  ;;  %v2296_v23 = vmul.f32 %v3263_v37, %v2102_v17  ;;  %v2105_v25 = vmin.f32 %v2097_v11, 6.0  ;;  %3272 = vrcp.f32 %v2278_v51  ;;  %v2095_v8 = vmax.f32 %v4664_v14, 0.0 }
 0x304   : > { %2987 = dma.vmem_to_hbm [thread:$0]  (%p3903_p10), %s4698_s7, 1024, %s4696_s30, %s4709_s27, %s3640_s26, %s3640_s26, %s3641_s25   ;;  %v3267_v49 = vpop.eup %3266  ;;  %3274 = vrcp.f32 %v2276_v45  ;;  %v2279_v26 = vadd.f32 1.0, %v3265_v32  ;;  %v2100_v13 = vmax.f32 %v4678_v46, 0.0  ;;  %v2098_v20 = vmax.f32 %v4684_v42, 0.0 }
 0x305   : > { %v3269_v60 = vpop.eup %3268  ;;  %2313 = vst [vmem:[#allocation2] sm:$0xff] %v2296_v23  ;;  %v2299_v27 = vmul.f32 %v3267_v49, %v2105_v25  ;;  %v2103_v24 = vmin.f32 %v2095_v8, 6.0  ;;  %v2101_v55 = vmax.f32 %v4691_v36, 0.0  ;;  %s2685_s4 = sshll.u32 %s4885_s22, 3  ;;  %s2686_s7 = sshll.u32 %s3610_s19, 4  ;;  %v2099_v14 = vmax.f32 %v4703_v1, 0.0 }
 0x306   : > { %3276 = vrcp.f32 %v2279_v26  ;;  %v2277_v16 = vadd.f32 1.0, %v3269_v60  ;;  %v3271_v52 = vpop.eup %3270  ;;  %v2108_v61 = vmin.f32 %v2100_v13, 6.0  ;;  %v2106_v54 = vmin.f32 %v2098_v20, 6.0  ;;  %s2355_s30 = sadd.s32 %s2686_s7, %s2685_s4  ;;  %s2358_s19 = sshll.u32 %s3964_s11, 4  ;;  %s4742_s19 = int_to_ptr.vmem [resolvable:$true] %s2358_s19 }
 0x307   : > { %2316 = vst [vmem:[#allocation2 + $0x48] sm:$0xff] %v2299_v27  ;;  %v2721_v63 = vpack.c.bf16 %v2299_v27, %v2298_v15  ;;  %v2297_v3 = vmul.f32 %v3271_v52, %v2103_v24  ;;  %v2109_v50 = vmin.f32 %v2101_v55, 6.0  ;;  %v2107_v33 = vmin.f32 %v2099_v14, 6.0  ;;  %s2687_s22 = sshll.u32 %s2355_s30, 6  ;;  %s4887_s28 = sld [smem:[#allocation42_spill]] }
 0x308   : > { %3278 = vrcp.f32 %v2277_v16  ;;  %s2338_s5 = scalar_lea.sflag [#allocation6], %s3938_s29  ;;  %s3490_s18 = scalar_lea.vmem %s4742_s19, 512 }
 0x309   : > { %2737 = vst [vmem:[%s3964_s11 + $0x8] sm:$0xff] %v2721_v63   ;;  %2314 = vst [vmem:[#allocation2 + $0x18] sm:$0xff] %v2297_v3  ;;  %v2716_v34 = vpack.c.bf16 %v2297_v3, %v2296_v23  ;;  %p3491_p10 = scmp.ne.s32.totalorder %s4742_s19, %s3490_s18  ;;  %p4888_p2 = scmp.ne.s32.totalorder %s4871_s24, 0 }
 0x30a   : > { %s3642_s9 = smov [#allocation16]  }
 0x30b   : > { %2717 = vst [vmem:[%s3964_s11] sm:$0xff] %v2716_v34   ;;  %p3492_p4 = pnand %p3491_p10, %p4888_p2  ;;  %s3494_s3 = sshll.u32 %s3642_s9, 4  ;;  %s3495_s3 = int_to_ptr.vmem [resolvable:$false] %s3494_s3 }
 0x30c   : > { %s3496_s6 = scalar_lea.vmem %s3495_s3, 1024  ;;  %p3497_p8 = scmp.lt.s32.totalorder %s4742_s19, %s3495_s3 }
 0x30d   : > { %s4748_s20 = scalar_lea.hbm %s4887_s28, %s2687_s22  ;;  %p3493_p7 = pneg %p3492_p4 }
 0x30e   : > { %p3498_p9 = scmp.lt.s32.totalorder %s3496_s6, %s3490_s18 }
 0x310   : > { %v3273_v59 = vpop.eup %3272  ;;  %p3499_p11 = por %p3498_p9, %p3497_p8 }
 0x311   : > { %v3275_v7 = vpop.eup %3274  ;;  %v2302_v29 = vmul.f32 %v3273_v59, %v2108_v61 }
 0x312   : > { %v2300_v9 = vmul.f32 %v3275_v7, %v2106_v54  ;;  %p3500_p5 = pnand %p3499_p11, %p3493_p7 }
 0x313   : > { %v3277_v28 = vpop.eup %3276  ;;  %2319 = vst [vmem:[#allocation2 + $0x20] sm:$0xff] %v2302_v29 }
 0x314   : > { %2317 = vst [vmem:[#allocation2 + $0x28] sm:$0xff] %v2300_v9  ;;  %v2303_v47 = vmul.f32 %v3277_v28, %v2109_v50 }
 0x315   : > { %v3279_v48 = vpop.eup %3278 }
 0x316   : > { %2320 = vst [vmem:[#allocation2 + $0x40] sm:$0xff] %v2303_v47  ;;  %v2301_v31 = vmul.f32 %v3279_v48, %v2107_v33  ;;  %v2731_v4 = vpack.c.bf16 %v2303_v47, %v2302_v29 }
 0x318   : > { %2318 = vst [vmem:[#allocation2 + $0x8] sm:$0xff] %v2301_v31  ;;  %v2726_v10 = vpack.c.bf16 %v2301_v31, %v2300_v9  ;;  %2739 = vst [vmem:[%s3964_s11 + $0x18] sm:$0xff] %v2731_v4  }
 0x31a   : > { %2738 = vst [vmem:[%s3964_s11 + $0x10] sm:$0xff] %v2726_v10  }
 0x31b   : > { %3503 = shalt.err (!%p3500_p5)
}
 0x31c   : > { %s3504_s11 = scalar_lea.hbm %s4748_s20, 512  ;;  %s3508_s26 = scalar_lea.hbm %s4887_s28, 3072 }
 0x31d   : > { %p3505_p3 = scmp.ne.s32.totalorder %s4748_s20, %s3504_s11  ;;  %p3509_p12 = scmp.lt.s32.totalorder %s4748_s20, %s4887_s28 }
 0x31e   : > { %p3510_p10 = scmp.lt.s32.totalorder %s3508_s26, %s3504_s11 }
 0x31f   : > { %p3506_p0 = pnand %p3505_p3, %p4888_p2 }
 0x320   : > { %p3511_p4 = por %p3510_p10, %p3509_p12 }
 0x321   : > { %p3507_p13 = pneg %p3506_p0 }
 0x323   : > { %p3512_p7 = pnand %p3511_p4, %p3507_p13 }
 0x325   : > { %3515 = shalt.err (!%p3512_p7)
}
 0x326   : > { %s3643_s7 = smov 64   ;;  %s3644_s30 = smov 4  }
 0x327   : > { %2986 = dma.vmem_to_hbm [thread:$0]  (%p4888_p2), %s4742_s19, 512, %s4748_s20, %s2338_s5, %s3643_s7, %s3643_s7, %s3644_s30  }
 0x328 PF: > { %p3033_p8 = scmp.ge.s32.totalorder %s3626_s23, 2  ;;  %s2389_s22 = sand.u32 1, %s3598_s16  }
 0x329   : > { %s2390_s27 = scalar_lea.sflag [#allocation6], %s2389_s22 }
 0x32a   : > { %p3014_p9 = pnand %p3033_p8, %p3888_p6 }
 0x32c   : > { %p3015_p11 = pneg %p3014_p9 }
 0x32e   : > { %3577 = dma.done.wait (%p3015_p11), %s2390_s27, 512  }
 0x32f   : > { %3579 = vsyncadd (%p3015_p11), %s2390_s27, 4294966784  ;;  %s2398_s18 = sand.u32 1, %s3586_s13   ;;  %p3017_p5 = pnand %p3033_p8, %p3913_p1 }
 0x330   : > { %s2399_s24 = scalar_lea.sflag [#allocation18], %s2398_s18 }
 0x331   : > { %p3018_p3 = pneg %p3017_p5 }
 0x333   : > { %3581 = dma.done.wait (%p3018_p3), %s2399_s24, 1024  }
 0x334   : > { %3583 = vsyncadd (%p3018_p3), %s2399_s24, 4294966272  ;;  %s33_s23 = sadd.s32 1, %s3626_s23   ;;  %s4890_s16 = sld [smem:[#allocation25_spill]] }
 0x335   : > { %p30_p2 = scmp.ge.s32.totalorder %s33_s23, 8   ;;  %s4891_s15 = sld [smem:[#allocation32_spill]] }
 0x336   : > { %s4892_s12 = sld [smem:[#allocation26_spill]]  ;;  %s4897_s13 = smov %s3590_s14 }
 0x337   : > { %s4893_s18 = sld [smem:[#allocation31_spill]]  ;;  %s4901_s19 = smov %s3618_s21 }
 0x338   : > { %s4894_s20 = sld [smem:[#allocation28_spill]] }
 0x339   : > { %s4895_s29 = sld [smem:[#allocation29_spill]] }
 0x33a   : > { %s4896_s22 = sld [smem:[#allocation30_spill]]  ;;  %s4898_s14 = smov %s4890_s16 }
 0x33b   : > { %s4899_s16 = smov %s3602_s17  ;;  %32 = sbr.rel (!%p30_p2) target bundleno = 25 (0x19), region = 160 }
 0x33c   : > { %s4900_s17 = smov %s4892_s12 }
 0x33f   : > { %s4902_s21 = smov %s4895_s29 }
 0x340   :  { %2404 = vsyncpa [#allocation5], 1 }
 0x341   :  { %2406 = vsyncpa [#allocation5 + $0x1], 1 }
 0x342   :  { %2407 = vsyncpa [#allocation8], 1 }
 0x343   :  { %2408 = vsyncpa [#allocation11], 1 }
 0x344   :  { %2409 = vsyncpa [#allocation14], 1 }
 0x345   :  { %2410 = vsyncpa [#allocation6], 1 }
 0x346   :  { %2412 = vsyncpa [#allocation6 + $0x1], 1 }
 0x347   :  { %2413 = vsyncpa [#allocation18], 1 }
 0x348   :  { %2415 = vsyncpa [#allocation18 + $0x1], 1 }

</bundles_post_ra>
